<compile_context>
chip_gen: v6e
topology: v6e:2x2x1
jax: 0.10.0
libtpu: 0.0.40
codegen_flags: <defaults>
</compile_context>

<pallas_src>
import functools

import jax
import jax.numpy as jnp
from jax.experimental import pallas as pl
from jax.experimental.pallas import tpu as pltpu

LEAKY_SLOPE = 0.2
BN_EPS = 0.8   # nn.BatchNorm2d(out_size, 0.8): second positional arg is eps


def _largest_divisor_leq(n, cap):
    cap = max(1, min(n, cap))
    for c in range(cap, 0, -1):
        if n % c == 0:
            return c
    return 1


def _pick_m_tile(m, cap=2048):
    """Largest divisor of m that is <= cap and a multiple of 8 (else m)."""
    if m <= cap:
        return m
    for c in range(cap, 7, -1):
        if m % c == 0 and c % 8 == 0:
            return c
    return m


def _hint(v, mult):
    # pl.multiple_of only applies to traced values; static ints pass through.
    return v if isinstance(v, int) else pl.multiple_of(v, mult)


# ---------------------------------------------------------------------------
# Kernel 1: 3x3 conv over the (upsampled, zero-padded) row block as 3
# lane-dense K = 3*Cin MXU matmuls per row-chunk, plus per-block BatchNorm
# partial sums (sum and sum-of-squares) computed in the same pass.
# ---------------------------------------------------------------------------
def _conv_stats_kernel(xb_ref, w_ref, conv_ref, stats_ref, *,
                       trh, w2, cin, cout, rc):
    # xb_ref   : (1, 1, trh+2, w2+2, cin)  bf16  padded upsampled rows (+halo)
    # w_ref    : (3, 3*cin, cout)          bf16  per-dy folded weights
    # conv_ref : (1, 1, trh*w2, cout)      f32   conv output for this block
    # stats_ref: (1, 1, 2, cout)           f32   [sum, sum_sq] over this block
    mrows = rc * w2
    n_chunks = trh // rc

    def chunk(c, carry):
        ssum, ssq = carry
        r0 = _hint(c * rc, rc)               # first upsampled row of chunk
        row_off = _hint(c * mrows, mrows)    # first output row of chunk

        acc = jnp.zeros((mrows, cout), jnp.float32)
        for dy in range(3):
            # Lane-dense (mrows, 3*cin) operand: the 3 dx taps concatenated
            # along the contraction dim (instead of 3 half-empty K=cin dots).
            taps = [xb_ref[0, 0, pl.ds(r0 + dy, rc), pl.ds(dx, w2), :]
                    for dx in range(3)]
            opnd = jnp.concatenate(taps, axis=-1).reshape(mrows, 3 * cin)
            acc = acc + jnp.dot(opnd, w_ref[dy],
                                preferred_element_type=jnp.float32)

        conv_ref[0, 0, pl.ds(row_off, mrows), :] = acc
        # One-pass BN partials; var = E[x^2] - mean^2 is finished outside.
        ssum = ssum + jnp.sum(acc, axis=0, keepdims=True)
        ssq = ssq + jnp.sum(acc * acc, axis=0, keepdims=True)
        return ssum, ssq

    init = (jnp.zeros((1, cout), jnp.float32),
            jnp.zeros((1, cout), jnp.float32))
    if n_chunks == 1:
        ssum, ssq = chunk(0, init)
    else:
        ssum, ssq = jax.lax.fori_loop(0, n_chunks, chunk, init,
                                      unroll=n_chunks <= 8)
    stats_ref[0, 0] = jnp.concatenate([ssum, ssq], axis=0)


# ---------------------------------------------------------------------------
# Kernel 2: y = LeakyReLU(z * scale + shift), tiled over M rows ("parallel").
# ---------------------------------------------------------------------------
def _bn_lrelu_kernel(z_ref, scale_ref, shift_ref, out_ref):
    z = z_ref[...] * scale_ref[...] + shift_ref[...]
    out_ref[...] = jnp.maximum(z, LEAKY_SLOPE * z)
    # TODO(synk): dropout > 0 would need pltpu.prng_seed + stateful_bernoulli;
    # the module default (dropout=0.0) is a no-op, so it is omitted here.


# ---------------------------------------------------------------------------
# Wrapper: NCHW API boundary, two pipelined pallas_calls, thin XLA glue.
# ---------------------------------------------------------------------------
def unet_up_forward(x_nchw, skip_nchw, params):
    """UNetUp forward. x: (N, Cin, H, W); skip: (N, Cskip, 2H, 2W); both NCHW."""
    w = params["w"]                              # (3, 3, Cin, Cout) HWIO
    gamma, beta = params["gamma"], params["beta"]

    n, cin, h, wd = x_nchw.shape
    h2, w2 = 2 * h, 2 * wd
    cout = w.shape[-1]
    m = n * h2 * w2

    # ---- XLA glue: NCHW -> NHWC, nearest 2x upsample, zero-pad 1, bf16. ----
    # (Replicating the upsample inside the kernel would cut the input HBM
    #  read a further ~4x; kept in XLA here for simplicity.)
    x_nhwc = jnp.transpose(x_nchw, (0, 2, 3, 1))
    x_up = jnp.repeat(jnp.repeat(x_nhwc, 2, axis=1), 2, axis=2)
    x_pad = jnp.pad(x_up, ((0, 0), (1, 1), (1, 1), (0, 0))).astype(jnp.bfloat16)

    # Row-block tiling of the upsampled image; each block carries its own
    # 2-row conv halo so the BlockSpec grid never needs overlapping blocks.
    trh = _largest_divisor_leq(h2, max(1, 2048 // w2))            # rows/block
    nrb = h2 // trh
    rc = _largest_divisor_leq(trh, max(1, 32768 // (w2 * cout)))  # rows/chunk
    row_idx = (jnp.arange(nrb) * trh)[:, None] + jnp.arange(trh + 2)[None, :]
    xb = x_pad[:, row_idx]                       # (N, nrb, trh+2, w2+2, cin)

    # Per-dy folded weights: w3[dy] = concat_dx W[dy, dx]  -> (3*cin, cout).
    w3 = w.reshape(3, 3 * cin, cout).astype(jnp.bfloat16)

    kern1 = functools.partial(_conv_stats_kernel, trh=trh, w2=w2,
                              cin=cin, cout=cout, rc=rc)
    conv_out, stats = pl.pallas_call(
        kern1,
        grid=(n, nrb),
        in_specs=[
            pl.BlockSpec((1, 1, trh + 2, w2 + 2, cin),
                         lambda i, r: (i, r, 0, 0, 0)),
            pl.BlockSpec((3, 3 * cin, cout), lambda i, r: (0, 0, 0)),
        ],
        out_specs=(
            pl.BlockSpec((1, 1, trh * w2, cout), lambda i, r: (i, r, 0, 0)),
            pl.BlockSpec((1, 1, 2, cout), lambda i, r: (i, r, 0, 0)),
        ),
        out_shape=(
            jax.ShapeDtypeStruct((n, nrb, trh * w2, cout), jnp.float32),
            jax.ShapeDtypeStruct((n, nrb, 2, cout), jnp.float32),
        ),
        compiler_params=pltpu.CompilerParams(
            dimension_semantics=("parallel", "parallel")),
        cost_estimate=pl.CostEstimate(
            flops=2 * m * 9 * cin * cout,
            transcendentals=0,
            bytes_accessed=(xb.size * 2 + w3.size * 2
                            + m * cout * 4 + n * nrb * 2 * cout * 4)),
    )(xb, w3)

    # ---- Finish BN stats (tiny XLA reduce): biased variance, eps = 0.8. ----
    s = jnp.sum(stats, axis=(0, 1))              # (2, cout) global partials
    mean = s[0] / m
    var = s[1] / m - mean * mean
    scale = gamma.astype(jnp.float32) * jax.lax.rsqrt(var + BN_EPS)
    shift = beta.astype(jnp.float32) - mean * scale

    # ---- Kernel 2: normalize + LeakyReLU over M-row tiles. ----
    z2d = conv_out.reshape(m, cout)
    tm = _pick_m_tile(m)
    y2d = pl.pallas_call(
        _bn_lrelu_kernel,
        grid=(m // tm,),
        in_specs=[
            pl.BlockSpec((tm, cout), lambda i: (i, 0)),
            pl.BlockSpec((1, cout), lambda i: (0, 0)),
            pl.BlockSpec((1, cout), lambda i: (0, 0)),
        ],
        out_specs=pl.BlockSpec((tm, cout), lambda i: (i, 0)),
        out_shape=jax.ShapeDtypeStruct((m, cout), jnp.float32),
        compiler_params=pltpu.CompilerParams(
            dimension_semantics=("parallel",)),
    )(z2d, scale.reshape(1, cout), shift.reshape(1, cout))

    # ---- torch.cat((x, skip), dim=1): skip stays in XLA / NCHW and never
    # transits a kernel's VPU/store path. ----
    y_nchw = jnp.transpose(y2d.reshape(n, h2, w2, cout), (0, 3, 1, 2))
    return jnp.concatenate([y_nchw, skip_nchw], axis=1)


# ---------------------------------------------------------------------------
# Parameter init (PyTorch defaults) and a pure-JAX f32 reference.
# ---------------------------------------------------------------------------
def init_params(key, in_size, out_size):
    kw, kb = jax.random.split(key)
    fan_in = in_size * 9
    bound = 1.0 / float(fan_in) ** 0.5
    w = jax.random.uniform(kw, (3, 3, in_size, out_size), jnp.float32,
                           -bound, bound)                  # HWIO layout
    b = jax.random.uniform(kb, (out_size,), jnp.float32, -bound, bound)
    gamma = jnp.ones((out_size,), jnp.float32)             # BatchNorm weight
    beta = jnp.zeros((out_size,), jnp.float32)             # BatchNorm bias
    return dict(w=w, b=b, gamma=gamma, beta=beta)


def unet_up_reference(x, skip, params):
    """f32 reference mirroring the PyTorch module (including the conv bias)."""
    w, b = params["w"], params["b"]
    gamma, beta = params["gamma"], params["beta"]
    x_up = jnp.repeat(jnp.repeat(x, 2, axis=2), 2, axis=3)          # nearest 2x
    y = jax.lax.conv_general_dilated(
        x_up, w, window_strides=(1, 1), padding=((1, 1), (1, 1)),
        dimension_numbers=("NCHW", "HWIO", "NCHW"))
    y = y + b.reshape(1, -1, 1, 1)
    mean = jnp.mean(y, axis=(0, 2, 3), keepdims=True)
    var = jnp.mean(jnp.square(y - mean), axis=(0, 2, 3), keepdims=True)
    y = (y - mean) * jax.lax.rsqrt(var + BN_EPS)
    y = y * gamma.reshape(1, -1, 1, 1) + beta.reshape(1, -1, 1, 1)
    y = jnp.where(y >= 0.0, y, LEAKY_SLOPE * y)
    return jnp.concatenate([y, skip], axis=1)


if __name__ == "__main__":
    key = jax.random.PRNGKey(0)
    kx, ks, kp = jax.random.split(key, 3)

    N, CIN, H, W = 2, 64, 8, 8
    COUT = 128                                  # skip carries COUT channels (U-Net)
    x = jax.random.normal(kx, (N, CIN, H, W), jnp.float32)            # NCHW
    skip = jax.random.normal(ks, (N, COUT, 2 * H, 2 * W), jnp.float32)
    params = init_params(kp, CIN, COUT)

    fwd = jax.jit(unet_up_forward)
    out = jax.block_until_ready(fwd(x, skip, params))

    assert out.shape == (N, 2 * COUT, 2 * H, 2 * W), out.shape
    assert out.dtype == jnp.float32

    ref = unet_up_reference(x, skip, params)
    err = float(jnp.max(jnp.abs(out - ref)))
    assert err < 5e-2, f"max abs err {err}"     # bf16 matmul vs f32 reference

    print("KERNEL_OK")
</pallas_src>

<mosaic_0001>
module attributes {stable_mosaic.version = 11 : i64} {
  func.func @_bn_lrelu_kernel(%arg0: i32, %arg1: memref<512x128xf32, #tpu.memory_space<vmem>>, %arg2: memref<1x128xf32, #tpu.memory_space<vmem>>, %arg3: memref<1x128xf32, #tpu.memory_space<vmem>>, %arg4: memref<512x128xf32, #tpu.memory_space<vmem>>) attributes {dimension_semantics = [#tpu.dimension_semantics<parallel>], iteration_bounds = array<i64: 1>, scalar_prefetch = 0 : i64, scratch_operands = 0 : i64, tpu.core_type = #tpu.core_type<tc>, window_params = [{transform_indices = @transform_0, window_bounds = array<i64: 512, 128>}, {pipeline_mode = #tpu.pipeline_mode<synchronous>, transform_indices = @transform_1, window_bounds = array<i64: 1, 128>}, {pipeline_mode = #tpu.pipeline_mode<synchronous>, transform_indices = @transform_2, window_bounds = array<i64: 1, 128>}, {transform_indices = @transform_3, window_bounds = array<i64: 512, 128>}]} {
    %c0 = arith.constant 0 : index
    %c0_0 = arith.constant 0 : index
    %0 = vector.load %arg1[%c0, %c0_0] : memref<512x128xf32, #tpu.memory_space<vmem>>, vector<512x128xf32>
    %c0_1 = arith.constant 0 : index
    %c0_2 = arith.constant 0 : index
    %1 = vector.load %arg2[%c0_1, %c0_2] : memref<1x128xf32, #tpu.memory_space<vmem>>, vector<1x128xf32>
    %2 = vector.broadcast %1 : vector<1x128xf32> to vector<512x128xf32>
    %3 = arith.mulf %0, %2 : vector<512x128xf32>
    %c0_3 = arith.constant 0 : index
    %c0_4 = arith.constant 0 : index
    %4 = vector.load %arg3[%c0_3, %c0_4] : memref<1x128xf32, #tpu.memory_space<vmem>>, vector<1x128xf32>
    %5 = vector.broadcast %4 : vector<1x128xf32> to vector<512x128xf32>
    %6 = arith.addf %3, %5 : vector<512x128xf32>
    %cst = arith.constant 2.000000e-01 : f32
    %7 = vector.broadcast %cst : f32 to vector<512x128xf32>
    %8 = arith.mulf %7, %6 : vector<512x128xf32>
    %9 = arith.maximumf %6, %8 : vector<512x128xf32>
    %c0_5 = arith.constant 0 : index
    %c0_6 = arith.constant 0 : index
    %10 = vector.load %arg4[%c0_5, %c0_6] : memref<512x128xf32, #tpu.memory_space<vmem>>, vector<512x128xf32>
    tpu.vector_store %arg4[%c0_5, %c0_6], %9 {strides = array<i32>} : memref<512x128xf32, #tpu.memory_space<vmem>>, vector<512x128xf32>,
    return
  }
  func.func @transform_0(%arg0: i32) -> (i32, i32) {
    %c0_i32 = arith.constant 0 : i32
    %c0_i32_0 = arith.constant 0 : i32
    return %arg0, %c0_i32 : i32, i32
  }
  func.func @transform_1(%arg0: i32) -> (i32, i32) {
    %c0_i32 = arith.constant 0 : i32
    %c0_i32_0 = arith.constant 0 : i32
    %c0_i32_1 = arith.constant 0 : i32
    return %c0_i32, %c0_i32_0 : i32, i32
  }
  func.func @transform_2(%arg0: i32) -> (i32, i32) {
    %c0_i32 = arith.constant 0 : i32
    %c0_i32_0 = arith.constant 0 : i32
    %c0_i32_1 = arith.constant 0 : i32
    return %c0_i32, %c0_i32_0 : i32, i32
  }
  func.func @transform_3(%arg0: i32) -> (i32, i32) {
    %c0_i32 = arith.constant 0 : i32
    %c0_i32_0 = arith.constant 0 : i32
    return %arg0, %c0_i32 : i32, i32
  }
}

module attributes {stable_mosaic.version = 11 : i64} {
  func.func @_conv_stats_kernel(%arg0: i32, %arg1: i32, %arg2: memref<1x1x18x18x64xbf16, #tpu.memory_space<vmem>>, %arg3: memref<3x192x128xbf16, #tpu.memory_space<vmem>>, %arg4: memref<1x1x256x128xf32, #tpu.memory_space<vmem>>, %arg5: memref<1x1x2x128xf32, #tpu.memory_space<vmem>>) attributes {dimension_semantics = [#tpu.dimension_semantics<parallel>, #tpu.dimension_semantics<parallel>], iteration_bounds = array<i64: 2, 1>, scalar_prefetch = 0 : i64, scratch_operands = 0 : i64, tpu.core_type = #tpu.core_type<tc>, window_params = [{transform_indices = @transform_0, window_bounds = array<i64: 1, 1, 18, 18, 64>}, {pipeline_mode = #tpu.pipeline_mode<synchronous>, transform_indices = @transform_1, window_bounds = array<i64: 3, 192, 128>}, {transform_indices = @transform_2, window_bounds = array<i64: 1, 1, 256, 128>}, {transform_indices = @transform_3, window_bounds = array<i64: 1, 1, 2, 128>}]} {
    %cst = arith.constant 0.000000e+00 : f32
    %0 = vector.broadcast %cst : f32 to vector<1x128xf32>
    %cst_0 = arith.constant 0.000000e+00 : f32
    %1 = vector.broadcast %cst_0 : f32 to vector<1x128xf32>
    %cst_1 = arith.constant 0.000000e+00 : f32
    %2 = vector.broadcast %cst_1 : f32 to vector<256x128xf32>
    %c0 = arith.constant 0 : index
    %c0_2 = arith.constant 0 : index
    %c0_3 = arith.constant 0 : index
    %c0_4 = arith.constant 0 : index
    %c0_5 = arith.constant 0 : index
    %3 = vector.load %arg2[%c0, %c0_2, %c0_3, %c0_4, %c0_5] : memref<1x1x18x18x64xbf16, #tpu.memory_space<vmem>>, vector<1x1x16x16x64xbf16>
    %4 = vector.shape_cast %3 : vector<1x1x16x16x64xbf16> to vector<16x16x64xbf16>
    %c0_6 = arith.constant 0 : index
    %c0_7 = arith.constant 0 : index
    %c0_8 = arith.constant 0 : index
    %c1 = arith.constant 1 : index
    %c0_9 = arith.constant 0 : index
    %5 = vector.load %arg2[%c0_6, %c0_7, %c0_8, %c1, %c0_9] : memref<1x1x18x18x64xbf16, #tpu.memory_space<vmem>>, vector<1x1x16x16x64xbf16>
    %6 = vector.shape_cast %5 : vector<1x1x16x16x64xbf16> to vector<16x16x64xbf16>
    %c0_10 = arith.constant 0 : index
    %c0_11 = arith.constant 0 : index
    %c0_12 = arith.constant 0 : index
    %c2 = arith.constant 2 : index
    %c0_13 = arith.constant 0 : index
    %7 = vector.load %arg2[%c0_10, %c0_11, %c0_12, %c2, %c0_13] : memref<1x1x18x18x64xbf16, #tpu.memory_space<vmem>>, vector<1x1x16x16x64xbf16>
    %8 = vector.shape_cast %7 : vector<1x1x16x16x64xbf16> to vector<16x16x64xbf16>
    %9 = tpu.concatenate %4, %6, %8 in 2 : vector<16x16x64xbf16>, vector<16x16x64xbf16>, vector<16x16x64xbf16> -> vector<16x16x192xbf16>
    %10 = vector.shape_cast %9 : vector<16x16x192xbf16> to vector<256x192xbf16>
    %c0_14 = arith.constant 0 : index
    %c0_15 = arith.constant 0 : index
    %c0_16 = arith.constant 0 : index
    %11 = vector.load %arg3[%c0_14, %c0_15, %c0_16] : memref<3x192x128xbf16, #tpu.memory_space<vmem>>, vector<1x192x128xbf16>
    %12 = vector.shape_cast %11 : vector<1x192x128xbf16> to vector<192x128xbf16>
    %cst_17 = arith.constant dense<0.000000e+00> : vector<256x128xf32>
    %13 = tpu.matmul %10, %12, %cst_17 {dimension_numbers = #tpu.dot_dimension_numbers<[1], [0], [0], [1], [0, 0, 1, 1], [], []>} : vector<256x192xbf16>, vector<192x128xbf16>, vector<256x128xf32> -> vector<256x128xf32>
    %14 = arith.addf %2, %13 : vector<256x128xf32>
    %c0_18 = arith.constant 0 : index
    %c0_19 = arith.constant 0 : index
    %c1_20 = arith.constant 1 : index
    %c0_21 = arith.constant 0 : index
    %c0_22 = arith.constant 0 : index
    %15 = vector.load %arg2[%c0_18, %c0_19, %c1_20, %c0_21, %c0_22] : memref<1x1x18x18x64xbf16, #tpu.memory_space<vmem>>, vector<1x1x16x16x64xbf16>
    %16 = vector.shape_cast %15 : vector<1x1x16x16x64xbf16> to vector<16x16x64xbf16>
    %c0_23 = arith.constant 0 : index
    %c0_24 = arith.constant 0 : index
    %c1_25 = arith.constant 1 : index
    %c1_26 = arith.constant 1 : index
    %c0_27 = arith.constant 0 : index
    %17 = vector.load %arg2[%c0_23, %c0_24, %c1_25, %c1_26, %c0_27] : memref<1x1x18x18x64xbf16, #tpu.memory_space<vmem>>, vector<1x1x16x16x64xbf16>
    %18 = vector.shape_cast %17 : vector<1x1x16x16x64xbf16> to vector<16x16x64xbf16>
    %c0_28 = arith.constant 0 : index
    %c0_29 = arith.constant 0 : index
    %c1_30 = arith.constant 1 : index
    %c2_31 = arith.constant 2 : index
    %c0_32 = arith.constant 0 : index
    %19 = vector.load %arg2[%c0_28, %c0_29, %c1_30, %c2_31, %c0_32] : memref<1x1x18x18x64xbf16, #tpu.memory_space<vmem>>, vector<1x1x16x16x64xbf16>
    %20 = vector.shape_cast %19 : vector<1x1x16x16x64xbf16> to vector<16x16x64xbf16>
    %21 = tpu.concatenate %16, %18, %20 in 2 : vector<16x16x64xbf16>, vector<16x16x64xbf16>, vector<16x16x64xbf16> -> vector<16x16x192xbf16>
    %22 = vector.shape_cast %21 : vector<16x16x192xbf16> to vector<256x192xbf16>
    %c1_33 = arith.constant 1 : index
    %c0_34 = arith.constant 0 : index
    %c0_35 = arith.constant 0 : index
    %23 = vector.load %arg3[%c1_33, %c0_34, %c0_35] : memref<3x192x128xbf16, #tpu.memory_space<vmem>>, vector<1x192x128xbf16>
    %24 = vector.shape_cast %23 : vector<1x192x128xbf16> to vector<192x128xbf16>
    %cst_36 = arith.constant dense<0.000000e+00> : vector<256x128xf32>
    %25 = tpu.matmul %22, %24, %cst_36 {dimension_numbers = #tpu.dot_dimension_numbers<[1], [0], [0], [1], [0, 0, 1, 1], [], []>} : vector<256x192xbf16>, vector<192x128xbf16>, vector<256x128xf32> -> vector<256x128xf32>
    %26 = arith.addf %14, %25 : vector<256x128xf32>
    %c0_37 = arith.constant 0 : index
    %c0_38 = arith.constant 0 : index
    %c2_39 = arith.constant 2 : index
    %c0_40 = arith.constant 0 : index
    %c0_41 = arith.constant 0 : index
    %27 = vector.load %arg2[%c0_37, %c0_38, %c2_39, %c0_40, %c0_41] : memref<1x1x18x18x64xbf16, #tpu.memory_space<vmem>>, vector<1x1x16x16x64xbf16>
    %28 = vector.shape_cast %27 : vector<1x1x16x16x64xbf16> to vector<16x16x64xbf16>
    %c0_42 = arith.constant 0 : index
    %c0_43 = arith.constant 0 : index
    %c2_44 = arith.constant 2 : index
    %c1_45 = arith.constant 1 : index
    %c0_46 = arith.constant 0 : index
    %29 = vector.load %arg2[%c0_42, %c0_43, %c2_44, %c1_45, %c0_46] : memref<1x1x18x18x64xbf16, #tpu.memory_space<vmem>>, vector<1x1x16x16x64xbf16>
    %30 = vector.shape_cast %29 : vector<1x1x16x16x64xbf16> to vector<16x16x64xbf16>
    %c0_47 = arith.constant 0 : index
    %c0_48 = arith.constant 0 : index
    %c2_49 = arith.constant 2 : index
    %c2_50 = arith.constant 2 : index
    %c0_51 = arith.constant 0 : index
    %31 = vector.load %arg2[%c0_47, %c0_48, %c2_49, %c2_50, %c0_51] : memref<1x1x18x18x64xbf16, #tpu.memory_space<vmem>>, vector<1x1x16x16x64xbf16>
    %32 = vector.shape_cast %31 : vector<1x1x16x16x64xbf16> to vector<16x16x64xbf16>
    %33 = tpu.concatenate %28, %30, %32 in 2 : vector<16x16x64xbf16>, vector<16x16x64xbf16>, vector<16x16x64xbf16> -> vector<16x16x192xbf16>
    %34 = vector.shape_cast %33 : vector<16x16x192xbf16> to vector<256x192xbf16>
    %c2_52 = arith.constant 2 : index
    %c0_53 = arith.constant 0 : index
    %c0_54 = arith.constant 0 : index
    %35 = vector.load %arg3[%c2_52, %c0_53, %c0_54] : memref<3x192x128xbf16, #tpu.memory_space<vmem>>, vector<1x192x128xbf16>
    %36 = vector.shape_cast %35 : vector<1x192x128xbf16> to vector<192x128xbf16>
    %cst_55 = arith.constant dense<0.000000e+00> : vector<256x128xf32>
    %37 = tpu.matmul %34, %36, %cst_55 {dimension_numbers = #tpu.dot_dimension_numbers<[1], [0], [0], [1], [0, 0, 1, 1], [], []>} : vector<256x192xbf16>, vector<192x128xbf16>, vector<256x128xf32> -> vector<256x128xf32>
    %38 = arith.addf %26, %37 : vector<256x128xf32>
    %c0_56 = arith.constant 0 : index
    %c0_57 = arith.constant 0 : index
    %c0_58 = arith.constant 0 : index
    %c0_59 = arith.constant 0 : index
    %39 = vector.load %arg4[%c0_56, %c0_57, %c0_58, %c0_59] : memref<1x1x256x128xf32, #tpu.memory_space<vmem>>, vector<1x1x256x128xf32>
    %40 = vector.shape_cast %39 : vector<1x1x256x128xf32> to vector<256x128xf32>
    %41 = vector.shape_cast %38 : vector<256x128xf32> to vector<1x1x256x128xf32>
    tpu.vector_store %arg4[%c0_56, %c0_57, %c0_58, %c0_59], %41 {strides = array<i32>} : memref<1x1x256x128xf32, #tpu.memory_space<vmem>>, vector<1x1x256x128xf32>,
    %cst_60 = arith.constant dense<0.000000e+00> : vector<128xf32>
    %42 = vector.multi_reduction <add>, %38, %cst_60 [0] : vector<256x128xf32> to vector<128xf32>
    %43 = vector.shape_cast %42 : vector<128xf32> to vector<1x128xf32>
    %44 = arith.addf %0, %43 : vector<1x128xf32>
    %45 = arith.mulf %38, %38 : vector<256x128xf32>
    %cst_61 = arith.constant dense<0.000000e+00> : vector<128xf32>
    %46 = vector.multi_reduction <add>, %45, %cst_61 [0] : vector<256x128xf32> to vector<128xf32>
    %47 = vector.shape_cast %46 : vector<128xf32> to vector<1x128xf32>
    %48 = arith.addf %1, %47 : vector<1x128xf32>
    %49 = tpu.concatenate %44, %48 in 0 : vector<1x128xf32>, vector<1x128xf32> -> vector<2x128xf32>
    %c0_62 = arith.constant 0 : index
    %c0_63 = arith.constant 0 : index
    %c0_64 = arith.constant 0 : index
    %c0_65 = arith.constant 0 : index
    %50 = vector.load %arg5[%c0_62, %c0_63, %c0_64, %c0_65] : memref<1x1x2x128xf32, #tpu.memory_space<vmem>>, vector<1x1x2x128xf32>
    %51 = vector.shape_cast %50 : vector<1x1x2x128xf32> to vector<2x128xf32>
    %52 = vector.shape_cast %49 : vector<2x128xf32> to vector<1x1x2x128xf32>
    tpu.vector_store %arg5[%c0_62, %c0_63, %c0_64, %c0_65], %52 {strides = array<i32>} : memref<1x1x2x128xf32, #tpu.memory_space<vmem>>, vector<1x1x2x128xf32>,
    return
  }
  func.func @transform_0(%arg0: i32, %arg1: i32) -> (i32, i32, i32, i32, i32) {
    %c0_i32 = arith.constant 0 : i32
    %c0_i32_0 = arith.constant 0 : i32
    %c0_i32_1 = arith.constant 0 : i32
    %c0_i32_2 = arith.constant 0 : i32
    return %arg0, %arg1, %c0_i32, %c0_i32_0, %c0_i32_1 : i32, i32, i32, i32, i32
  }
  func.func @transform_1(%arg0: i32, %arg1: i32) -> (i32, i32, i32) {
    %c0_i32 = arith.constant 0 : i32
    %c0_i32_0 = arith.constant 0 : i32
    %c0_i32_1 = arith.constant 0 : i32
    %c0_i32_2 = arith.constant 0 : i32
    return %c0_i32, %c0_i32_0, %c0_i32_1 : i32, i32, i32
  }
  func.func @transform_2(%arg0: i32, %arg1: i32) -> (i32, i32, i32, i32) {
    %c0_i32 = arith.constant 0 : i32
    %c0_i32_0 = arith.constant 0 : i32
    %c0_i32_1 = arith.constant 0 : i32
    return %arg0, %arg1, %c0_i32, %c0_i32_0 : i32, i32, i32, i32
  }
  func.func @transform_3(%arg0: i32, %arg1: i32) -> (i32, i32, i32, i32) {
    %c0_i32 = arith.constant 0 : i32
    %c0_i32_0 = arith.constant 0 : i32
    %c0_i32_1 = arith.constant 0 : i32
    return %arg0, %arg1, %c0_i32, %c0_i32_0 : i32, i32, i32, i32
  }
}

</mosaic_0001>

<bundles_post_ra>
// kernel: unet_up_forward.3
= control target key start
LH: loop header
LB: loop body
LE: loop exit
PB: predicated region body
PF: predicated region fallthrough
CT: control target
= control target key end

     0   :  { %s960_s0 = inlined_call_operand.vmem [shape: f32[512,128], index: 0, kind: input, shape index: {}]   ;;  %s961_s1 = inlined_call_operand.vmem [shape: f32[1,128], index: 1, kind: input, shape index: {}]   ;;  %s962_s2 = inlined_call_operand.vmem [shape: f32[1,128], index: 2, kind: input, shape index: {}]   ;;  %s963_s3 = inlined_call_operand.vmem [shape: f32[512,128], index: 3, kind: output, shape index: {}]  }
   0x1   :  { %v14_v0 = vld [vmem:[%s960_s0] sm:$0xff]  ;;  %v15_v4 = vld [vmem:[%s960_s0 + $0x8] sm:$0xff]  ;;  %v16_v5 = vld [vmem:[%s960_s0 + $0x10] sm:$0xff] }
   0x2   :  { %v444_v1 = vld [vmem:[%s961_s1] ss:$0 sm:$0xff]  ;;  %v17_v6 = vld [vmem:[%s960_s0 + $0x18] sm:$0xff]  ;;  %v19_v11 = vld [vmem:[%s960_s0 + $0x28] sm:$0xff] }
   0x3   :  { %v449_v2 = vld [vmem:[%s962_s2] ss:$0 sm:$0xff]  ;;  %v85_v3 = vmul.f32 %v444_v1, %v14_v0  ;;  %v86_v7 = vmul.f32 %v444_v1, %v15_v4  ;;  %v87_v8 = vmul.f32 %v444_v1, %v16_v5  ;;  %v88_v9 = vmul.f32 %v444_v1, %v17_v6  ;;  %v20_v12 = vld [vmem:[%s960_s0 + $0x30] sm:$0xff]  ;;  %v21_v17 = vld [vmem:[%s960_s0 + $0x38] sm:$0xff] }
   0x4   :  { %v18_v10 = vld [vmem:[%s960_s0 + $0x20] sm:$0xff]  ;;  %v90_v15 = vmul.f32 %v444_v1, %v19_v11  ;;  %v91_v16 = vmul.f32 %v444_v1, %v20_v12  ;;  %v92_v21 = vmul.f32 %v444_v1, %v21_v17  ;;  %v23_v27 = vld [vmem:[%s960_s0 + $0x48] sm:$0xff]  ;;  %v24_v28 = vld [vmem:[%s960_s0 + $0x50] sm:$0xff] }
   0x5   :  { %v156_v13 = vadd.f32 %v449_v2, %v85_v3  ;;  %v89_v14 = vmul.f32 %v444_v1, %v18_v10  ;;  %v157_v18 = vadd.f32 %v449_v2, %v86_v7  ;;  %v158_v19 = vadd.f32 %v449_v2, %v87_v8  ;;  %v22_v22 = vld [vmem:[%s960_s0 + $0x40] sm:$0xff]  ;;  %v25_v29 = vld [vmem:[%s960_s0 + $0x58] sm:$0xff]  ;;  %v27_v43 = vld [vmem:[%s960_s0 + $0x68] sm:$0xff] }
   0x6   :  { %v159_v20 = vadd.f32 %v449_v2, %v88_v9  ;;  %v161_v25 = vadd.f32 %v449_v2, %v90_v15  ;;  %v162_v26 = vadd.f32 %v449_v2, %v91_v16  ;;  %v163_v33 = vadd.f32 %v449_v2, %v92_v21  ;;  %v26_v42 = vld [vmem:[%s960_s0 + $0x60] sm:$0xff]  ;;  %v28_v44 = vld [vmem:[%s960_s0 + $0x70] sm:$0xff]  ;;  %v29_v49 = vld [vmem:[%s960_s0 + $0x78] sm:$0xff] }
   0x7   :  { %v220_v23 = vmul.f32 0.2, %v156_v13  ;;  %v160_v24 = vadd.f32 %v449_v2, %v89_v14  ;;  %v221_v30 = vmul.f32 0.2, %v157_v18  ;;  %v222_v31 = vmul.f32 0.2, %v158_v19 }
   0x8   :  { %v223_v32 = vmul.f32 0.2, %v159_v20  ;;  %v225_v36 = vmul.f32 0.2, %v161_v25  ;;  %v226_v37 = vmul.f32 0.2, %v162_v26  ;;  %v93_v48 = vmul.f32 %v444_v1, %v22_v22 }
   0x9   :  { %v284_v34 = vmax.f32 %v156_v13, %v220_v23  ;;  %v224_v35 = vmul.f32 0.2, %v160_v24  ;;  %v285_v38 = vmax.f32 %v157_v18, %v221_v30  ;;  %v286_v39 = vmax.f32 %v158_v19, %v222_v31  ;;  %v30_v62 = vld [vmem:[%s960_s0 + $0x80] sm:$0xff]  ;;  %v31_v5 = vld [vmem:[%s960_s0 + $0x88] sm:$0xff]  ;;  %v32_v6 = vld [vmem:[%s960_s0 + $0x90] sm:$0xff] }
   0xa   :  { %v287_v40 = vmax.f32 %v159_v20, %v223_v32  ;;  %v227_v41 = vmul.f32 0.2, %v163_v33  ;;  %v289_v46 = vmax.f32 %v161_v25, %v225_v36  ;;  %v290_v47 = vmax.f32 %v162_v26, %v226_v37  ;;  %v33_v7 = vld [vmem:[%s960_s0 + $0x98] sm:$0xff]  ;;  %v34_v20 = vld [vmem:[%s960_s0 + $0xa0] sm:$0xff]  ;;  %v35_v21 = vld [vmem:[%s960_s0 + $0xa8] sm:$0xff] }
   0xb   :  { %348 = vst [vmem:[%s963_s3] sm:$0xff] %v284_v34  ;;  %v288_v45 = vmax.f32 %v160_v24, %v224_v35  ;;  %349 = vst [vmem:[%s963_s3 + $0x8] sm:$0xff] %v285_v38  ;;  %v94_v51 = vmul.f32 %v444_v1, %v23_v27  ;;  %v95_v52 = vmul.f32 %v444_v1, %v24_v28  ;;  %v36_v22 = vld [vmem:[%s960_s0 + $0xb0] sm:$0xff]  ;;  %v37_v27 = vld [vmem:[%s960_s0 + $0xb8] sm:$0xff] }
   0xc   :  { %350 = vst [vmem:[%s963_s3 + $0x10] sm:$0xff] %v286_v39  ;;  %351 = vst [vmem:[%s963_s3 + $0x18] sm:$0xff] %v287_v40  ;;  %v291_v50 = vmax.f32 %v163_v33, %v227_v41  ;;  %v96_v53 = vmul.f32 %v444_v1, %v25_v29  ;;  %v164_v54 = vadd.f32 %v449_v2, %v93_v48  ;;  %v38_v40 = vld [vmem:[%s960_s0 + $0xc0] sm:$0xff] }
   0xd   :  { %352 = vst [vmem:[%s963_s3 + $0x20] sm:$0xff] %v288_v45  ;;  %353 = vst [vmem:[%s963_s3 + $0x28] sm:$0xff] %v289_v46  ;;  %v97_v55 = vmul.f32 %v444_v1, %v26_v42  ;;  %v98_v56 = vmul.f32 %v444_v1, %v27_v43  ;;  %v99_v57 = vmul.f32 %v444_v1, %v28_v44  ;;  %v39_v45 = vld [vmem:[%s960_s0 + $0xc8] sm:$0xff]  ;;  %v40_v46 = vld [vmem:[%s960_s0 + $0xd0] sm:$0xff] }
   0xe   :  { %354 = vst [vmem:[%s963_s3 + $0x30] sm:$0xff] %v290_v47  ;;  %355 = vst [vmem:[%s963_s3 + $0x38] sm:$0xff] %v291_v50  ;;  %v165_v58 = vadd.f32 %v449_v2, %v94_v51  ;;  %v166_v59 = vadd.f32 %v449_v2, %v95_v52  ;;  %v167_v60 = vadd.f32 %v449_v2, %v96_v53  ;;  %v228_v63 = vmul.f32 0.2, %v164_v54  ;;  %v41_v47 = vld [vmem:[%s960_s0 + $0xd8] sm:$0xff] }
   0xf   :  { %v100_v61 = vmul.f32 %v444_v1, %v29_v49  ;;  %v168_v0 = vadd.f32 %v449_v2, %v97_v55  ;;  %v169_v3 = vadd.f32 %v449_v2, %v98_v56  ;;  %v170_v4 = vadd.f32 %v449_v2, %v99_v57 }
  0x10   :  { %v229_v8 = vmul.f32 0.2, %v165_v58  ;;  %v230_v9 = vmul.f32 0.2, %v166_v59  ;;  %v231_v10 = vmul.f32 0.2, %v167_v60  ;;  %v292_v12 = vmax.f32 %v164_v54, %v228_v63 }
  0x11   :  { %v171_v11 = vadd.f32 %v449_v2, %v100_v61  ;;  %v232_v13 = vmul.f32 0.2, %v168_v0  ;;  %v233_v14 = vmul.f32 0.2, %v169_v3  ;;  %v234_v15 = vmul.f32 0.2, %v170_v4 }
  0x12   :  { %v293_v16 = vmax.f32 %v165_v58, %v229_v8  ;;  %v294_v17 = vmax.f32 %v166_v59, %v230_v9  ;;  %v295_v18 = vmax.f32 %v167_v60, %v231_v10  ;;  %356 = vst [vmem:[%s963_s3 + $0x40] sm:$0xff] %v292_v12  ;;  %v101_v26 = vmul.f32 %v444_v1, %v30_v62  ;;  %v42_v60 = vld [vmem:[%s960_s0 + $0xe0] sm:$0xff]  ;;  %v43_v61 = vld [vmem:[%s960_s0 + $0xe8] sm:$0xff]  ;;  %v44_v62 = vld [vmem:[%s960_s0 + $0xf0] sm:$0xff] }
  0x13   :  { %v235_v19 = vmul.f32 0.2, %v171_v11  ;;  %v296_v23 = vmax.f32 %v168_v0, %v232_v13  ;;  %v297_v24 = vmax.f32 %v169_v3, %v233_v14  ;;  %v298_v25 = vmax.f32 %v170_v4, %v234_v15 }
  0x14   :  { %357 = vst [vmem:[%s963_s3 + $0x48] sm:$0xff] %v293_v16  ;;  %358 = vst [vmem:[%s963_s3 + $0x50] sm:$0xff] %v294_v17  ;;  %v102_v29 = vmul.f32 %v444_v1, %v31_v5  ;;  %v103_v30 = vmul.f32 %v444_v1, %v32_v6  ;;  %v104_v31 = vmul.f32 %v444_v1, %v33_v7  ;;  %v45_v5 = vld [vmem:[%s960_s0 + $0xf8] sm:$0xff] }
  0x15   :  { %359 = vst [vmem:[%s963_s3 + $0x58] sm:$0xff] %v295_v18  ;;  %v299_v28 = vmax.f32 %v171_v11, %v235_v19  ;;  %360 = vst [vmem:[%s963_s3 + $0x60] sm:$0xff] %v296_v23  ;;  %v172_v32 = vadd.f32 %v449_v2, %v101_v26  ;;  %v105_v33 = vmul.f32 %v444_v1, %v34_v20  ;;  %v46_v18 = vld [vmem:[%s960_s0 + $0x100] sm:$0xff]  ;;  %v47_v23 = vld [vmem:[%s960_s0 + $0x108] sm:$0xff] }
  0x16   :  { %361 = vst [vmem:[%s963_s3 + $0x68] sm:$0xff] %v297_v24  ;;  %362 = vst [vmem:[%s963_s3 + $0x70] sm:$0xff] %v298_v25  ;;  %v106_v34 = vmul.f32 %v444_v1, %v35_v21  ;;  %v107_v35 = vmul.f32 %v444_v1, %v36_v22  ;;  %v173_v36 = vadd.f32 %v449_v2, %v102_v29  ;;  %v48_v24 = vld [vmem:[%s960_s0 + $0x110] sm:$0xff]  ;;  %v49_v25 = vld [vmem:[%s960_s0 + $0x118] sm:$0xff] }
  0x17   :  { %363 = vst [vmem:[%s963_s3 + $0x78] sm:$0xff] %v299_v28  ;;  %v174_v37 = vadd.f32 %v449_v2, %v103_v30  ;;  %v175_v38 = vadd.f32 %v449_v2, %v104_v31  ;;  %v108_v39 = vmul.f32 %v444_v1, %v37_v27  ;;  %v236_v41 = vmul.f32 0.2, %v172_v32 }
  0x18   :  { %v176_v42 = vadd.f32 %v449_v2, %v105_v33  ;;  %v177_v43 = vadd.f32 %v449_v2, %v106_v34  ;;  %v178_v44 = vadd.f32 %v449_v2, %v107_v35  ;;  %v237_v48 = vmul.f32 0.2, %v173_v36 }
  0x19   :  { %v238_v49 = vmul.f32 0.2, %v174_v37  ;;  %v239_v50 = vmul.f32 0.2, %v175_v38  ;;  %v179_v51 = vadd.f32 %v449_v2, %v108_v39  ;;  %v300_v52 = vmax.f32 %v172_v32, %v236_v41  ;;  %v51_v39 = vld [vmem:[%s960_s0 + $0x128] sm:$0xff] }
  0x1a   :  { %v240_v53 = vmul.f32 0.2, %v176_v42  ;;  %v241_v54 = vmul.f32 0.2, %v177_v43  ;;  %v242_v55 = vmul.f32 0.2, %v178_v44  ;;  %v301_v56 = vmax.f32 %v173_v36, %v237_v48 }
  0x1b   :  { %v302_v57 = vmax.f32 %v174_v37, %v238_v49  ;;  %v303_v58 = vmax.f32 %v175_v38, %v239_v50  ;;  %v243_v59 = vmul.f32 0.2, %v179_v51  ;;  %364 = vst [vmem:[%s963_s3 + $0x80] sm:$0xff] %v300_v52  ;;  %v109_v4 = vmul.f32 %v444_v1, %v38_v40  ;;  %v50_v38 = vld [vmem:[%s960_s0 + $0x120] sm:$0xff]  ;;  %v52_v40 = vld [vmem:[%s960_s0 + $0x130] sm:$0xff] }
  0x1c   :  { %v304_v63 = vmax.f32 %v176_v42, %v240_v53  ;;  %v305_v0 = vmax.f32 %v177_v43, %v241_v54  ;;  %v306_v3 = vmax.f32 %v178_v44, %v242_v55  ;;  %365 = vst [vmem:[%s963_s3 + $0x88] sm:$0xff] %v301_v56  ;;  %v110_v7 = vmul.f32 %v444_v1, %v39_v45  ;;  %v53_v45 = vld [vmem:[%s960_s0 + $0x138] sm:$0xff] }
  0x1d   :  { %366 = vst [vmem:[%s963_s3 + $0x90] sm:$0xff] %v302_v57  ;;  %367 = vst [vmem:[%s963_s3 + $0x98] sm:$0xff] %v303_v58  ;;  %v307_v6 = vmax.f32 %v179_v51, %v243_v59  ;;  %v111_v8 = vmul.f32 %v444_v1, %v40_v46  ;;  %v112_v9 = vmul.f32 %v444_v1, %v41_v47  ;;  %v54_v58 = vld [vmem:[%s960_s0 + $0x140] sm:$0xff] }
  0x1e   :  { %368 = vst [vmem:[%s963_s3 + $0xa0] sm:$0xff] %v304_v63  ;;  %369 = vst [vmem:[%s963_s3 + $0xa8] sm:$0xff] %v305_v0  ;;  %v180_v10 = vadd.f32 %v449_v2, %v109_v4  ;;  %v113_v11 = vmul.f32 %v444_v1, %v42_v60  ;;  %v114_v12 = vmul.f32 %v444_v1, %v43_v61  ;;  %v55_v63 = vld [vmem:[%s960_s0 + $0x148] sm:$0xff]  ;;  %v56_v0 = vld [vmem:[%s960_s0 + $0x150] sm:$0xff] }
  0x1f   :  { %370 = vst [vmem:[%s963_s3 + $0xb0] sm:$0xff] %v306_v3  ;;  %v115_v13 = vmul.f32 %v444_v1, %v44_v62  ;;  %371 = vst [vmem:[%s963_s3 + $0xb8] sm:$0xff] %v307_v6  ;;  %v181_v14 = vadd.f32 %v449_v2, %v110_v7  ;;  %v182_v15 = vadd.f32 %v449_v2, %v111_v8  ;;  %v57_v3 = vld [vmem:[%s960_s0 + $0x158] sm:$0xff] }
  0x20   :  { %v183_v16 = vadd.f32 %v449_v2, %v112_v9  ;;  %v116_v17 = vmul.f32 %v444_v1, %v45_v5  ;;  %v244_v19 = vmul.f32 0.2, %v180_v10  ;;  %v184_v20 = vadd.f32 %v449_v2, %v113_v11 }
  0x21   :  { %v185_v21 = vadd.f32 %v449_v2, %v114_v12  ;;  %v186_v22 = vadd.f32 %v449_v2, %v115_v13  ;;  %v245_v26 = vmul.f32 0.2, %v181_v14  ;;  %v246_v27 = vmul.f32 0.2, %v182_v15 }
  0x22   :  { %v247_v28 = vmul.f32 0.2, %v183_v16  ;;  %v187_v29 = vadd.f32 %v449_v2, %v116_v17  ;;  %v308_v30 = vmax.f32 %v180_v10, %v244_v19  ;;  %v248_v31 = vmul.f32 0.2, %v184_v20  ;;  %v59_v17 = vld [vmem:[%s960_s0 + $0x168] sm:$0xff] }
  0x23   :  { %v249_v32 = vmul.f32 0.2, %v185_v21  ;;  %v250_v33 = vmul.f32 0.2, %v186_v22  ;;  %v309_v34 = vmax.f32 %v181_v14, %v245_v26  ;;  %v310_v35 = vmax.f32 %v182_v15, %v246_v27 }
  0x24   :  { %v311_v36 = vmax.f32 %v183_v16, %v247_v28  ;;  %v251_v37 = vmul.f32 0.2, %v187_v29  ;;  %372 = vst [vmem:[%s963_s3 + $0xc0] sm:$0xff] %v308_v30  ;;  %v312_v41 = vmax.f32 %v184_v20, %v248_v31  ;;  %v117_v44 = vmul.f32 %v444_v1, %v46_v18  ;;  %v58_v16 = vld [vmem:[%s960_s0 + $0x160] sm:$0xff]  ;;  %v60_v18 = vld [vmem:[%s960_s0 + $0x170] sm:$0xff] }
  0x25   :  { %v313_v42 = vmax.f32 %v185_v21, %v249_v32  ;;  %v314_v43 = vmax.f32 %v186_v22, %v250_v33  ;;  %373 = vst [vmem:[%s963_s3 + $0xc8] sm:$0xff] %v309_v34  ;;  %374 = vst [vmem:[%s963_s3 + $0xd0] sm:$0xff] %v310_v35  ;;  %v118_v47 = vmul.f32 %v444_v1, %v47_v23  ;;  %v61_v23 = vld [vmem:[%s960_s0 + $0x178] sm:$0xff] }
  0x26   :  { %375 = vst [vmem:[%s963_s3 + $0xd8] sm:$0xff] %v311_v36  ;;  %v315_v46 = vmax.f32 %v187_v29, %v251_v37  ;;  %v119_v48 = vmul.f32 %v444_v1, %v48_v24  ;;  %v120_v49 = vmul.f32 %v444_v1, %v49_v25  ;;  %376 = vst [vmem:[%s963_s3 + $0xe0] sm:$0xff] %v312_v41  ;;  %v62_v36 = vld [vmem:[%s960_s0 + $0x180] sm:$0xff]  ;;  %v63_v41 = vld [vmem:[%s960_s0 + $0x188] sm:$0xff] }
  0x27   :  { %377 = vst [vmem:[%s963_s3 + $0xe8] sm:$0xff] %v313_v42  ;;  %378 = vst [vmem:[%s963_s3 + $0xf0] sm:$0xff] %v314_v43  ;;  %v188_v50 = vadd.f32 %v449_v2, %v117_v44  ;;  %v121_v51 = vmul.f32 %v444_v1, %v50_v38  ;;  %v122_v52 = vmul.f32 %v444_v1, %v51_v39  ;;  %v64_v42 = vld [vmem:[%s960_s0 + $0x190] sm:$0xff]  ;;  %v65_v43 = vld [vmem:[%s960_s0 + $0x198] sm:$0xff] }
  0x28   :  { %v123_v53 = vmul.f32 %v444_v1, %v52_v40  ;;  %379 = vst [vmem:[%s963_s3 + $0xf8] sm:$0xff] %v315_v46  ;;  %v189_v54 = vadd.f32 %v449_v2, %v118_v47  ;;  %v190_v55 = vadd.f32 %v449_v2, %v119_v48  ;;  %v191_v56 = vadd.f32 %v449_v2, %v120_v49 }
  0x29   :  { %v124_v57 = vmul.f32 %v444_v1, %v53_v45  ;;  %v252_v59 = vmul.f32 0.2, %v188_v50  ;;  %v192_v60 = vadd.f32 %v449_v2, %v121_v51  ;;  %v193_v61 = vadd.f32 %v449_v2, %v122_v52 }
  0x2a   :  { %v194_v62 = vadd.f32 %v449_v2, %v123_v53  ;;  %v253_v4 = vmul.f32 0.2, %v189_v54  ;;  %v254_v5 = vmul.f32 0.2, %v190_v55  ;;  %v255_v6 = vmul.f32 0.2, %v191_v56 }
  0x2b   :  { %v195_v7 = vadd.f32 %v449_v2, %v124_v57  ;;  %v316_v8 = vmax.f32 %v188_v50, %v252_v59  ;;  %v256_v9 = vmul.f32 0.2, %v192_v60  ;;  %v257_v10 = vmul.f32 0.2, %v193_v61  ;;  %v67_v57 = vld [vmem:[%s960_s0 + $0x1a8] sm:$0xff] }
  0x2c   :  { %v258_v11 = vmul.f32 0.2, %v194_v62  ;;  %v317_v12 = vmax.f32 %v189_v54, %v253_v4  ;;  %v318_v13 = vmax.f32 %v190_v55, %v254_v5  ;;  %v319_v14 = vmax.f32 %v191_v56, %v255_v6  ;;  %v66_v56 = vld [vmem:[%s960_s0 + $0x1a0] sm:$0xff] }
  0x2d   :  { %v259_v15 = vmul.f32 0.2, %v195_v7  ;;  %380 = vst [vmem:[%s963_s3 + $0x100] sm:$0xff] %v316_v8  ;;  %v320_v19 = vmax.f32 %v192_v60, %v256_v9  ;;  %v321_v20 = vmax.f32 %v193_v61, %v257_v10  ;;  %v125_v22 = vmul.f32 %v444_v1, %v54_v58  ;;  %v68_v58 = vld [vmem:[%s960_s0 + $0x1b0] sm:$0xff] }
  0x2e   :  { %v322_v21 = vmax.f32 %v194_v62, %v258_v11  ;;  %381 = vst [vmem:[%s963_s3 + $0x108] sm:$0xff] %v317_v12  ;;  %382 = vst [vmem:[%s963_s3 + $0x110] sm:$0xff] %v318_v13  ;;  %v126_v25 = vmul.f32 %v444_v1, %v55_v63  ;;  %v127_v26 = vmul.f32 %v444_v1, %v56_v0  ;;  %v69_v63 = vld [vmem:[%s960_s0 + $0x1b8] sm:$0xff] }
  0x2f   :  { %383 = vst [vmem:[%s963_s3 + $0x118] sm:$0xff] %v319_v14  ;;  %v323_v24 = vmax.f32 %v195_v7, %v259_v15  ;;  %v128_v27 = vmul.f32 %v444_v1, %v57_v3  ;;  %384 = vst [vmem:[%s963_s3 + $0x120] sm:$0xff] %v320_v19  ;;  %v196_v28 = vadd.f32 %v449_v2, %v125_v22  ;;  %v70_v14 = vld [vmem:[%s960_s0 + $0x1c0] sm:$0xff]  ;;  %v71_v19 = vld [vmem:[%s960_s0 + $0x1c8] sm:$0xff] }
  0x30   :  { %385 = vst [vmem:[%s963_s3 + $0x128] sm:$0xff] %v321_v20  ;;  %386 = vst [vmem:[%s963_s3 + $0x130] sm:$0xff] %v322_v21  ;;  %v129_v29 = vmul.f32 %v444_v1, %v58_v16  ;;  %v130_v30 = vmul.f32 %v444_v1, %v59_v17  ;;  %v131_v31 = vmul.f32 %v444_v1, %v60_v18  ;;  %v72_v20 = vld [vmem:[%s960_s0 + $0x1d0] sm:$0xff]  ;;  %v73_v21 = vld [vmem:[%s960_s0 + $0x1d8] sm:$0xff] }
  0x31   :  { %387 = vst [vmem:[%s963_s3 + $0x138] sm:$0xff] %v323_v24  ;;  %v197_v32 = vadd.f32 %v449_v2, %v126_v25  ;;  %v198_v33 = vadd.f32 %v449_v2, %v127_v26  ;;  %v199_v34 = vadd.f32 %v449_v2, %v128_v27  ;;  %v132_v35 = vmul.f32 %v444_v1, %v61_v23 }
  0x32   :  { %v260_v37 = vmul.f32 0.2, %v196_v28  ;;  %v200_v38 = vadd.f32 %v449_v2, %v129_v29  ;;  %v201_v39 = vadd.f32 %v449_v2, %v130_v30  ;;  %v202_v40 = vadd.f32 %v449_v2, %v131_v31 }
  0x33   :  { %v261_v44 = vmul.f32 0.2, %v197_v32  ;;  %v262_v45 = vmul.f32 0.2, %v198_v33  ;;  %v263_v46 = vmul.f32 0.2, %v199_v34  ;;  %v203_v47 = vadd.f32 %v449_v2, %v132_v35 }
  0x34   :  { %v324_v48 = vmax.f32 %v196_v28, %v260_v37  ;;  %v264_v49 = vmul.f32 0.2, %v200_v38  ;;  %v265_v50 = vmul.f32 0.2, %v201_v39  ;;  %v266_v51 = vmul.f32 0.2, %v202_v40 }
  0x35   :  { %v325_v52 = vmax.f32 %v197_v32, %v261_v44  ;;  %v326_v53 = vmax.f32 %v198_v33, %v262_v45  ;;  %v327_v54 = vmax.f32 %v199_v34, %v263_v46  ;;  %v267_v55 = vmul.f32 0.2, %v203_v47  ;;  %v74_v34 = vld [vmem:[%s960_s0 + $0x1e0] sm:$0xff]  ;;  %v75_v35 = vld [vmem:[%s960_s0 + $0x1e8] sm:$0xff] }
  0x36   :  { %388 = vst [vmem:[%s963_s3 + $0x140] sm:$0xff] %v324_v48  ;;  %v328_v59 = vmax.f32 %v200_v38, %v264_v49  ;;  %v329_v60 = vmax.f32 %v201_v39, %v265_v50  ;;  %v330_v61 = vmax.f32 %v202_v40, %v266_v51  ;;  %v133_v62 = vmul.f32 %v444_v1, %v62_v36  ;;  %v76_v36 = vld [vmem:[%s960_s0 + $0x1f0] sm:$0xff] }
  0x37   :  { %389 = vst [vmem:[%s963_s3 + $0x148] sm:$0xff] %v325_v52  ;;  %390 = vst [vmem:[%s963_s3 + $0x150] sm:$0xff] %v326_v53  ;;  %v331_v0 = vmax.f32 %v203_v47, %v267_v55  ;;  %v134_v3 = vmul.f32 %v444_v1, %v63_v41  ;;  %v135_v4 = vmul.f32 %v444_v1, %v64_v42  ;;  %v77_v41 = vld [vmem:[%s960_s0 + $0x1f8] sm:$0xff] }
  0x38   :  { %391 = vst [vmem:[%s963_s3 + $0x158] sm:$0xff] %v327_v54  ;;  %v136_v5 = vmul.f32 %v444_v1, %v65_v43  ;;  %392 = vst [vmem:[%s963_s3 + $0x160] sm:$0xff] %v328_v59  ;;  %v204_v6 = vadd.f32 %v449_v2, %v133_v62  ;;  %v137_v7 = vmul.f32 %v444_v1, %v66_v56 }
  0x39   :  { %393 = vst [vmem:[%s963_s3 + $0x168] sm:$0xff] %v329_v60  ;;  %394 = vst [vmem:[%s963_s3 + $0x170] sm:$0xff] %v330_v61  ;;  %v138_v8 = vmul.f32 %v444_v1, %v67_v57  ;;  %v139_v9 = vmul.f32 %v444_v1, %v68_v58  ;;  %v205_v10 = vadd.f32 %v449_v2, %v134_v3 }
  0x3a   :  { %395 = vst [vmem:[%s963_s3 + $0x178] sm:$0xff] %v331_v0  ;;  %v206_v11 = vadd.f32 %v449_v2, %v135_v4  ;;  %v207_v12 = vadd.f32 %v449_v2, %v136_v5  ;;  %v140_v13 = vmul.f32 %v444_v1, %v69_v63  ;;  %v268_v15 = vmul.f32 0.2, %v204_v6 }
  0x3b   :  { %v208_v16 = vadd.f32 %v449_v2, %v137_v7  ;;  %v209_v17 = vadd.f32 %v449_v2, %v138_v8  ;;  %v210_v18 = vadd.f32 %v449_v2, %v139_v9  ;;  %v269_v22 = vmul.f32 0.2, %v205_v10 }
  0x3c   :  { %v270_v23 = vmul.f32 0.2, %v206_v11  ;;  %v271_v24 = vmul.f32 0.2, %v207_v12  ;;  %v211_v25 = vadd.f32 %v449_v2, %v140_v13  ;;  %v332_v26 = vmax.f32 %v204_v6, %v268_v15 }
  0x3d   :  { %v272_v27 = vmul.f32 0.2, %v208_v16  ;;  %v273_v28 = vmul.f32 0.2, %v209_v17  ;;  %v274_v29 = vmul.f32 0.2, %v210_v18  ;;  %v333_v30 = vmax.f32 %v205_v10, %v269_v22 }
  0x3e   :  { %v334_v31 = vmax.f32 %v206_v11, %v270_v23  ;;  %v335_v32 = vmax.f32 %v207_v12, %v271_v24  ;;  %v275_v33 = vmul.f32 0.2, %v211_v25  ;;  %396 = vst [vmem:[%s963_s3 + $0x180] sm:$0xff] %v332_v26  ;;  %v141_v40 = vmul.f32 %v444_v1, %v70_v14 }
  0x3f   :  { %v336_v37 = vmax.f32 %v208_v16, %v272_v27  ;;  %v337_v38 = vmax.f32 %v209_v17, %v273_v28  ;;  %v338_v39 = vmax.f32 %v210_v18, %v274_v29  ;;  %397 = vst [vmem:[%s963_s3 + $0x188] sm:$0xff] %v333_v30  ;;  %v142_v43 = vmul.f32 %v444_v1, %v71_v19 }
  0x40   :  { %398 = vst [vmem:[%s963_s3 + $0x190] sm:$0xff] %v334_v31  ;;  %399 = vst [vmem:[%s963_s3 + $0x198] sm:$0xff] %v335_v32  ;;  %v339_v42 = vmax.f32 %v211_v25, %v275_v33  ;;  %v143_v44 = vmul.f32 %v444_v1, %v72_v20  ;;  %v144_v45 = vmul.f32 %v444_v1, %v73_v21 }
  0x41   :  { %400 = vst [vmem:[%s963_s3 + $0x1a0] sm:$0xff] %v336_v37  ;;  %401 = vst [vmem:[%s963_s3 + $0x1a8] sm:$0xff] %v337_v38  ;;  %v212_v46 = vadd.f32 %v449_v2, %v141_v40  ;;  %v145_v47 = vmul.f32 %v444_v1, %v74_v34  ;;  %v146_v48 = vmul.f32 %v444_v1, %v75_v35 }
  0x42   :  { %402 = vst [vmem:[%s963_s3 + $0x1b0] sm:$0xff] %v338_v39  ;;  %v147_v49 = vmul.f32 %v444_v1, %v76_v36  ;;  %403 = vst [vmem:[%s963_s3 + $0x1b8] sm:$0xff] %v339_v42  ;;  %v213_v50 = vadd.f32 %v449_v2, %v142_v43  ;;  %v214_v51 = vadd.f32 %v449_v2, %v143_v44 }
  0x43   :  { %v215_v52 = vadd.f32 %v449_v2, %v144_v45  ;;  %v148_v53 = vmul.f32 %v444_v1, %v77_v41  ;;  %v276_v54 = vmul.f32 0.2, %v212_v46  ;;  %v216_v55 = vadd.f32 %v449_v2, %v145_v47 }
  0x44   :  { %v217_v56 = vadd.f32 %v449_v2, %v146_v48  ;;  %v218_v57 = vadd.f32 %v449_v2, %v147_v49  ;;  %v277_v58 = vmul.f32 0.2, %v213_v50  ;;  %v278_v59 = vmul.f32 0.2, %v214_v51 }
  0x45   :  { %v279_v60 = vmul.f32 0.2, %v215_v52  ;;  %v219_v61 = vadd.f32 %v449_v2, %v148_v53  ;;  %v340_v62 = vmax.f32 %v212_v46, %v276_v54  ;;  %v280_v63 = vmul.f32 0.2, %v216_v55 }
  0x46   :  { %v281_v0 = vmul.f32 0.2, %v217_v56  ;;  %v282_v3 = vmul.f32 0.2, %v218_v57  ;;  %v341_v4 = vmax.f32 %v213_v50, %v277_v58  ;;  %v342_v5 = vmax.f32 %v214_v51, %v278_v59 }
  0x47   :  { %v343_v6 = vmax.f32 %v215_v52, %v279_v60  ;;  %v283_v1 = vmul.f32 0.2, %v219_v61  ;;  %404 = vst [vmem:[%s963_s3 + $0x1c0] sm:$0xff] %v340_v62  ;;  %v344_v7 = vmax.f32 %v216_v55, %v280_v63 }
  0x48   :  { %v345_v8 = vmax.f32 %v217_v56, %v281_v0  ;;  %v346_v9 = vmax.f32 %v218_v57, %v282_v3  ;;  %405 = vst [vmem:[%s963_s3 + $0x1c8] sm:$0xff] %v341_v4  ;;  %406 = vst [vmem:[%s963_s3 + $0x1d0] sm:$0xff] %v342_v5 }
  0x49   :  { %407 = vst [vmem:[%s963_s3 + $0x1d8] sm:$0xff] %v343_v6  ;;  %v347_v2 = vmax.f32 %v219_v61, %v283_v1  ;;  %408 = vst [vmem:[%s963_s3 + $0x1e0] sm:$0xff] %v344_v7 }
  0x4a   :  { %409 = vst [vmem:[%s963_s3 + $0x1e8] sm:$0xff] %v345_v8  ;;  %410 = vst [vmem:[%s963_s3 + $0x1f0] sm:$0xff] %v346_v9 }
  0x4b   :  { %411 = vst [vmem:[%s963_s3 + $0x1f8] sm:$0xff] %v347_v2 }

// kernel: unet_up_forward.2
= control target key start
LH: loop header
LB: loop body
LE: loop exit
PB: predicated region body
PF: predicated region fallthrough
CT: control target
= control target key end

     0   :  { %s3898_s12 = smov 0   ;;  %s3900_s13 = smov 0   ;;  %s5275_s0 = inlined_call_operand.vmem [shape: bf16[2,1,18,18,64], index: 0, kind: input, shape index: {}]   ;;  %s5276_s1 = inlined_call_operand.vmem [shape: bf16[3,192,128], index: 1, kind: input, shape index: {}]   ;;  %s5277_s2 = inlined_call_operand.vmem [shape: f32[2,1,256,128], index: 2, kind: output, shape index: {0}]   ;;  %s5278_s3 = inlined_call_operand.vmem [shape: f32[2,1,2,128], index: 3, kind: output, shape index: {1}]  }
   0x1   :  { %s3902_s14 = smov 0  }
   0x2 LB: > { %s26_s15 = sadd.s32 1, %s3870_s13  ;;  %p3141_p0 = scmp.ge.s32.totalorder %s3874_s14, 1  ;;  %s3874_s14 = sphi %s3902_s14, %s14_s14   ;;  %s3870_s13 = sphi %s3900_s13, %s5352_s13   ;;  %s3866_s12 = sphi %s3898_s12, %s5351_s12  }
   0x3   : > { %p28_p1 = scmp.ge.s32.totalorder %s26_s15, 2  ;;  %p162_p2 = scmp.lt.s32.totalorder %s3874_s14, 3 }
   0x5   : > { %s5354_s15 = smov (%p28_p1, %s26_s15), 0  ;;  %p163_p3 = pnand %p3141_p0, %p162_p2 }
   0x7   : > { %166 = sbr.rel (%p163_p3) target bundleno = 549 (0x225), region = 28 }
   0xc   : > { %p201_p4 = scmp.lt.s32.totalorder %s3866_s12, 1  ;;  %v3640_v0 = vld [vmem:[%s5276_s1 + $0x98] sm:$0xff]   ;;  %v5279_v1 = vmov 0   ;;  %v3643_v2 = vld [vmem:[%s5276_s1 + $0x90] sm:$0xff]   ;;  %vm419_vm0 = vsmask.f32 7424 }
   0xd   : > { %3553 = vmatprep.subr.bf16.mxu1 %v5279_v1  ;;  %1520 = vmatprep.subr.bf16.mxu0 %v5279_v1  ;;  %v3646_v3 = vld [vmem:[%s5276_s1 + $0x88] sm:$0xff]   ;;  %v3649_v9 = vld [vmem:[%s5276_s1 + $0x80] sm:$0xff]   ;;  %v3652_v24 = vld [vmem:[%s5276_s1 + $0x78] sm:$0xff]   ;;  %s3877_s30 = smov 64   ;;  %vm692_vm1 = vcmask 1046528   ;;  %vm741_vm2 = vcmask 523264  }
   0xe   : > { %s5356_s12 = smov (!%p201_p4, %s3866_s12), 1  ;;  %3565 = vmatpush1.bf16.msra.mxu1 %v3640_v0  ;;  %1521 = vmatpush1.bf16.msra.mxu0 %v3640_v0  ;;  %v3655_v51 = vld [vmem:[%s5276_s1 + $0x70] sm:$0xff]   ;;  %vm3001_vm3 = vcmask 1040384  }
   0xf   : > { %3554 = vmatprep.subr.bf16.mxu1 %v5279_v1  ;;  %1522 = vmatprep.subr.bf16.mxu0 %v5279_v1  ;;  %s3577_s20 = smul.u32 216, %s5356_s12  ;;  %s3145_s5 = sshll.u32 %s5356_s12, 1 }
  0x10   : > { %s225_s8 = scalar_lea.vmem %s5278_s3, %s3145_s5 }
  0x11   : > { %s3932_s23 = scalar_lea.vmem %s5275_s0, %s3577_s20 }
  0x12   : > { %3566 = vmatpush1.bf16.msra.mxu1 %v3643_v2  ;;  %1523 = vmatpush1.bf16.msra.mxu0 %v3643_v2  ;;  %v3210_v4 = vld [vmem:[%s3932_s23 + $0x6c] sm:$0xf]  ;;  %v3939_v5 = vld [vmem:[%s3932_s23 + $0x70] sm:$0xf]  ;;  %v3212_v11 = vld [vmem:[%s3932_s23 + $0x78] sm:$0xf] }
  0x13   : > { %3555 = vmatprep.subr.bf16.mxu1 %v5279_v1  ;;  %1524 = vmatprep.subr.bf16.mxu0 %v5279_v1  ;;  %v3944_v6 = vcombine.low %v3210_v4, %v3939_v5  ;;  %v3947_v7 = vld [vmem:[%s3932_s23 + $0x74] ss:$0 sps:$4 sm:$0x11]   ;;  %v3194_v8 = vld [vmem:[%s3932_s23 + $0xc] sm:$0xf] }
  0x14   : > { %v3954_v10 = vld [vmem:[%s3932_s23 + $0x10] sm:$0xf]  ;;  %v1111_v14 = vshll.u32 %v3947_v7, 16  ;;  %v3964_v16 = vld [vmem:[%s3932_s23 + $0x14] ss:$0 sps:$4 sm:$0x11]  }
  0x15   : > { %v1104_v12 = vshrl.u32 %v3944_v6, 16  ;;  %v1106_v13 = vshll.u32 %v3944_v6, 16  ;;  %v3961_v15 = vcombine.low %v3194_v8, %v3954_v10  ;;  %v3213_v17 = vld [vmem:[%s3932_s23 + $0x7c] sm:$0xf]  ;;  %v3196_v18 = vld [vmem:[%s3932_s23 + $0x18] sm:$0xf] }
  0x16   : > { %3567 = vmatpush1.bf16.msra.mxu1 %v3646_v3  ;;  %1525 = vmatpush1.bf16.msra.mxu0 %v3646_v3  ;;  %v1113_v20 = vrot.slane %v1111_v14, 1  ;;  %v3197_v23 = vld [vmem:[%s3932_s23 + $0x1c] sm:$0xf]  ;;  %v1015_v25 = vshll.u32 %v3964_v16, 16  ;;  %v3977_v26 = vcombine.low %v3212_v11, %v3213_v17  ;;  %v3214_v32 = vld [vmem:[%s3932_s23 + $0x84] sm:$0xf] }
  0x17   : > { %3556 = vmatprep.subr.bf16.mxu1 %v5279_v1  ;;  %1526 = vmatprep.subr.bf16.mxu0 %v5279_v1  ;;  %v1108_v19 = vrot.slane %v1106_v13, 1  ;;  %v1008_v21 = vshrl.u32 %v3961_v15, 16  ;;  %v1010_v22 = vshll.u32 %v3961_v15, 16  ;;  %v3609_v27 = vld [vmem:[%s3932_s23 + $0x80] ss:$0 sps:$4 sm:$0x11]   ;;  %v3980_v28 = vcombine.low %v3196_v18, %v3197_v23 }
  0x18   : > { %v3611_v31 = vld [vmem:[%s3932_s23 + $0x20] ss:$0 sps:$4 sm:$0x11]   ;;  %v1017_v33 = vrot.slane %v1015_v25, 1  ;;  %v1116_v34 = vshrl.u32 %v3977_v26, 16  ;;  %v1118_v35 = vshll.u32 %v3977_v26, 16 }
  0x19   : > { %v1109_v29 = vor.u32 %v1108_v19, %v1104_v12  ;;  %v1012_v30 = vrot.slane %v1010_v22, 1  ;;  %v1123_v36 = vshll.u32 %v3609_v27, 16  ;;  %v3215_v37 = vld [vmem:[%s3932_s23 + $0x88] sm:$0xf]  ;;  %v1020_v40 = vshrl.u32 %v3980_v28, 16 }
  0x1a   : > { %3568 = vmatpush1.bf16.msra.mxu1 %v3649_v9  ;;  %1527 = vmatpush1.bf16.msra.mxu0 %v3649_v9  ;;  %v1022_v41 = vshll.u32 %v3980_v28, 16  ;;  %v3198_v42 = vld [vmem:[%s3932_s23 + $0x24] sm:$0xf]  ;;  %v1120_v43 = vrot.slane %v1118_v35, 1  ;;  %v1027_v45 = vshll.u32 %v3611_v31, 16  ;;  %v3994_v46 = vcombine.low %v3214_v32, %v3215_v37 }
  0x1b   : > { %3557 = vmatprep.subr.bf16.mxu1 %v5279_v1  ;;  %1528 = vmatprep.subr.bf16.mxu0 %v5279_v1  ;;  %v1114_v38 = vsel %vm419_vm0, %v1109_v29, %v1113_v20  ;;  %v1013_v39 = vor.u32 %v1012_v30, %v1008_v21  ;;  %v1125_v44 = vrot.slane %v1123_v36, 1  ;;  %v3613_v47 = vld [vmem:[%s3932_s23 + $0x8c] ss:$0 sps:$4 sm:$0x11]   ;;  %v3199_v50 = vld [vmem:[%s3932_s23 + $0x28] sm:$0xf] }
  0x1c   : > { %1215 = vrot.lane.b32.xlu0 %v1114_v38, %s3877_s30  ;;  %v1024_v49 = vrot.slane %v1022_v41, 1  ;;  %v1121_v52 = vor.u32 %v1120_v43, %v1116_v34  ;;  %v1029_v53 = vrot.slane %v1027_v45, 1  ;;  %v1128_v54 = vshrl.u32 %v3994_v46, 16  ;;  %v3615_v56 = vld [vmem:[%s3932_s23 + $0x2c] ss:$0 sps:$4 sm:$0x11]  }
  0x1d   : > { %v1018_v48 = vsel %vm419_vm0, %v1013_v39, %v1017_v33  ;;  %v1130_v55 = vshll.u32 %v3994_v46, 16  ;;  %v1135_v58 = vshll.u32 %v3613_v47, 16  ;;  %v4007_v59 = vcombine.low %v3198_v42, %v3199_v50  ;;  %v3216_v60 = vld [vmem:[%s3932_s23 + $0x90] sm:$0xf]  ;;  %v3217_v61 = vld [vmem:[%s3932_s23 + $0x94] sm:$0xf] }
  0x1e   : > { %3569 = vmatpush1.bf16.msra.mxu1 %v3652_v24  ;;  %1529 = vmatpush1.bf16.msra.mxu0 %v3652_v24  ;;  %v1025_v57 = vor.u32 %v1024_v49, %v1020_v40  ;;  %v1126_v62 = vsel %vm419_vm0, %v1121_v52, %v1125_v44  ;;  %v1039_v0 = vshll.u32 %v3615_v56, 16  ;;  %v4013_v2 = vcombine.low %v3216_v60, %v3217_v61  ;;  %v3200_v3 = vld [vmem:[%s3932_s23 + $0x30] sm:$0xf]  ;;  %v3617_v12 = vld [vmem:[%s3932_s23 + $0x98] ss:$0 sps:$4 sm:$0x11]  }
  0x1f   : > { %3558 = vmatprep.subr.bf16.mxu1 %v5279_v1  ;;  %1530 = vmatprep.subr.bf16.mxu0 %v5279_v1  ;;  %v1132_v63 = vrot.slane %v1130_v55, 1  ;;  %v1137_v8 = vrot.slane %v1135_v58, 1  ;;  %v1032_v9 = vshrl.u32 %v4007_v59, 16  ;;  %v1034_v11 = vshll.u32 %v4007_v59, 16  ;;  %v3201_v19 = vld [vmem:[%s3932_s23 + $0x34] sm:$0xf] }
  0x20   : > { %1199 = vrot.lane.b32.xlu0 %v1018_v48, %s3877_s30  ;;  %1217 = vrot.lane.b32.xlu1 %v1126_v62, %s3877_s30  ;;  %v1030_v4 = vsel %vm419_vm0, %v1025_v57, %v1029_v53  ;;  %v1041_v14 = vrot.slane %v1039_v0, 1  ;;  %v1140_v17 = vshrl.u32 %v4013_v2, 16  ;;  %v1142_v18 = vshll.u32 %v4013_v2, 16  ;;  %v3658_v20 = vld [vmem:[%s5276_s1 + $0x68] sm:$0xff]   ;;  %v3218_v24 = vld [vmem:[%s3932_s23 + $0x9c] sm:$0xf] }
  0x21   : > { %v1133_v13 = vor.u32 %v1132_v63, %v1128_v54  ;;  %v1036_v21 = vrot.slane %v1034_v11, 1  ;;  %v1147_v22 = vshll.u32 %v3617_v12, 16  ;;  %v4028_v23 = vcombine.low %v3200_v3, %v3201_v19  ;;  %v3619_v29 = vld [vmem:[%s3932_s23 + $0x38] ss:$0 sps:$4 sm:$0x11]   ;;  %v3661_v35 = vld [vmem:[%s5276_s1 + $0x60] sm:$0xff]  }
  0x22   : > { %3570 = vmatpush1.bf16.msra.mxu1 %v3655_v51  ;;  %1531 = vmatpush1.bf16.msra.mxu0 %v3655_v51  ;;  %v1144_v27 = vrot.slane %v1142_v18, 1  ;;  %v3219_v30 = vld [vmem:[%s3932_s23 + $0xa0] sm:$0xf]  ;;  %v1051_v37 = vshll.u32 %v3619_v29, 16  ;;  %v3202_v40 = vld [vmem:[%s3932_s23 + $0x3c] sm:$0xf] }
  0x23   : > { %3559 = vmatprep.subr.bf16.mxu1 %v5279_v1  ;;  %1532 = vmatprep.subr.bf16.mxu0 %v5279_v1  ;;  %v1138_v25 = vsel %vm419_vm0, %v1133_v13, %v1137_v8  ;;  %v1037_v31 = vor.u32 %v1036_v21, %v1032_v9  ;;  %v1149_v32 = vrot.slane %v1147_v22, 1  ;;  %v1044_v33 = vshrl.u32 %v4028_v23, 16  ;;  %v3621_v39 = vld [vmem:[%s3932_s23 + $0xa4] ss:$0 sps:$4 sm:$0x11]   ;;  %v3664_v50 = vld [vmem:[%s5276_s1 + $0xb8] sm:$0xff]  }
  0x24   : > { %1201 = vrot.lane.b32.xlu1 %v1030_v4, %s3877_s30  ;;  %1219 = vrot.lane.b32.xlu0 %v1138_v25, %s3877_s30  ;;  %v1046_v34 = vshll.u32 %v4028_v23, 16  ;;  %v1145_v36 = vor.u32 %v1144_v27, %v1140_v17  ;;  %v4042_v38 = vcombine.low %v3218_v24, %v3219_v30  ;;  %v3203_v43 = vld [vmem:[%s3932_s23 + $0x40] sm:$0xf]  ;;  %v1053_v45 = vrot.slane %v1051_v37, 1  ;;  %v3220_v54 = vld [vmem:[%s3932_s23 + $0xa8] sm:$0xf] }
  0x25   : > { %v1042_v41 = vsel %vm419_vm0, %v1037_v31, %v1041_v14  ;;  %v3623_v49 = vld [vmem:[%s3932_s23 + $0x44] ss:$0 sps:$4 sm:$0x11]   ;;  %v1159_v52 = vshll.u32 %v3621_v39, 16  ;;  %v4059_v53 = vcombine.low %v3202_v40, %v3203_v43  ;;  %v3221_v55 = vld [vmem:[%s3932_s23 + $0xac] sm:$0xf] }
  0x26   : > { %3571 = vmatpush1.bf16.msra.mxu1 %v3658_v20  ;;  %1533 = vmatpush1.bf16.msra.mxu0 %v3658_v20  ;;  %v1048_v42 = vrot.slane %v1046_v34, 1  ;;  %v1150_v44 = vsel %vm419_vm0, %v1145_v36, %v1149_v32  ;;  %v1152_v47 = vshrl.u32 %v4042_v38, 16  ;;  %v1154_v48 = vshll.u32 %v4042_v38, 16  ;;  %v3204_v60 = vld [vmem:[%s3932_s23 + $0x48] sm:$0xf]  ;;  %v3667_v13 = vld [vmem:[%s5276_s1 + $0xb0] sm:$0xff]  }
  0x27   : > { %3560 = vmatprep.subr.bf16.mxu1 %v5279_v1  ;;  %1534 = vmatprep.subr.bf16.mxu0 %v5279_v1  ;;  %v1063_v57 = vshll.u32 %v3623_v49, 16  ;;  %v4063_v58 = vcombine.low %v3220_v54, %v3221_v55  ;;  %v1161_v62 = vrot.slane %v1159_v52, 1  ;;  %v1056_v63 = vshrl.u32 %v4059_v53, 16  ;;  %v3625_v3 = vld [vmem:[%s3932_s23 + $0xb0] ss:$0 sps:$4 sm:$0x11]  }
  0x28   : > { %1203 = vrot.lane.b32.xlu1 %v1042_v41, %s3877_s30  ;;  %1221 = vrot.lane.b32.xlu0 %v1150_v44, %s3877_s30  ;;  %v1049_v51 = vor.u32 %v1048_v42, %v1044_v33  ;;  %v1156_v56 = vrot.slane %v1154_v48, 1  ;;  %v1058_v0 = vshll.u32 %v4059_v53, 16  ;;  %v3205_v12 = vld [vmem:[%s3932_s23 + $0x4c] sm:$0xf]  ;;  %v1171_v17 = vshll.u32 %v3625_v3, 16 }
  0x29   : > { %v1065_v8 = vrot.slane %v1063_v57, 1  ;;  %v1164_v9 = vshrl.u32 %v4063_v58, 16  ;;  %v1166_v11 = vshll.u32 %v4063_v58, 16  ;;  %v4079_v18 = vcombine.low %v3204_v60, %v3205_v12  ;;  %v3222_v19 = vld [vmem:[%s3932_s23 + $0xb4] sm:$0xf]  ;;  %v3670_v40 = vld [vmem:[%s5276_s1 + $0xa8] sm:$0xff]  }
  0x2a   : > { %3572 = vmatpush1.bf16.msra.mxu1 %v3661_v35  ;;  %1535 = vmatpush1.bf16.msra.mxu0 %v3661_v35  ;;  %v1054_v61 = vsel %vm419_vm0, %v1049_v51, %v1053_v45  ;;  %v1157_v4 = vor.u32 %v1156_v56, %v1152_v47  ;;  %v1060_v14 = vrot.slane %v1058_v0, 1  ;;  %v3627_v22 = vld [vmem:[%s3932_s23 + $0x50] ss:$0 sps:$4 sm:$0x11]   ;;  %v3223_v24 = vld [vmem:[%s3932_s23 + $0xb8] sm:$0xf] }
  0x2b   : > { %3561 = vmatprep.subr.bf16.mxu1 %v5279_v1  ;;  %1544 = vmatprep.subr.bf16.mxu0 %v5279_v1  ;;  %v1168_v21 = vrot.slane %v1166_v11, 1  ;;  %v1173_v27 = vrot.slane %v1171_v17, 1  ;;  %v1068_v29 = vshrl.u32 %v4079_v18, 16  ;;  %v1070_v30 = vshll.u32 %v4079_v18, 16  ;;  %v3206_v35 = vld [vmem:[%s3932_s23 + $0x54] sm:$0xf] }
  0x2c   : > { %1205 = vrot.lane.b32.xlu1 %v1054_v61, %s3877_s30  ;;  %v1162_v20 = vsel %vm419_vm0, %v1157_v4, %v1161_v62  ;;  %v1061_v25 = vor.u32 %v1060_v14, %v1056_v63  ;;  %v1075_v32 = vshll.u32 %v3627_v22, 16  ;;  %v4089_v33 = vcombine.low %v3222_v19, %v3223_v24  ;;  %v3629_v34 = vld [vmem:[%s3932_s23 + $0xbc] ss:$0 sps:$4 sm:$0x11]   ;;  %v3207_v39 = vld [vmem:[%s3932_s23 + $0x58] sm:$0xf] }
  0x2d   : > { %1223 = vrot.lane.b32.xlu0 %v1162_v20, %s3877_s30  ;;  %v1169_v31 = vor.u32 %v1168_v21, %v1164_v9  ;;  %v1072_v37 = vrot.slane %v1070_v30, 1  ;;  %v3631_v45 = vld [vmem:[%s3932_s23 + $0x5c] ss:$0 sps:$4 sm:$0x11]   ;;  %v1183_v48 = vshll.u32 %v3629_v34, 16  ;;  %v4105_v49 = vcombine.low %v3206_v35, %v3207_v39  ;;  %v3673_v11 = vld [vmem:[%s5276_s1 + $0xa0] sm:$0xff]  }
  0x2e   : > { %3573 = vmatpush2.bf16.msra.mxu1 %v3664_v50  ;;  %1545 = vmatpush2.bf16.msra.mxu0 %v3664_v50  ;;  %v1066_v36 = vsel %vm419_vm0, %v1061_v25, %v1065_v8  ;;  %v1077_v42 = vrot.slane %v1075_v32, 1  ;;  %v1176_v43 = vshrl.u32 %v4089_v33, 16  ;;  %v1178_v44 = vshll.u32 %v4089_v33, 16  ;;  %v3224_v50 = vld [vmem:[%s3932_s23 + $0xc0] sm:$0xf] }
  0x2f   : > { %3562 = vmatprep.subr.bf16.mxu1 %v5279_v1  ;;  %1546 = vmatprep.subr.bf16.mxu0 %v5279_v1  ;;  %v1174_v41 = vsel %vm419_vm0, %v1169_v31, %v1173_v27  ;;  %v1073_v47 = vor.u32 %v1072_v37, %v1068_v29  ;;  %v3225_v51 = vld [vmem:[%s3932_s23 + $0xc4] sm:$0xf]  ;;  %v1087_v54 = vshll.u32 %v3631_v45, 16  ;;  %v3208_v56 = vld [vmem:[%s3932_s23 + $0x60] sm:$0xf]  ;;  %v1185_v60 = vrot.slane %v1183_v48, 1 }
  0x30   : > { %1207 = vrot.lane.b32.xlu1 %v1066_v36, %s3877_s30  ;;  %v1180_v52 = vrot.slane %v1178_v44, 1  ;;  %v4109_v55 = vcombine.low %v3224_v50, %v3225_v51  ;;  %v1080_v61 = vshrl.u32 %v4105_v49, 16  ;;  %v1082_v62 = vshll.u32 %v4105_v49, 16  ;;  %v3633_v63 = vld [vmem:[%s3932_s23 + $0xc8] ss:$0 sps:$4 sm:$0x11]  }
  0x31   : > { %1225 = vrot.lane.b32.xlu0 %v1174_v41, %s3877_s30  ;;  %v1078_v57 = vsel %vm419_vm0, %v1073_v47, %v1077_v42  ;;  %v1089_v3 = vrot.slane %v1087_v54, 1  ;;  %v3209_v9 = vld [vmem:[%s3932_s23 + $0x64] sm:$0xf]  ;;  %v227_v17 = vld [vmem:[%s3932_s23] sm:$0xf] }
  0x32   : > { %3574 = vmatpush2.bf16.msra.mxu1 %v3667_v13  ;;  %1547 = vmatpush2.bf16.msra.mxu0 %v3667_v13  ;;  %v1181_v0 = vor.u32 %v1180_v52, %v1176_v43  ;;  %v1188_v4 = vshrl.u32 %v4109_v55, 16  ;;  %v1190_v8 = vshll.u32 %v4109_v55, 16  ;;  %v1084_v12 = vrot.slane %v1082_v62, 1  ;;  %v3635_v21 = vld [vmem:[%s3932_s23 + $0x68] ss:$0 sps:$4 sm:$0x11]  }
  0x33   : > { %3563 = vmatprep.subr.bf16.mxu1 %v5279_v1  ;;  %1548 = vmatprep.subr.bf16.mxu0 %v5279_v1  ;;  %v1195_v13 = vshll.u32 %v3633_v63, 16  ;;  %v4125_v14 = vcombine.low %v3208_v56, %v3209_v9  ;;  %v228_v22 = vld [vmem:[%s3932_s23 + $0x4] sm:$0xf]  ;;  %v1099_v31 = vshll.u32 %v3635_v21, 16  ;;  %v3386_v35 = vld [vmem:[%s3932_s23 + $0x18] sm:$0xf] }
  0x34   : > { %1209 = vrot.lane.b32.xlu1 %v1078_v57, %s3877_s30  ;;  %v1186_v19 = vsel %vm419_vm0, %v1181_v0, %v1185_v60  ;;  %v1192_v20 = vrot.slane %v1190_v8, 1  ;;  %v1085_v24 = vor.u32 %v1084_v12, %v1080_v61  ;;  %v4136_v32 = vcombine.low %v227_v17, %v228_v22  ;;  %v3637_v34 = vld [vmem:[%s3932_s23 + $0x8] ss:$0 sps:$4 sm:$0x11]   ;;  %v3387_v39 = vld [vmem:[%s3932_s23 + $0x1c] sm:$0xf] }
  0x35   : > { %1227 = vrot.lane.b32.xlu0 %v1186_v19, %s3877_s30  ;;  %v1197_v25 = vrot.slane %v1195_v13, 1  ;;  %v1092_v27 = vshrl.u32 %v4125_v14, 16  ;;  %v1094_v29 = vshll.u32 %v4125_v14, 16  ;;  %v1101_v41 = vrot.slane %v1099_v31, 1  ;;  %v229_v50 = vld [vmem:[%s3932_s23 + $0xc] sm:$0xf] }
  0x36   : > { %3575 = vmatpush2.bf16.msra.mxu1 %v3670_v40  ;;  %1549 = vmatpush2.bf16.msra.mxu0 %v3670_v40  ;;  %v1193_v30 = vor.u32 %v1192_v20, %v1188_v4  ;;  %v1090_v36 = vsel %vm419_vm0, %v1085_v24, %v1089_v3  ;;  %v421_v42 = vshrl.u32 %v4136_v32, 16  ;;  %v423_v43 = vshll.u32 %v4136_v32, 16  ;;  %v3639_v44 = vld [vmem:[%s3932_s23 + $0x20] ss:$0 sps:$4 sm:$0x11]  }
  0x37   : > { %3564 = vmatprep.subr.bf16.mxu1 %v5279_v1  ;;  %1550 = vmatprep.subr.bf16.mxu0 %v5279_v1  ;;  %v1096_v37 = vrot.slane %v1094_v29, 1  ;;  %v428_v47 = vshll.u32 %v3637_v34, 16  ;;  %v4150_v48 = vcombine.low %v3386_v35, %v3387_v39  ;;  %v230_v51 = vld [vmem:[%s3932_s23 + $0x10] sm:$0xf]  ;;  %v2163_v54 = vshll.u32 %v3639_v44, 16 }
  0x38   : > { %1211 = vrot.lane.b32.xlu1 %v1090_v36, %s3877_s30  ;;  %v1198_v40 = vsel %vm419_vm0, %v1193_v30, %v1197_v25  ;;  %v425_v52 = vrot.slane %v423_v43, 1  ;;  %v4154_v56 = vcombine.low %v229_v50, %v230_v51  ;;  %v3388_v57 = vld [vmem:[%s3932_s23 + $0x24] sm:$0xf]  ;;  %v3642_v0 = vld [vmem:[%s3932_s23 + $0x14] ss:$0 sps:$4 sm:$0x11]  }
  0x39   : > { %1229 = vrot.lane.b32.xlu0 %v1198_v40, %s3877_s30  ;;  %v1097_v45 = vor.u32 %v1096_v37, %v1092_v27  ;;  %v430_v61 = vrot.slane %v428_v47, 1  ;;  %v2156_v62 = vshrl.u32 %v4150_v48, 16  ;;  %v2158_v63 = vshll.u32 %v4150_v48, 16  ;;  %v231_v19 = vld [vmem:[%s3932_s23 + $0x18] sm:$0xf] }
  0x3a   : > { %3576 = vmatpush2.bf16.msra.mxu1 %v3673_v11  ;;  %1551 = vmatpush2.bf16.msra.mxu0 %v3673_v11  ;;  %v426_v3 = vor.u32 %v425_v52, %v421_v42  ;;  %v2165_v4 = vrot.slane %v2163_v54, 1  ;;  %v433_v8 = vshrl.u32 %v4154_v56, 16  ;;  %v435_v9 = vshll.u32 %v4154_v56, 16  ;;  %v3389_v11 = vld [vmem:[%s3932_s23 + $0x28] sm:$0xf] }
  0x3b   : > { %1801 = vmatprep.subr.bf16.mxu1 %v5279_v1  ;;  %2668 = vmatprep.subr.bf16.mxu0 %v5279_v1  ;;  %v1102_v60 = vsel %vm419_vm0, %v1097_v45, %v1101_v41  ;;  %v2160_v12 = vrot.slane %v2158_v63, 1  ;;  %v440_v13 = vshll.u32 %v3642_v0, 16  ;;  %v4165_v17 = vcombine.low %v3388_v57, %v3389_v11  ;;  %v3645_v22 = vld [vmem:[%s3932_s23 + $0x2c] ss:$0 sps:$4 sm:$0x11]  }
  0x3c   : > { %1213 = vrot.lane.b32.xlu1 %v1102_v60, %s3877_s30  ;;  %v431_v20 = vsel %vm419_vm0, %v426_v3, %v430_v61  ;;  %v437_v21 = vrot.slane %v435_v9, 1  ;;  %v232_v24 = vld [vmem:[%s3932_s23 + $0x1c] sm:$0xf]  ;;  %v2175_v34 = vshll.u32 %v3645_v22, 16  ;;  %v3390_v37 = vld [vmem:[%s3932_s23 + $0x30] sm:$0xf] }
  0x3d   : > { %612 = vrot.lane.b32.xlu0 %v431_v20, %s3877_s30  ;;  %v2161_v25 = vor.u32 %v2160_v12, %v2156_v62  ;;  %v442_v27 = vrot.slane %v440_v13, 1  ;;  %v2168_v29 = vshrl.u32 %v4165_v17, 16  ;;  %v2170_v30 = vshll.u32 %v4165_v17, 16  ;;  %v3648_v36 = vld [vmem:[%s3932_s23 + $0x20] ss:$0 sps:$4 sm:$0x11]  }
  0x3e   : > { %v438_v31 = vor.u32 %v437_v21, %v433_v8  ;;  %v4174_v35 = vcombine.low %v231_v19, %v232_v24  ;;  %v3391_v41 = vld [vmem:[%s3932_s23 + $0x34] sm:$0xf]  ;;  %v2177_v43 = vrot.slane %v2175_v34, 1  ;;  %v3651_v47 = vld [vmem:[%s3932_s23 + $0x38] ss:$0 sps:$4 sm:$0x11]  }
  0x3f   : > { %v2166_v39 = vsel %vm419_vm0, %v2161_v25, %v2165_v4  ;;  %v2172_v40 = vrot.slane %v2170_v30, 1  ;;  %v452_v51 = vshll.u32 %v3648_v36, 16  ;;  %v4186_v52 = vcombine.low %v3390_v37, %v3391_v41  ;;  %v233_v54 = vld [vmem:[%s3932_s23 + $0x24] sm:$0xf]  ;;  %v234_v57 = vld [vmem:[%s3932_s23 + $0x28] sm:$0xf] }
  0x40   : > { %2347 = vrot.lane.b32.xlu1 %v2166_v39, %s3877_s30  ;;  %v443_v42 = vsel %vm419_vm0, %v438_v31, %v442_v27  ;;  %v445_v44 = vshrl.u32 %v4174_v35, 16  ;;  %v447_v45 = vshll.u32 %v4174_v35, 16  ;;  %v2187_v61 = vshll.u32 %v3651_v47, 16  ;;  %v3392_v63 = vld [vmem:[%s3932_s23 + $0x3c] sm:$0xf] }
  0x41   : > { %614 = vrot.lane.b32.xlu0 %v443_v42, %s3877_s30  ;;  %v2173_v50 = vor.u32 %v2172_v40, %v2168_v29  ;;  %v4190_v62 = vcombine.low %v233_v54, %v234_v57  ;;  %v454_v3 = vrot.slane %v452_v51, 1  ;;  %v2180_v4 = vshrl.u32 %v4186_v52, 16  ;;  %v3654_v9 = vld [vmem:[%s3932_s23 + $0x2c] ss:$0 sps:$4 sm:$0x11]  }
  0x42   : > { %v449_v60 = vrot.slane %v447_v45, 1  ;;  %v2182_v8 = vshll.u32 %v4186_v52, 16  ;;  %v2189_v12 = vrot.slane %v2187_v61, 1  ;;  %v3393_v20 = vld [vmem:[%s3932_s23 + $0x40] sm:$0xf]  ;;  %v464_v22 = vshll.u32 %v3654_v9, 16 }
  0x43   : > { %v2178_v0 = vsel %vm419_vm0, %v2173_v50, %v2177_v43  ;;  %v457_v13 = vshrl.u32 %v4190_v62, 16  ;;  %v459_v19 = vshll.u32 %v4190_v62, 16  ;;  %v4201_v24 = vcombine.low %v3392_v63, %v3393_v20  ;;  %v3657_v29 = vld [vmem:[%s3932_s23 + $0x44] ss:$0 sps:$4 sm:$0x11]  }
  0x44   : > { %2349 = vrot.lane.b32.xlu1 %v2178_v0, %s3877_s30  ;;  %v450_v11 = vor.u32 %v449_v60, %v445_v44  ;;  %v2184_v21 = vrot.slane %v2182_v8, 1  ;;  %v235_v30 = vld [vmem:[%s3932_s23 + $0x30] sm:$0xf]  ;;  %v466_v34 = vrot.slane %v464_v22, 1  ;;  %v236_v39 = vld [vmem:[%s3932_s23 + $0x34] sm:$0xf] }
  0x45   : > { %v461_v27 = vrot.slane %v459_v19, 1  ;;  %v2192_v36 = vshrl.u32 %v4201_v24, 16  ;;  %v2194_v37 = vshll.u32 %v4201_v24, 16  ;;  %v2199_v41 = vshll.u32 %v3657_v29, 16  ;;  %v3394_v57 = vld [vmem:[%s3932_s23 + $0x48] sm:$0xf] }
  0x46   : > { %v455_v25 = vsel %vm419_vm0, %v450_v11, %v454_v3  ;;  %v2185_v31 = vor.u32 %v2184_v21, %v2180_v4  ;;  %v4210_v42 = vcombine.low %v235_v30, %v236_v39  ;;  %v3660_v43 = vld [vmem:[%s3932_s23 + $0x38] ss:$0 sps:$4 sm:$0x11]   ;;  %v3395_v63 = vld [vmem:[%s3932_s23 + $0x4c] sm:$0xf] }
  0x47   : > { %616 = vrot.lane.b32.xlu0 %v455_v25, %s3877_s30  ;;  %v462_v40 = vor.u32 %v461_v27, %v457_v13  ;;  %v2196_v45 = vrot.slane %v2194_v37, 1  ;;  %v2201_v50 = vrot.slane %v2199_v41, 1  ;;  %v476_v61 = vshll.u32 %v3660_v43, 16  ;;  %v3663_v4 = vld [vmem:[%s3932_s23 + $0x50] ss:$0 sps:$4 sm:$0x11]  }
  0x48   : > { %5304 = vst [vmem:[#allocation2_spill] sm:$0xff] %v4210_v42  ;;  %v2190_v44 = vsel %vm419_vm0, %v2185_v31, %v2189_v12  ;;  %v469_v51 = vshrl.u32 %v4210_v42, 16  ;;  %v471_v54 = vshll.u32 %v4210_v42, 16  ;;  %v4221_v3 = vcombine.low %v3394_v57, %v3395_v63  ;;  %v237_v11 = vld [vmem:[%s3932_s23 + $0x3c] sm:$0xf] }
  0x49   : > { %2351 = vrot.lane.b32.xlu1 %v2190_v44, %s3877_s30  ;;  %v467_v47 = vsel %vm419_vm0, %v462_v40, %v466_v34  ;;  %v2197_v60 = vor.u32 %v2196_v45, %v2192_v36  ;;  %v478_v9 = vrot.slane %v476_v61, 1  ;;  %v2211_v20 = vshll.u32 %v3663_v4, 16  ;;  %v238_v21 = vld [vmem:[%s3932_s23 + $0x40] sm:$0xf]  ;;  %v3396_v37 = vld [vmem:[%s3932_s23 + $0x54] sm:$0xf] }
  0x4a   : > { %v473_v0 = vrot.slane %v471_v54, 1  ;;  %5305 = vst [vmem:[#allocation3_spill] sm:$0xff] %v4221_v3  ;;  %v2204_v13 = vshrl.u32 %v4221_v3, 16  ;;  %v2206_v19 = vshll.u32 %v4221_v3, 16  ;;  %v4230_v22 = vcombine.low %v237_v11, %v238_v21  ;;  %v3397_v40 = vld [vmem:[%s3932_s23 + $0x58] sm:$0xf] }
  0x4b   : > { %618 = vrot.lane.b32.xlu0 %v467_v47, %s3877_s30  ;;  %v2202_v8 = vsel %vm419_vm0, %v2197_v60, %v2201_v50  ;;  %v3666_v25 = vld [vmem:[%s3932_s23 + $0x44] ss:$0 sps:$4 sm:$0x11]   ;;  %v2213_v30 = vrot.slane %v2211_v20, 1  ;;  %v4239_v44 = vcombine.low %v3396_v37, %v3397_v40  ;;  %v239_v50 = vld [vmem:[%s3932_s23 + $0x48] sm:$0xf] }
  0x4c   : > { %v474_v12 = vor.u32 %v473_v0, %v469_v51  ;;  %5306 = vst [vmem:[#allocation4_spill] sm:$0xff] %v4230_v22  ;;  %v2208_v29 = vrot.slane %v2206_v19, 1  ;;  %v481_v31 = vshrl.u32 %v4230_v22, 16  ;;  %v483_v34 = vshll.u32 %v4230_v22, 16  ;;  %v240_v51 = vld [vmem:[%s3932_s23 + $0x4c] sm:$0xf] }
  0x4d   : > { %2353 = vrot.lane.b32.xlu1 %v2202_v8, %s3877_s30  ;;  %v488_v36 = vshll.u32 %v3666_v25, 16  ;;  %5307 = vst [vmem:[#allocation5_spill] sm:$0xff] %v4239_v44  ;;  %v3669_v45 = vld [vmem:[%s3932_s23 + $0x5c] ss:$0 sps:$4 sm:$0x11]   ;;  %v2216_v57 = vshrl.u32 %v4239_v44, 16  ;;  %v4248_v63 = vcombine.low %v239_v50, %v240_v51 }
  0x4e   : > { %v479_v27 = vsel %vm419_vm0, %v474_v12, %v478_v9  ;;  %v2209_v39 = vor.u32 %v2208_v29, %v2204_v13  ;;  %v485_v41 = vrot.slane %v483_v34, 1  ;;  %v2218_v60 = vshll.u32 %v4239_v44, 16  ;;  %v3672_v0 = vld [vmem:[%s3932_s23 + $0x50] ss:$0 sps:$4 sm:$0x11]  }
  0x4f   : > { %620 = vrot.lane.b32.xlu0 %v479_v27, %s3877_s30  ;;  %v490_v43 = vrot.slane %v488_v36, 1  ;;  %v2223_v61 = vshll.u32 %v3669_v45, 16  ;;  %5308 = vst [vmem:[#allocation6_spill] sm:$0xff] %v4248_v63  ;;  %v1304_v4 = vrot.slane %v3947_v7, 1  ;;  %v3250_v12 = vld [vmem:[%s3932_s23 + $0x6c] sm:$0xe] }
  0x50   : > { %v2214_v47 = vsel %vm419_vm0, %v2209_v39, %v2213_v30  ;;  %v486_v54 = vor.u32 %v485_v41, %v481_v31  ;;  %v2220_v9 = vrot.slane %v2218_v60, 1  ;;  %v493_v13 = vshrl.u32 %v4248_v63, 16  ;;  %v3398_v25 = vld [vmem:[%s3932_s23 + $0x60] sm:$0xf]  ;;  %v3399_v7 = vld [vmem:[%s3932_s23 + $0x64] sm:$0xf] }
  0x51   : > { %2355 = vrot.lane.b32.xlu1 %v2214_v47, %s3877_s30  ;;  %v2225_v11 = vrot.slane %v2223_v61, 1  ;;  %v495_v19 = vshll.u32 %v4248_v63, 16  ;;  %v500_v20 = vshll.u32 %v3672_v0, 16  ;;  %v3298_v21 = vcombine.low %v3250_v12, %v3939_v5  ;;  %v3676_v36 = vld [vmem:[%s3932_s23 + $0x68] ss:$0 sps:$4 sm:$0x11]  }
  0x52   : > { %v491_v8 = vsel %vm419_vm0, %v486_v54, %v490_v43  ;;  %v2221_v27 = vor.u32 %v2220_v9, %v2216_v57  ;;  %v4260_v34 = vcombine.low %v3398_v25, %v3399_v7  ;;  %v3242_v39 = vld [vmem:[%s3932_s23 + $0xc] sm:$0xe]  ;;  %v241_v45 = vld [vmem:[%s3932_s23 + $0x54] sm:$0xf]  ;;  %v2235_v47 = vshll.u32 %v3676_v36, 16 }
  0x53   : > { %622 = vrot.lane.b32.xlu0 %v491_v8, %s3877_s30  ;;  %v497_v29 = vrot.slane %v495_v19, 1  ;;  %v502_v30 = vrot.slane %v500_v20, 1  ;;  %v1303_v31 = vrot.slane %v3298_v21, 1  ;;  %v3290_v50 = vcombine.low %v3242_v39, %v3954_v10  ;;  %v242_v54 = vld [vmem:[%s3932_s23 + $0x58] sm:$0xf] }
  0x54   : > { %5309 = vst [vmem:[#allocation7_spill] sm:$0xff] %v4260_v34  ;;  %v2226_v37 = vsel %vm419_vm0, %v2221_v27, %v2225_v11  ;;  %v2228_v41 = vshrl.u32 %v4260_v34, 16  ;;  %v2230_v43 = vshll.u32 %v4260_v34, 16  ;;  %v1280_v51 = vrot.slane %v3964_v16, 1  ;;  %v3400_v16 = vld [vmem:[%s3932_s23 + $0x6c] sm:$0xf] }
  0x55   : > { %2357 = vrot.lane.b32.xlu1 %v2226_v37, %s3877_s30  ;;  %v498_v40 = vor.u32 %v497_v29, %v493_v13  ;;  %v1305_v5 = vsel %vm692_vm1, %v1303_v31, %v1304_v4  ;;  %v4275_v61 = vcombine.low %v241_v45, %v242_v54  ;;  %v3681_v0 = vld [vmem:[%s3932_s23 + $0x5c] ss:$0 sps:$4 sm:$0x11]   ;;  %v2237_v4 = vrot.slane %v2235_v47, 1  ;;  %v3401_v19 = vld [vmem:[%s3932_s23 + $0x70] sm:$0xf] }
  0x56   : > { %3350 = vmatprep.mubr.msk.bf16.mxu1 %vm741_vm2, %v1305_v5  ;;  %v2232_v60 = vrot.slane %v2230_v43, 1  ;;  %v1279_v8 = vrot.slane %v3290_v50, 1  ;;  %v512_v12 = vshll.u32 %v3681_v0, 16  ;;  %v4286_v27 = vcombine.low %v3400_v16, %v3401_v19  ;;  %v3685_v7 = vld [vmem:[%s3932_s23 + $0x74] ss:$0 sps:$4 sm:$0x11]  }
  0x57   : > { %v503_v57 = vsel %vm419_vm0, %v498_v40, %v502_v30  ;;  %5310 = vst [vmem:[#allocation8_spill] sm:$0xff] %v4275_v61  ;;  %v505_v11 = vshrl.u32 %v4275_v61, 16  ;;  %v507_v10 = vshll.u32 %v4275_v61, 16  ;;  %v2247_v36 = vshll.u32 %v3685_v7, 16  ;;  %v243_v37 = vld [vmem:[%s3932_s23 + $0x60] sm:$0xf] }
  0x58   : > { %624 = vrot.lane.b32.xlu0 %v503_v57, %s3877_s30  ;;  %v2233_v9 = vor.u32 %v2232_v60, %v2228_v41  ;;  %v1281_v13 = vsel %vm692_vm1, %v1279_v8, %v1280_v51  ;;  %v514_v25 = vrot.slane %v512_v12, 1  ;;  %5311 = vst [vmem:[#allocation9_spill] sm:$0xff] %v4286_v27  ;;  %v2240_v30 = vshrl.u32 %v4286_v27, 16  ;;  %v244_v39 = vld [vmem:[%s3932_s23 + $0x64] sm:$0xf] }
  0x59   : > { %3342 = vmatprep.mubr.msk.bf16.mxu0 %vm741_vm2, %v1281_v13  ;;  %v509_v21 = vrot.slane %v507_v10, 1  ;;  %v2242_v31 = vshll.u32 %v4286_v27, 16  ;;  %v2249_v41 = vrot.slane %v2247_v36, 1  ;;  %v4295_v43 = vcombine.low %v243_v37, %v244_v39  ;;  %v3689_v45 = vld [vmem:[%s3932_s23 + $0x68] ss:$0 sps:$4 sm:$0x11]  }
  0x5a   : > { %v2238_v20 = vsel %vm419_vm0, %v2233_v9, %v2237_v4  ;;  %v524_v54 = vshll.u32 %v3689_v45, 16  ;;  %v3402_v57 = vld [vmem:[%s3932_s23 + $0x78] sm:$0xf]  ;;  %v3403_v60 = vld [vmem:[%s3932_s23 + $0x7c] sm:$0xf]  ;;  %v3686_v27 = vld [vmem:[%s5276_s1 + $0xf0] sm:$0xff]  }
  0x5b   : > { %2359 = vrot.lane.b32.xlu1 %v2238_v20, %s3877_s30  ;;  %v510_v29 = vor.u32 %v509_v21, %v505_v11  ;;  %v2244_v5 = vrot.slane %v2242_v31, 1  ;;  %5312 = vst [vmem:[#allocation10_spill] sm:$0xff] %v4295_v43  ;;  %v517_v50 = vshrl.u32 %v4295_v43, 16  ;;  %v519_v51 = vshll.u32 %v4295_v43, 16  ;;  %v245_v19 = vld [vmem:[%s3932_s23 + $0x6c] sm:$0xf] }
  0x5c   : > { %v526_v8 = vrot.slane %v524_v54, 1  ;;  %v4304_v9 = vcombine.low %v3402_v57, %v3403_v60  ;;  %v3694_v11 = vld [vmem:[%s3932_s23 + $0x80] ss:$0 sps:$4 sm:$0x11]   ;;  %v257_v3 = vld [vmem:[%s3932_s23 + $0xb4] sm:$0xf] }
  0x5d   : > { %v515_v40 = vsel %vm419_vm0, %v510_v29, %v514_v25  ;;  %v2245_v47 = vor.u32 %v2244_v5, %v2240_v30  ;;  %v521_v4 = vrot.slane %v519_v51, 1  ;;  %v2259_v13 = vshll.u32 %v3694_v11, 16  ;;  %v246_v25 = vld [vmem:[%s3932_s23 + $0x70] sm:$0xf] }
  0x5e   : > { %626 = vrot.lane.b32.xlu0 %v515_v40, %s3877_s30  ;;  %5313 = vst [vmem:[#allocation11_spill] sm:$0xff] %v4304_v9  ;;  %v2252_v12 = vshrl.u32 %v4304_v9, 16  ;;  %v2254_v16 = vshll.u32 %v4304_v9, 16  ;;  %v4314_v29 = vcombine.low %v245_v19, %v246_v25  ;;  %v3699_v30 = vld [vmem:[%s3932_s23 + $0x74] ss:$0 sps:$4 sm:$0x11]  }
  0x5f   : > { %v2250_v0 = vsel %vm419_vm0, %v2245_v47, %v2249_v41  ;;  %v522_v10 = vor.u32 %v521_v4, %v517_v50  ;;  %v2261_v7 = vrot.slane %v2259_v13, 1  ;;  %v536_v39 = vshll.u32 %v3699_v30, 16  ;;  %v3404_v40 = vld [vmem:[%s3932_s23 + $0x84] sm:$0xf]  ;;  %v3405_v41 = vld [vmem:[%s3932_s23 + $0x88] sm:$0xf] }
  0x60   : > { %2361 = vrot.lane.b32.xlu1 %v2250_v0, %s3877_s30  ;;  %v2256_v21 = vrot.slane %v2254_v16, 1  ;;  %5314 = vst [vmem:[#allocation12_spill] sm:$0xff] %v4314_v29  ;;  %v529_v36 = vshrl.u32 %v4314_v29, 16  ;;  %v531_v37 = vshll.u32 %v4314_v29, 16  ;;  %v4323_v50 = vcombine.low %v3404_v40, %v3405_v41  ;;  %v247_v4 = vld [vmem:[%s3932_s23 + $0x78] sm:$0xf] }
  0x61   : > { %v527_v20 = vsel %vm419_vm0, %v522_v10, %v526_v8  ;;  %v538_v47 = vrot.slane %v536_v39, 1  ;;  %v3703_v51 = vld [vmem:[%s3932_s23 + $0x8c] ss:$0 sps:$4 sm:$0x11]   ;;  %v4330_v8 = vld [vmem:[%s3932_s23 + $0x7c] sm:$0xf] }
  0x62   : > { %628 = vrot.lane.b32.xlu0 %v527_v20, %s3877_s30  ;;  %v2257_v31 = vor.u32 %v2256_v21, %v2252_v12  ;;  %v533_v45 = vrot.slane %v531_v37, 1  ;;  %5315 = vst [vmem:[#allocation13_spill] sm:$0xff] %v4323_v50  ;;  %v2264_v57 = vshrl.u32 %v4323_v50, 16  ;;  %v2266_v60 = vshll.u32 %v4323_v50, 16  ;;  %v3251_v19 = vld [vmem:[%s3932_s23 + $0x78] sm:$0xe] }
  0x63   : > { %v2271_v0 = vshll.u32 %v3703_v51, 16  ;;  %v4334_v16 = vcombine.low %v247_v4, %v4330_v8  ;;  %v4337_v13 = vld [vmem:[%s3932_s23 + $0x80] ss:$0 sps:$4 sm:$0x11]   ;;  %v3406_v30 = vld [vmem:[%s3932_s23 + $0x90] sm:$0xf] }
  0x64   : > { %v2262_v5 = vsel %vm419_vm0, %v2257_v31, %v2261_v7  ;;  %v534_v54 = vor.u32 %v533_v45, %v529_v36  ;;  %v2268_v10 = vrot.slane %v2266_v60, 1  ;;  %v548_v7 = vshll.u32 %v4337_v13, 16  ;;  %v4346_v31 = vld [vmem:[%s3932_s23 + $0x94] sm:$0xf]  ;;  %v3252_v45 = vld [vmem:[%s3932_s23 + $0x84] sm:$0xe] }
  0x65   : > { %2363 = vrot.lane.b32.xlu1 %v2262_v5, %s3877_s30  ;;  %v2273_v12 = vrot.slane %v2271_v0, 1  ;;  %5316 = vst [vmem:[#allocation14_spill] sm:$0xff] %v4334_v16  ;;  %v541_v21 = vshrl.u32 %v4334_v16, 16  ;;  %v543_v25 = vshll.u32 %v4334_v16, 16  ;;  %v4350_v40 = vcombine.low %v3406_v30, %v4346_v31  ;;  %v3243_v5 = vld [vmem:[%s3932_s23 + $0x18] sm:$0xe] }
  0x66   : > { %v539_v11 = vsel %vm419_vm0, %v534_v54, %v538_v47  ;;  %v2269_v20 = vor.u32 %v2268_v10, %v2264_v57  ;;  %v550_v39 = vrot.slane %v548_v7, 1  ;;  %v4355_v41 = vld [vmem:[%s3932_s23 + $0x98] ss:$0 sps:$4 sm:$0x11]   ;;  %v3784_v57 = vld [vmem:[%s3932_s23 + $0x7c] sm:$0xf] }
  0x67   : > { %630 = vrot.lane.b32.xlu0 %v539_v11, %s3877_s30  ;;  %v545_v37 = vrot.slane %v543_v25, 1  ;;  %5317 = vst [vmem:[#allocation15_spill] sm:$0xff] %v4350_v40  ;;  %v2276_v51 = vshrl.u32 %v4350_v40, 16  ;;  %v2278_v54 = vshll.u32 %v4350_v40, 16  ;;  %v3299_v60 = vcombine.low %v3251_v19, %v3784_v57  ;;  %v249_v4 = vld [vmem:[%s3932_s23 + $0x84] sm:$0xf] }
  0x68   : > { %v2274_v36 = vsel %vm419_vm0, %v2269_v20, %v2273_v12  ;;  %v2283_v0 = vshll.u32 %v4355_v41, 16  ;;  %v4365_v12 = vld [vmem:[%s3932_s23 + $0x88] sm:$0xf]  ;;  %v4372_v25 = vld [vmem:[%s3932_s23 + $0x8c] ss:$0 sps:$4 sm:$0x11]  }
  0x69   : > { %2365 = vrot.lane.b32.xlu1 %v2274_v36, %s3877_s30  ;;  %v546_v47 = vor.u32 %v545_v37, %v541_v21  ;;  %v2280_v10 = vrot.slane %v2278_v54, 1  ;;  %v4369_v21 = vcombine.low %v249_v4, %v4365_v12  ;;  %v3785_v7 = vld [vmem:[%s3932_s23 + $0x80] ss:$0 sps:$4 sm:$0x11]   ;;  %v3786_v30 = vld [vmem:[%s3932_s23 + $0x1c] sm:$0xf] }
  0x6a   : > { %v2285_v20 = vrot.slane %v2283_v0, 1  ;;  %v1307_v19 = vrot.slane %v3785_v7, 1  ;;  %v3291_v36 = vcombine.low %v3243_v5, %v3786_v30  ;;  %v3787_v37 = vld [vmem:[%s3932_s23 + $0x88] sm:$0xf]  ;;  %v1306_v54 = vrot.slane %v3299_v60, 1 }
  0x6b   : > { %v551_v11 = vsel %vm419_vm0, %v546_v47, %v550_v39  ;;  %5318 = vst [vmem:[#allocation16_spill] sm:$0xff] %v4369_v21  ;;  %v3300_v39 = vcombine.low %v3252_v45, %v3787_v37  ;;  %v2281_v47 = vor.u32 %v2280_v10, %v2276_v51  ;;  %v553_v57 = vshrl.u32 %v4369_v21, 16  ;;  %v4383_v40 = vld [vmem:[%s3932_s23 + $0xa0] sm:$0xf]  ;;  %v3253_v9 = vld [vmem:[%s3932_s23 + $0x90] sm:$0xe] }
  0x6c   : > { %632 = vrot.lane.b32.xlu0 %v551_v11, %s3877_s30  ;;  %v555_v0 = vshll.u32 %v4369_v21, 16  ;;  %v560_v4 = vshll.u32 %v4372_v25, 16  ;;  %v3408_v11 = vld [vmem:[%s3932_s23 + $0x9c] sm:$0xf]  ;;  %v1282_v60 = vrot.slane %v3291_v36, 1 }
  0x6d   : > { %v2286_v1 = vsel %vm419_vm0, %v2281_v47, %v2285_v20  ;;  %v4387_v45 = vcombine.low %v3408_v11, %v4383_v40  ;;  %v4390_v51 = vld [vmem:[%s3932_s23 + $0xa4] ss:$0 sps:$4 sm:$0x11]   ;;  %v3788_v10 = vld [vmem:[%s3932_s23 + $0x20] ss:$0 sps:$4 sm:$0x11]  }
  0x6e   : > { %2367 = vrot.lane.b32.xlu1 %v2286_v1, %s3877_s30  ;;  %v557_v5 = vrot.slane %v555_v0, 1  ;;  %v562_v7 = vrot.slane %v560_v4, 1  ;;  %v1283_v30 = vrot.slane %v3788_v10, 1  ;;  %v4393_v37 = vrot.slane %v3300_v39, 1  ;;  %v3677_v1 = vld [vmem:[%s5276_s1 + $0x38] sm:$0xff]  }
  0x6f   : > { %5319 = vst [vmem:[#allocation17_spill] sm:$0xff] %v4387_v45  ;;  %v4396_v20 = vld [vmem:[%s3932_s23 + $0x8c] ss:$0 sps:$4 sm:$0x11]   ;;  %v2288_v4 = vshrl.u32 %v4387_v45, 16  ;;  %v2290_v36 = vshll.u32 %v4387_v45, 16  ;;  %v1308_v10 = vsel %vm692_vm1, %v1306_v54, %v1307_v19 }
  0x70   : > { %v1310_v47 = vrot.slane %v4396_v20, 1  ;;  %v558_v0 = vor.u32 %v557_v5, %v553_v57  ;;  %v2295_v11 = vshll.u32 %v4390_v51, 16  ;;  %v251_v39 = vld [vmem:[%s3932_s23 + $0x90] sm:$0xf]  ;;  %v4408_v21 = vld [vmem:[%s3932_s23 + $0x94] sm:$0xf]  ;;  %v1284_v61 = vsel %vm692_vm1, %v1282_v60, %v1283_v30 }
  0x71   : > { %v2292_v50 = vrot.slane %v2290_v36, 1  ;;  %v4412_v57 = vcombine.low %v251_v39, %v4408_v21  ;;  %v4415_v5 = vld [vmem:[%s3932_s23 + $0x98] ss:$0 sps:$4 sm:$0x11]   ;;  %v3244_v54 = vld [vmem:[%s3932_s23 + $0x24] sm:$0xe] }
  0x72   : > { %v563_v20 = vsel %vm419_vm0, %v558_v0, %v562_v7  ;;  %v2297_v29 = vrot.slane %v2295_v11, 1  ;;  %v3679_v19 = vld [vmem:[%s5276_s1 + $0xf8] sm:$0xff]   ;;  %v3683_v7 = vld [vmem:[%s5276_s1 + $0x30] sm:$0xff]   ;;  %v4434_v39 = vld [vmem:[%s3932_s23 + $0xac] sm:$0xf] }
  0x73   : > { %5320 = vst [vmem:[#allocation18_spill] sm:$0xff] %v4412_v57  ;;  %634 = vrot.lane.b32.xlu0 %v563_v20, %s3877_s30  ;;  %v2293_v0 = vor.u32 %v2292_v50, %v2288_v4  ;;  %v565_v36 = vshrl.u32 %v4412_v57, 16  ;;  %v567_v11 = vshll.u32 %v4412_v57, 16  ;;  %v5321_v20 = vmov 0  }
  0x74   : > { %v4542_v44 = vld [vmem:[%s3932_s23 + $0xb0] ss:$0 sps:$4 sm:$0x11]   ;;  %v3797_v22 = vld [vmem:[%s3932_s23 + $0xa4] ss:$0 sps:$4 sm:$0x11]  }
  0x75   : > { %v2298_v50 = vsel %vm419_vm0, %v2293_v0, %v2297_v29  ;;  %v569_v4 = vrot.slane %v567_v11, 1  ;;  %v3690_v29 = vld [vmem:[%s5276_s1 + $0x28] sm:$0xff]  }
  0x76   : > { %v3790_v0 = vld [vmem:[%s3932_s23 + $0x28] sm:$0xf]  ;;  %2369 = vrot.lane.b32.xlu1 %v2298_v50, %s3877_s30 }
  0x77   : > { %v3292_v11 = vcombine.low %v3244_v54, %v3790_v0  ;;  %v570_v34 = vor.u32 %v569_v4, %v565_v36  ;;  %v3792_v0 = vld [vmem:[%s3932_s23 + $0x2c] ss:$0 sps:$4 sm:$0x11]   ;;  %v1311_v36 = vsel %vm692_vm1, %v4393_v37, %v1310_v47  ;;  %v3793_v4 = vld [vmem:[%s3932_s23 + $0x98] ss:$0 sps:$4 sm:$0x11]  }
  0x8e   : > { %v1216_v16 = vpop.permute.xlu0 %1215 }
  0x8f   : > { %v1352_v45 = vsel %vm741_vm2, %v3944_v6, %v1216_v16  ;;  %v572_v6 = vshll.u32 %v4415_v5, 16  ;;  %v3410_v16 = vld [vmem:[%s3932_s23 + $0xa8] sm:$0xf] }
  0x90   : > { %1617 = vmatmul.mubr.bf16.vlgmr.msra.gmra.mxu1 %v1352_v45  ;;  %v4439_v57 = vcombine.low %v3410_v16, %v4434_v39 }
  0x91   : > { %1802 = vmatpush1.bf16.msra.mxu1 %v3677_v1  ;;  %3351 = vmatprep.mubr.msk.bf16.mxu1 %vm741_vm2, %v1308_v10  ;;  %v574_v43 = vrot.slane %v572_v6, 1  ;;  %v3791_v6 = vld [vmem:[%s3932_s23 + $0x94] sm:$0xf] }
  0x92   : > { %v1200_v45 = vpop.permute.xlu0 %1199  ;;  %1803 = vmatprep.subr.bf16.mxu1 %v5321_v20  ;;  %5322 = vst [vmem:[#allocation19_spill] sm:$0xff] %v4439_v57  ;;  %v1218_v10 = vpop.permute.xlu1 %1217  ;;  %v3301_v16 = vcombine.low %v3253_v9, %v3791_v6  ;;  %v2300_v60 = vshrl.u32 %v4439_v57, 16  ;;  %v2302_v30 = vshll.u32 %v4439_v57, 16  ;;  %v1286_v9 = vrot.slane %v3792_v0, 1  ;;  %v253_v6 = vld [vmem:[%s3932_s23 + $0x9c] sm:$0xf] }
  0x93   : > { %v1328_v1 = vsel %vm741_vm2, %v3961_v15, %v1200_v45  ;;  %v4454_v15 = vld [vmem:[%s3932_s23 + $0xb0] ss:$0 sps:$4 sm:$0x11]   ;;  %v3245_v45 = vld [vmem:[%s3932_s23 + $0x30] sm:$0xe]  ;;  %v1355_v54 = vsel %vm741_vm2, %v3977_v26, %v1218_v10  ;;  %v575_v26 = vsel %vm419_vm0, %v570_v34, %v574_v43  ;;  %v3692_v0 = vld [vmem:[%s5276_s1 + $0xe8] sm:$0xff]  }
  0x94   : > { %1553 = vmatmul.mubr.bf16.vlgmr.msra.gmra.mxu0 %v1328_v1  ;;  %v2307_v50 = vshll.u32 %v4454_v15, 16  ;;  %v4471_v1 = vld [vmem:[%s3932_s23 + $0xa0] sm:$0xf]  ;;  %v1312_v57 = vrot.slane %v3301_v16, 1  ;;  %636 = vrot.lane.b32.xlu0 %v575_v26, %s3877_s30  ;;  %v3794_v43 = vld [vmem:[%s3932_s23 + $0x34] sm:$0xf] }
  0x95   : > { %2669 = vmatpush1.bf16.msra.mxu0 %v3679_v19  ;;  %1804 = vmatpush1.bf16.msra.mxu1 %v3683_v7  ;;  %v1313_v19 = vrot.slane %v3793_v4, 1  ;;  %v2304_v7 = vrot.slane %v2302_v30, 1  ;;  %v4479_v47 = vcombine.low %v253_v6, %v4471_v1  ;;  %v4482_v34 = vld [vmem:[%s3932_s23 + $0xa4] ss:$0 sps:$4 sm:$0x11]   ;;  %v3293_v30 = vcombine.low %v3245_v45, %v3794_v43 }
  0x96   : > { %2670 = vmatprep.subr.bf16.mxu0 %v5321_v20  ;;  %3343 = vmatprep.mubr.msk.bf16.mxu0 %vm741_vm2, %v1284_v61  ;;  %v1202_v10 = vpop.permute.xlu1 %1201  ;;  %v1285_v61 = vrot.slane %v3292_v11, 1  ;;  %v2309_v37 = vrot.slane %v2307_v50, 1  ;;  %v3254_v4 = vld [vmem:[%s3932_s23 + $0x9c] sm:$0xe]  ;;  %v1220_v16 = vpop.permute.xlu0 %1219  ;;  %v3695_v50 = vld [vmem:[%s5276_s1 + $0x20] sm:$0xff]   ;;  %v584_v26 = vshll.u32 %v4482_v34, 16 }
  0x97   : > { %1805 = vmatprep.subr.bf16.mxu1 %v5321_v20  ;;  %5323 = vst [vmem:[#allocation20_spill] sm:$0xff] %v4479_v47  ;;  %v2305_v63 = vor.u32 %v2304_v7, %v2300_v60  ;;  %v1331_v11 = vsel %vm741_vm2, %v3980_v28, %v1202_v10  ;;  %v577_v6 = vshrl.u32 %v4479_v47, 16  ;;  %v3412_v45 = vld [vmem:[%s3932_s23 + $0xb4] sm:$0xf] }
  0x98   : > { %1625 = vmatmul.mubr.bf16.gmra.mxu1 %v1355_v54  ;;  %v579_v54 = vshll.u32 %v4479_v47, 16  ;;  %v586_v7 = vrot.slane %v584_v26, 1  ;;  %v4508_v43 = vld [vmem:[%s3932_s23 + $0xbc] ss:$0 sps:$4 sm:$0x11]  }
  0x99   : > { %2671 = vmatpush1.bf16.msra.mxu0 %v3686_v27  ;;  %1806 = vmatpush1.bf16.msra.mxu1 %v3690_v29  ;;  %v2310_v28 = vsel %vm419_vm0, %v2305_v63, %v2309_v37  ;;  %v4499_v27 = vld [vmem:[%s3932_s23 + $0xb8] sm:$0xf]  ;;  %v1287_v29 = vsel %vm692_vm1, %v1285_v61, %v1286_v9  ;;  %v1358_v63 = vsel %vm741_vm2, %v3994_v46, %v1220_v16  ;;  %v1288_v9 = vrot.slane %v3293_v30, 1  ;;  %v4524_v46 = vld [vmem:[%s3932_s23 + $0xa8] sm:$0xe] }
  0x9a   : > { %2672 = vmatprep.subr.bf16.mxu0 %v5321_v20  ;;  %3352 = vmatprep.mubr.msk.bf16.mxu1 %vm741_vm2, %v1311_v36  ;;  %v581_v60 = vrot.slane %v579_v54, 1  ;;  %v4505_v10 = vcombine.low %v3412_v45, %v4499_v27  ;;  %v3697_v36 = vld [vmem:[%s5276_s1 + $0xe0] sm:$0xff]   ;;  %v3795_v61 = vld [vmem:[%s3932_s23 + $0x38] ss:$0 sps:$4 sm:$0x11]   ;;  %v1204_v45 = vpop.permute.xlu1 %1203  ;;  %v2319_v47 = vshll.u32 %v4508_v43, 16 }
  0x9b   : > { %1807 = vmatprep.subr.bf16.mxu1 %v5321_v20  ;;  %2371 = vrot.lane.b32.xlu1 %v2310_v28, %s3877_s30  ;;  %v1289_v37 = vrot.slane %v3795_v61, 1  ;;  %v3796_v54 = vld [vmem:[%s3932_s23 + $0xa0] sm:$0xf]  ;;  %v4521_v28 = vld [vmem:[%s3932_s23 + $0x3c] sm:$0xe] }
  0x9c   : > { %5324 = vst [vmem:[#allocation21_spill] sm:$0xff] %v4505_v10  ;;  %1561 = vmatmul.mubr.bf16.gmra.mxu0 %v1331_v11  ;;  %v3302_v26 = vcombine.low %v3254_v4, %v3796_v54  ;;  %v3701_v11 = vld [vmem:[%s5276_s1 + $0x18] sm:$0xff]   ;;  %v582_v16 = vor.u32 %v581_v60, %v577_v6  ;;  %v2312_v30 = vshrl.u32 %v4505_v10, 16  ;;  %v2314_v61 = vshll.u32 %v4505_v10, 16 }
  0x9d   : > { %2673 = vmatpush1.bf16.msra.mxu0 %v3692_v0  ;;  %1808 = vmatpush1.bf16.msra.mxu1 %v3695_v50  ;;  %v255_v0 = vld [vmem:[%s3932_s23 + $0xa8] sm:$0xf]  ;;  %v1314_v4 = vsel %vm692_vm1, %v1312_v57, %v1313_v19  ;;  %v4534_v50 = vld [vmem:[%s3932_s23 + $0xac] sm:$0xf]  ;;  %v2321_v54 = vrot.slane %v2319_v47, 1  ;;  %v3704_v57 = vld [vmem:[%s5276_s1 + $0xd8] sm:$0xff]  }
  0x9e   : > { %3344 = vmatprep.mubr.msk.bf16.mxu0 %vm741_vm2, %v1287_v29  ;;  %2674 = vmatprep.subr.bf16.mxu0 %v5321_v20  ;;  %v587_v6 = vsel %vm419_vm0, %v582_v16, %v586_v7  ;;  %v2316_v60 = vrot.slane %v2314_v61, 1  ;;  %v4539_v10 = vcombine.low %v255_v0, %v4534_v50  ;;  %v1334_v29 = vsel %vm741_vm2, %v4007_v59, %v1204_v45  ;;  %v3708_v59 = vld [vmem:[%s5276_s1 + $0x10] sm:$0xff]   ;;  %v1222_v16 = vpop.permute.xlu0 %1221  ;;  %v3799_v0 = vld [vmem:[%s3932_s23 + $0xac] sm:$0xf] }
  0x9f   : > { %1809 = vmatprep.subr.bf16.mxu1 %v5321_v20  ;;  %v1315_v19 = vrot.slane %v3302_v26, 1  ;;  %v1316_v7 = vrot.slane %v3797_v22, 1  ;;  %638 = vrot.lane.b32.xlu0 %v587_v6, %s3877_s30  ;;  %v596_v26 = vshll.u32 %v4542_v44, 16  ;;  %v1290_v22 = vsel %vm692_vm1, %v1288_v9, %v1289_v37  ;;  %v4566_v6 = vld [vmem:[%s3932_s23 + $0xc4] sm:$0xf] }
  0xa0   : > { %5325 = vst [vmem:[#allocation22_spill] sm:$0xff] %v4539_v10  ;;  %1633 = vmatmul.mubr.bf16.gmra.mxu1 %v1358_v63  ;;  %v2317_v47 = vor.u32 %v2316_v60, %v2312_v30  ;;  %v589_v63 = vshrl.u32 %v4539_v10, 16  ;;  %v591_v45 = vshll.u32 %v4539_v10, 16  ;;  %v3303_v30 = vcombine.low %v4524_v46, %v3799_v0  ;;  %v3713_v46 = vld [vmem:[%s5276_s1 + $0x8] sm:$0xff]  }
  0xa1   : > { %2675 = vmatpush1.bf16.msra.mxu0 %v3697_v36  ;;  %3353 = vmatprep.mubr.msk.bf16.mxu1 %vm741_vm2, %v1314_v4  ;;  %v3798_v36 = vld [vmem:[%s3932_s23 + $0x40] sm:$0xf]  ;;  %v598_v37 = vrot.slane %v596_v26, 1  ;;  %v4582_v10 = vld [vmem:[%s3932_s23 + $0xc8] ss:$0 sps:$4 sm:$0x11]  }
  0xa2   : > { %1810 = vmatpush1.bf16.msra.mxu1 %v3701_v11  ;;  %2676 = vmatprep.subr.bf16.mxu0 %v5321_v20  ;;  %v3294_v61 = vcombine.low %v4521_v28, %v3798_v36  ;;  %v3414_v4 = vld [vmem:[%s3932_s23 + $0xc0] sm:$0xf]  ;;  %v3710_v11 = vld [vmem:[%s5276_s1 + $0xd0] sm:$0xff]   ;;  %v2322_v60 = vsel %vm419_vm0, %v2317_v47, %v2321_v54  ;;  %v593_v9 = vrot.slane %v591_v45, 1  ;;  %v1361_v54 = vsel %vm741_vm2, %v4013_v2, %v1222_v16  ;;  %v4591_v26 = vld [vmem:[%s3932_s23 + $0xb8] sm:$0xf] }
  0xa3   : > { %1811 = vmatprep.subr.bf16.mxu1 %v5321_v20  ;;  %v4574_v28 = vcombine.low %v3414_v4, %v4566_v6  ;;  %v3800_v36 = vld [vmem:[%s3932_s23 + $0x44] ss:$0 sps:$4 sm:$0x11]   ;;  %2373 = vrot.lane.b32.xlu1 %v2322_v60, %s3877_s30  ;;  %v1206_v4 = vpop.permute.xlu1 %1205  ;;  %v1317_v60 = vsel %vm692_vm1, %v1315_v19, %v1316_v7  ;;  %v3801_v2 = vld [vmem:[%s3932_s23 + $0xb0] ss:$0 sps:$4 sm:$0x11]   ;;  %v4604_v42 = vcombine.low %v257_v3, %v4591_v26 }
  0xa4   : > { %1569 = vmatmul.mubr.bf16.gmra.mxu0 %v1334_v29  ;;  %v1292_v0 = vrot.slane %v3800_v36, 1  ;;  %v594_v29 = vor.u32 %v593_v9, %v589_v63  ;;  %v1291_v36 = vrot.slane %v3294_v61, 1  ;;  %v2331_v16 = vshll.u32 %v4582_v10, 16  ;;  %v4598_v63 = vld [vmem:[%s3932_s23 + $0xbc] ss:$0 sps:$4 sm:$0x11]  }
  0xa5   : > { %5326 = vst [vmem:[#allocation23_spill] sm:$0xff] %v4574_v28  ;;  %2677 = vmatpush1.bf16.msra.mxu0 %v3704_v57  ;;  %3345 = vmatprep.mubr.msk.bf16.mxu0 %vm741_vm2, %v1290_v22  ;;  %v2324_v47 = vshrl.u32 %v4574_v28, 16  ;;  %v2326_v45 = vshll.u32 %v4574_v28, 16  ;;  %v1319_v57 = vrot.slane %v3801_v2, 1  ;;  %v1318_v22 = vrot.slane %v3303_v30, 1  ;;  %5327 = vst [vmem:[#allocation24_spill] sm:$0xff] %v4604_v42 }
  0xa6   : > { %1812 = vmatpush1.bf16.msra.mxu1 %v3708_v59  ;;  %2678 = vmatprep.subr.bf16.mxu0 %v5321_v20  ;;  %v3247_v9 = vld [vmem:[%s3932_s23 + $0x48] sm:$0xe]  ;;  %v599_v28 = vsel %vm419_vm0, %v594_v29, %v598_v37  ;;  %v3416_v19 = vld [vmem:[%s3932_s23 + $0xcc] sm:$0xf]  ;;  %v2333_v7 = vrot.slane %v2331_v16, 1  ;;  %v608_v61 = vshll.u32 %v4598_v63, 16  ;;  %v1337_v30 = vsel %vm741_vm2, %v4028_v23, %v1206_v4 }
  0xa7   : > { %1813 = vmatprep.subr.bf16.mxu1 %v5321_v20  ;;  %v2328_v59 = vrot.slane %v2326_v45, 1  ;;  %640 = vrot.lane.b32.xlu0 %v599_v28, %s3877_s30  ;;  %v4610_v2 = vld [vmem:[%s3932_s23 + $0xd0] sm:$0xf]  ;;  %v3715_v3 = vld [vmem:[%s5276_s1 + $0xc8] sm:$0xff]   ;;  %v601_v28 = vshrl.u32 %v4604_v42, 16  ;;  %v1224_v45 = vpop.permute.xlu0 %1223  ;;  %v1293_v16 = vsel %vm692_vm1, %v1291_v36, %v1292_v0  ;;  %v3719_v23 = vld [vmem:[%s5276_s1] sm:$0xff]  }
  0xa8   : > { %1641 = vmatmul.mubr.bf16.gmra.mxu1 %v1361_v54  ;;  %v603_v54 = vshll.u32 %v4604_v42, 16  ;;  %v4621_v29 = vld [vmem:[%s3932_s23 + $0xd4] ss:$0 sps:$4 sm:$0x11]   ;;  %v610_v42 = vrot.slane %v608_v61, 1  ;;  %v3722_v61 = vld [vmem:[%s5276_s1 + $0xc0] sm:$0xff]  }
  0xa9   : > { %3354 = vmatprep.mubr.msk.bf16.mxu1 %vm741_vm2, %v1317_v60  ;;  %2679 = vmatpush1.bf16.msra.mxu0 %v3710_v11  ;;  %v2329_v37 = vor.u32 %v2328_v59, %v2324_v47  ;;  %v3802_v11 = vld [vmem:[%s3932_s23 + $0x4c] sm:$0xf]  ;;  %v4630_v47 = vcombine.low %v3416_v19, %v4610_v2  ;;  %v3256_v60 = vld [vmem:[%s3932_s23 + $0xb4] sm:$0xe]  ;;  %v2343_v0 = vshll.u32 %v4621_v29, 16  ;;  %v1364_v19 = vsel %vm741_vm2, %v4042_v38, %v1224_v45  ;;  %v3726_v38 = vld [vmem:[%s5276_s1 + $0x58] sm:$0xff]  }
  0xaa   : > { %1814 = vmatpush1.bf16.msra.mxu1 %v3713_v46  ;;  %2680 = vmatprep.subr.bf16.mxu0 %v5321_v20  ;;  %v3295_v4 = vcombine.low %v3247_v9, %v3802_v11  ;;  %v605_v46 = vrot.slane %v603_v54, 1  ;;  %v1208_v11 = vpop.permute.xlu1 %1207 }
  0xab   : > { %1815 = vmatprep.subr.bf16.mxu1 %v5321_v20  ;;  %v2334_v59 = vsel %vm419_vm0, %v2329_v37, %v2333_v7  ;;  %v2336_v36 = vshrl.u32 %v4630_v47, 16  ;;  %v2338_v9 = vshll.u32 %v4630_v47, 16  ;;  %v1320_v7 = vsel %vm692_vm1, %v1318_v22, %v1319_v57 }
  0xac   : > { %1577 = vmatmul.mubr.bf16.gmra.mxu0 %v1337_v30  ;;  %2375 = vrot.lane.b32.xlu1 %v2334_v59, %s3877_s30  ;;  %v3803_v30 = vld [vmem:[%s3932_s23 + $0x50] ss:$0 sps:$4 sm:$0x11]   ;;  %v606_v54 = vor.u32 %v605_v46, %v601_v28  ;;  %v1294_v59 = vrot.slane %v3295_v4, 1  ;;  %v2345_v22 = vrot.slane %v2343_v0, 1  ;;  %v1226_v46 = vpop.permute.xlu0 %1225 }
  0xad   : > { %3346 = vmatprep.mubr.msk.bf16.mxu0 %vm741_vm2, %v1293_v16  ;;  %2681 = vmatpush1.bf16.msra.mxu0 %v3715_v3  ;;  %v1295_v37 = vrot.slane %v3803_v30, 1  ;;  %v3804_v3 = vld [vmem:[%s3932_s23 + $0xb8] sm:$0xf]  ;;  %v2340_v57 = vrot.slane %v2338_v9, 1  ;;  %v3248_v16 = vld [vmem:[%s3932_s23 + $0x54] sm:$0xe] }
  0xae   : > { %1816 = vmatpush1.bf16.msra.mxu1 %v3719_v23  ;;  %2682 = vmatprep.subr.bf16.mxu0 %v5321_v20  ;;  %v3304_v45 = vcombine.low %v3256_v60, %v3804_v3  ;;  %v611_v30 = vsel %vm419_vm0, %v606_v54, %v610_v42  ;;  %v1340_v23 = vsel %vm741_vm2, %v4059_v53, %v1208_v11  ;;  %v3805_v4 = vld [vmem:[%s3932_s23 + $0xbc] ss:$0 sps:$4 sm:$0x11]   ;;  %v3731_v53 = vld [vmem:[%s5276_s1 + $0x50] sm:$0xff]   ;;  %v3806_v9 = vld [vmem:[%s3932_s23 + $0x58] sm:$0xf] }
  0xaf   : > { %1825 = vmatprep.subr.bf16.mxu1 %v5321_v20  ;;  %642 = vrot.lane.b32.xlu0 %v611_v30, %s3877_s30  ;;  %v2341_v28 = vor.u32 %v2340_v57, %v2336_v36  ;;  %v1322_v60 = vrot.slane %v3805_v4, 1  ;;  %v3728_v42 = vld [vmem:[%s5276_s1 + $0x118] sm:$0xff]   ;;  %v1296_v0 = vsel %vm692_vm1, %v1294_v59, %v1295_v37  ;;  %v275_v37 = vld [vmem:[%s3932_s23] sm:$0xe]  ;;  %v1367_v11 = vsel %vm741_vm2, %v4063_v58, %v1226_v46  ;;  %v3733_v59 = vld [vmem:[%s5276_s1 + $0x110] sm:$0xff]  }
  0xb0   : > { %1649 = vmatmul.mubr.bf16.gmra.mxu1 %v1364_v19  ;;  %v1321_v36 = vrot.slane %v3304_v45, 1  ;;  %v3296_v19 = vcombine.low %v3248_v16, %v3806_v9  ;;  %v3808_v45 = vld [vmem:[%s3932_s23 + $0x64] sm:$0xf]  ;;  %v3809_v58 = vld [vmem:[%s3932_s23 + $0x5c] ss:$0 sps:$4 sm:$0x11]  }
  0xb1   : > { %3355 = vmatprep.mubr.msk.bf16.mxu1 %vm741_vm2, %v1320_v7  ;;  %2683 = vmatpush1.bf16.msra.mxu0 %v3722_v61  ;;  %v3257_v7 = vld [vmem:[%s3932_s23 + $0xc0] sm:$0xe]  ;;  %v2346_v54 = vsel %vm419_vm0, %v2341_v28, %v2345_v22  ;;  %v1210_v22 = vpop.permute.xlu1 %1209  ;;  %v1298_v28 = vrot.slane %v3809_v58, 1  ;;  %v3810_v4 = vld [vmem:[%s3932_s23 + $0x4] sm:$0xf]  ;;  %v3740_v9 = vld [vmem:[%s5276_s1 + $0x108] sm:$0xff]  }
  0xb2   : > { %1826 = vmatpush2.bf16.msra.mxu1 %v3726_v38  ;;  %2692 = vmatprep.subr.bf16.mxu0 %v5321_v20  ;;  %v3249_v61 = vld [vmem:[%s3932_s23 + $0x60] sm:$0xe]  ;;  %v3807_v38 = vld [vmem:[%s3932_s23 + $0xc4] sm:$0xf]  ;;  %v1323_v16 = vsel %vm692_vm1, %v1321_v36, %v1322_v60  ;;  %v1297_v30 = vrot.slane %v3296_v19, 1  ;;  %v1343_v36 = vsel %vm741_vm2, %v4079_v18, %v1210_v22 }
  0xb3   : > { %1827 = vmatprep.subr.bf16.mxu1 %v5321_v20  ;;  %2377 = vrot.lane.b32.xlu1 %v2346_v54, %s3877_s30  ;;  %v3305_v3 = vcombine.low %v3257_v7, %v3807_v38  ;;  %v3297_v57 = vcombine.low %v3249_v61, %v3808_v45  ;;  %v3811_v46 = vld [vmem:[%s3932_s23 + $0xc8] ss:$0 sps:$4 sm:$0x11]   ;;  %v3434_v60 = vld [vmem:[%s3932_s23 + $0x18] sm:$0xe] }
  0xb4   : > { %1585 = vmatmul.mubr.bf16.gmra.mxu0 %v1340_v23  ;;  %v3737_v23 = vld [vmem:[%s5276_s1 + $0x48] sm:$0xff]   ;;  %v285_v54 = vld [vmem:[%s3932_s23 + $0x78] sm:$0xe]  ;;  %v1299_v18 = vsel %vm692_vm1, %v1297_v30, %v1298_v28  ;;  %v3814_v45 = vld [vmem:[%s3932_s23 + $0x1c] sm:$0xf] }
  0xb5   : > { %3347 = vmatprep.mubr.msk.bf16.mxu0 %vm741_vm2, %v1296_v0  ;;  %2693 = vmatpush2.bf16.msra.mxu0 %v3728_v42  ;;  %v3178_v42 = vcombine.low %v275_v37, %v3810_v4  ;;  %v1325_v0 = vrot.slane %v3811_v46, 1  ;;  %v1300_v19 = vrot.slane %v3297_v57, 1  ;;  %v3812_v7 = vld [vmem:[%s3932_s23 + $0x68] ss:$0 sps:$4 sm:$0x11]   ;;  %v1228_v37 = vpop.permute.xlu0 %1227  ;;  %v3482_v57 = vcombine.low %v3434_v60, %v3814_v45 }
  0xb6   : > { %1828 = vmatpush2.bf16.msra.mxu1 %v3731_v53  ;;  %2694 = vmatprep.subr.bf16.mxu0 %v5321_v20  ;;  %v1324_v53 = vrot.slane %v3305_v3, 1  ;;  %v1301_v61 = vrot.slane %v3812_v7, 1  ;;  %v3813_v38 = vld [vmem:[%s3932_s23 + $0x8] ss:$0 sps:$4 sm:$0x11]   ;;  %v3188_v4 = vcombine.low %v285_v54, %v4330_v8  ;;  %v1212_v7 = vpop.permute.xlu1 %1211  ;;  %v724_v8 = vrot.slane %v4337_v13, 1 }
  0xb7   : > { %1829 = vmatprep.subr.bf16.mxu1 %v5321_v20  ;;  %v694_v3 = vrot.slane %v3813_v38, 1  ;;  %v3444_v22 = vld [vmem:[%s3932_s23 + $0x90] sm:$0xe]  ;;  %v4712_v58 = vld [vmem:[%s3932_s23 + $0x20] ss:$0 sps:$4 sm:$0x11]  }
  0xb8   : > { %1657 = vmatmul.mubr.bf16.gmra.mxu1 %v1367_v11  ;;  %v3744_v11 = vld [vmem:[%s5276_s1 + $0x40] sm:$0xff]   ;;  %v2428_v30 = vrot.slane %v4712_v58, 1  ;;  %v4716_v28 = vld [vmem:[%s3932_s23 + $0x14] ss:$0 sps:$4 sm:$0x11]   ;;  %v1326_v60 = vsel %vm692_vm1, %v1324_v53, %v1325_v0  ;;  %v3492_v54 = vcombine.low %v3444_v22, %v4346_v31  ;;  %v2458_v0 = vrot.slane %v4355_v41, 1 }
  0xb9   : > { %3356 = vmatprep.mubr.msk.bf16.mxu1 %vm741_vm2, %v1323_v16  ;;  %2695 = vmatpush2.bf16.msra.mxu0 %v3733_v59  ;;  %v693_v59 = vrot.slane %v3178_v42, 1  ;;  %v286_v16 = vld [vmem:[%s3932_s23 + $0x84] sm:$0xe]  ;;  %v3445_v46 = vld [vmem:[%s3932_s23 + $0x9c] sm:$0xe]  ;;  %v1370_v42 = vsel %vm741_vm2, %v4089_v33, %v1228_v37  ;;  %v723_v33 = vrot.slane %v3188_v4, 1 }
  0xba   : > { %1830 = vmatpush2.bf16.msra.mxu1 %v3737_v23  ;;  %2696 = vmatprep.subr.bf16.mxu0 %v5321_v20  ;;  %v697_v23 = vrot.slane %v4716_v28, 1  ;;  %v3746_v38 = vld [vmem:[%s5276_s1 + $0x100] sm:$0xff]   ;;  %v3189_v53 = vcombine.low %v286_v16, %v4365_v12  ;;  %v727_v37 = vrot.slane %v4372_v25, 1  ;;  %v3446_v13 = vld [vmem:[%s3932_s23 + $0xa8] sm:$0xe]  ;;  %v2457_v41 = vrot.slane %v3492_v54, 1 }
  0xbb   : > { %1831 = vmatprep.subr.bf16.mxu1 %v5321_v20  ;;  %v4743_v31 = vsel %vm692_vm1, %v723_v33, %v724_v8  ;;  %v2461_v25 = vrot.slane %v4390_v51, 1  ;;  %v3494_v4 = vcombine.low %v3446_v13, %v4434_v39  ;;  %v733_v39 = vrot.slane %v4482_v34, 1  ;;  %v3449_v13 = vld [vmem:[%s3932_s23 + $0xcc] sm:$0xe] }
  0xbc   : > { %1593 = vmatmul.mubr.bf16.gmra.mxu0 %v1343_v36  ;;  %v1302_v36 = vsel %vm692_vm1, %v1300_v19, %v1301_v61  ;;  %v695_v19 = vsel %vm692_vm1, %v693_v59, %v694_v3  ;;  %v2427_v61 = vrot.slane %v3482_v57, 1  ;;  %v726_v12 = vrot.slane %v3189_v53, 1  ;;  %v288_v59 = vld [vmem:[%s3932_s23 + $0x9c] sm:$0xe]  ;;  %v1230_v3 = vpop.permute.xlu0 %1229  ;;  %v3447_v57 = vld [vmem:[%s3932_s23 + $0xb4] sm:$0xe] }
  0xbd   : > { %3348 = vmatprep.mubr.msk.bf16.mxu0 %vm741_vm2, %v1299_v18  ;;  %2697 = vmatpush2.bf16.msra.mxu0 %v3740_v9  ;;  %v287_v9 = vld [vmem:[%s3932_s23 + $0x90] sm:$0xe]  ;;  %v3493_v18 = vcombine.low %v3445_v46, %v4383_v40  ;;  %v4752_v22 = vsel %vm692_vm1, %v2457_v41, %v2458_v0  ;;  %v2464_v46 = vrot.slane %v4454_v15, 1  ;;  %v1373_v8 = vsel %vm741_vm2, %v4109_v55, %v1230_v3 }
  0xbe   : > { %1832 = vmatpush2.bf16.msra.mxu1 %v3744_v11  ;;  %2698 = vmatprep.subr.bf16.mxu0 %v5321_v20  ;;  %v1346_v20 = vsel %vm741_vm2, %v4105_v49, %v1212_v7  ;;  %v276_v11 = vld [vmem:[%s3932_s23 + $0xc] sm:$0xe]  ;;  %v3190_v45 = vcombine.low %v287_v9, %v4408_v21  ;;  %v730_v49 = vrot.slane %v4415_v5, 1  ;;  %v4755_v16 = vsel %vm692_vm1, %v726_v12, %v727_v37  ;;  %v3817_v7 = vld [vmem:[%s3932_s23 + $0x10] sm:$0xf]  ;;  %v1214_v37 = vpop.permute.xlu1 %1213 }
  0xbf   : > { %v2460_v40 = vrot.slane %v3493_v18, 1  ;;  %v3191_v5 = vcombine.low %v288_v59, %v4471_v1  ;;  %v2463_v33 = vrot.slane %v3494_v4, 1  ;;  %v3495_v15 = vcombine.low %v3447_v57, %v4499_v27  ;;  %v290_v9 = vld [vmem:[%s3932_s23 + $0xb4] sm:$0xe] }
  0xc0   : > { %1665 = vmatmul.mubr.bf16.gmra.mxu1 %v1370_v42  ;;  %v289_v42 = vld [vmem:[%s3932_s23 + $0xa8] sm:$0xe]  ;;  %v729_v21 = vrot.slane %v3190_v45, 1  ;;  %v2467_v1 = vrot.slane %v4508_v43, 1  ;;  %v736_v34 = vrot.slane %v4542_v44, 1  ;;  %v739_v58 = vrot.slane %v4598_v63, 1  ;;  %v613_v59 = vpop.permute.xlu0 %612 }
  0xc1   : > { %3357 = vmatprep.mubr.msk.bf16.mxu1 %vm741_vm2, %v1326_v60  ;;  %2699 = vmatpush2.bf16.msra.mxu0 %v3746_v38  ;;  %v3179_v60 = vcombine.low %v276_v11, %v3817_v7  ;;  %v4762_v51 = vsel %vm692_vm1, %v2460_v40, %v2461_v25  ;;  %v3448_v38 = vld [vmem:[%s3932_s23 + $0xc0] sm:$0xe]  ;;  %v732_v0 = vrot.slane %v3191_v5, 1  ;;  %v3192_v53 = vcombine.low %v289_v42, %v4534_v50  ;;  %v3818_v40 = vld [vmem:[%s3932_s23 + $0x28] sm:$0xf] }
  0xc2   : > { %v4772_v54 = vsel %vm692_vm1, %v729_v21, %v730_v49  ;;  %v4778_v55 = vsel %vm692_vm1, %v2463_v33, %v2464_v46  ;;  %v2466_v18 = vrot.slane %v3495_v15, 1  ;;  %v3496_v27 = vcombine.low %v3448_v38, %v4566_v6  ;;  %v277_v25 = vld [vmem:[%s3932_s23 + $0x18] sm:$0xe]  ;;  %v2348_v49 = vpop.permute.xlu1 %2347  ;;  %v3819_v46 = vld [vmem:[%s3932_s23 + $0x2c] ss:$0 sps:$4 sm:$0x11]  }
  0xc3   : > { %v4788_v43 = vsel %vm692_vm1, %v732_v0, %v733_v39  ;;  %v735_v50 = vrot.slane %v3192_v53, 1  ;;  %v2470_v11 = vrot.slane %v4582_v10, 1  ;;  %v3193_v6 = vcombine.low %v290_v9, %v4591_v26  ;;  %v3820_v7 = vld [vmem:[%s3932_s23 + $0x1c] sm:$0xf]  ;;  %v3436_v21 = vld [vmem:[%s3932_s23 + $0x30] sm:$0xe] }
  0xc4   : > { %1601 = vmatmul.mubr.bf16.gmra.mxu0 %v1346_v20  ;;  %v3435_v20 = vld [vmem:[%s3932_s23 + $0x24] sm:$0xe]  ;;  %v4792_v41 = vsel %vm692_vm1, %v2466_v18, %v2467_v1  ;;  %v2469_v44 = vrot.slane %v3496_v27, 1  ;;  %v3497_v10 = vcombine.low %v3449_v13, %v4610_v2  ;;  %v2473_v12 = vrot.slane %v4621_v29, 1  ;;  %v615_v5 = vpop.permute.xlu0 %614  ;;  %v3822_v33 = vld [vmem:[%s3932_s23 + $0x34] sm:$0xf] }
  0xc5   : > { %3349 = vmatprep.mubr.msk.bf16.mxu0 %vm741_vm2, %v1302_v36  ;;  %v2429_v36 = vsel %vm692_vm1, %v2427_v61, %v2428_v30  ;;  %v1349_v30 = vsel %vm741_vm2, %v4125_v14, %v1214_v37  ;;  %v4800_v61 = vsel %vm692_vm1, %v735_v50, %v736_v34  ;;  %v696_v3 = vrot.slane %v3179_v60, 1  ;;  %v278_v15 = vld [vmem:[%s3932_s23 + $0x24] sm:$0xe]  ;;  %v3823_v9 = vld [vmem:[%s3932_s23 + $0x38] ss:$0 sps:$4 sm:$0x11]  }
  0xc6   : > { %v3483_v26 = vcombine.low %v3435_v20, %v3818_v40  ;;  %v4806_v63 = vsel %vm692_vm1, %v2469_v44, %v2470_v11  ;;  %v738_v14 = vrot.slane %v3193_v6, 1  ;;  %v743_v2 = vsel %vm741_vm2, %v4136_v32, %v613_v59  ;;  %v3824_v18 = vld [vmem:[%s3932_s23 + $0x28] sm:$0xf]  ;;  %v3437_v27 = vld [vmem:[%s3932_s23 + $0x3c] sm:$0xe] }
  0xc7   : > { %v698_v57 = vsel %vm692_vm1, %v696_v3, %v697_v23  ;;  %v2431_v42 = vrot.slane %v3819_v46, 1  ;;  %v3180_v60 = vcombine.low %v277_v25, %v3820_v7  ;;  %v2476_v32 = vsel %vm741_vm2, %v4150_v48, %v2348_v49  ;;  %v3821_v23 = vld [vmem:[%s3932_s23 + $0x20] ss:$0 sps:$4 sm:$0x11]   ;;  %v2350_v48 = vpop.permute.xlu1 %2349  ;;  %v3828_v40 = vld [vmem:[%s3932_s23 + $0x34] sm:$0xf] }
  0xc8   : > { %1673 = vmatmul.mubr.bf16.gmra.mxu1 %v1373_v8  ;;  %v4810_v45 = vsel %vm692_vm1, %v738_v14, %v739_v58  ;;  %v2430_v4 = vrot.slane %v3483_v26, 1  ;;  %v700_v8 = vrot.slane %v3821_v23, 1  ;;  %v3484_v39 = vcombine.low %v3436_v21, %v3822_v33  ;;  %v3825_v50 = vld [vmem:[%s3932_s23 + $0x2c] ss:$0 sps:$4 sm:$0x11]  }
  0xc9   : > { %3370 = vmatprep.mubr.msk.bf16.mxu1 %vm741_vm2, %v695_v19  ;;  %v2472_v19 = vrot.slane %v3497_v10, 1  ;;  %v699_v38 = vrot.slane %v3180_v60, 1  ;;  %v746_v0 = vsel %vm741_vm2, %v4154_v56, %v615_v5  ;;  %v2434_v37 = vrot.slane %v3823_v9, 1  ;;  %v617_v56 = vpop.permute.xlu0 %616  ;;  %v3826_v44 = vld [vmem:[%s3932_s23 + $0x40] sm:$0xf] }
  0xca   : > { %v2432_v28 = vsel %vm692_vm1, %v2430_v4, %v2431_v42  ;;  %v2433_v53 = vrot.slane %v3484_v39, 1  ;;  %v3181_v34 = vcombine.low %v278_v15, %v3824_v18  ;;  %v2479_v13 = vsel %vm741_vm2, %v4165_v17, %v2350_v48  ;;  %v279_v58 = vld [vmem:[%s3932_s23 + $0x30] sm:$0xe]  ;;  %v3827_v59 = vld [vmem:[%s3932_s23 + $0x44] ss:$0 sps:$4 sm:$0x11]  }
  0xcb   : > { %v4816_v29 = vsel %vm692_vm1, %v2472_v19, %v2473_v12  ;;  %v701_v1 = vsel %vm692_vm1, %v699_v38, %v700_v8  ;;  %v703_v11 = vrot.slane %v3825_v50, 1  ;;  %v3485_v6 = vcombine.low %v3437_v27, %v3826_v44  ;;  %v2352_v17 = vpop.permute.xlu1 %2351  ;;  %v3438_v14 = vld [vmem:[%s3932_s23 + $0x48] sm:$0xe]  ;;  %v3829_v49 = vld [vmem:[%s3932_s23 + $0x38] ss:$0 sps:$4 sm:$0x11]  }
  0xcc   : > { %1609 = vmatmul.mubr.bf16.gmra.mxu0 %v1349_v30  ;;  %v702_v20 = vrot.slane %v3181_v34, 1  ;;  %v749_v30 = vsel %vm741_vm2, %v4174_v35, %v617_v56  ;;  %v2437_v3 = vrot.slane %v3827_v59, 1  ;;  %v3182_v26 = vcombine.low %v279_v58, %v3828_v40  ;;  %v3830_v4 = vld [vmem:[%s3932_s23 + $0x4c] sm:$0xf]  ;;  %v280_v42 = vld [vmem:[%s3932_s23 + $0x3c] sm:$0xe] }
  0xcd   : > { %3534 = vmatprep.mubr.msk.bf16.mxu0 %vm741_vm2, %v2429_v36  ;;  %v2435_v36 = vsel %vm692_vm1, %v2433_v53, %v2434_v37  ;;  %v2436_v12 = vrot.slane %v3485_v6, 1  ;;  %v2482_v25 = vsel %vm741_vm2, %v4186_v52, %v2352_v17  ;;  %v619_v35 = vpop.permute.xlu0 %618  ;;  %v3486_v46 = vcombine.low %v3438_v14, %v3830_v4  ;;  %v3439_v23 = vld [vmem:[%s3932_s23 + $0x54] sm:$0xe]  ;;  %v3833_v15 = vld [vmem:[%s3932_s23 + $0x44] ss:$0 sps:$4 sm:$0x11]  }
  0xce   : > { %v704_v10 = vsel %vm692_vm1, %v702_v20, %v703_v11  ;;  %v752_v7 = vsel %vm741_vm2, %v4190_v62, %v619_v35  ;;  %v3834_v48 = vld [vmem:[%s3932_s23 + $0x58] sm:$0xf]  ;;  %v281_v53 = vld [vmem:[%s3932_s23 + $0x48] sm:$0xe]  ;;  %v5328_v9 = vld [vmem:[#allocation2_spill] sm:$0xff] }
  0xcf   : > { %v2438_v19 = vsel %vm692_vm1, %v2436_v12, %v2437_v3  ;;  %v2354_v52 = vpop.permute.xlu1 %2353  ;;  %v2439_v21 = vrot.slane %v3486_v46, 1  ;;  %v3835_v27 = vld [vmem:[%s3932_s23 + $0x5c] ss:$0 sps:$4 sm:$0x11]   ;;  %v3836_v56 = vld [vmem:[%s3932_s23 + $0x4c] sm:$0xf] }
  0xd0   : > { %1834 = vmatmul.mubr.bf16.vlgmr.msra.gmra.mxu1 %v743_v2  ;;  %v705_v2 = vrot.slane %v3182_v26, 1  ;;  %v2485_v8 = vsel %vm741_vm2, %v4201_v24, %v2354_v52  ;;  %v3440_v20 = vld [vmem:[%s3932_s23 + $0x60] sm:$0xe]  ;;  %v5329_v50 = vld [vmem:[#allocation3_spill] sm:$0xff]  ;;  %v282_v59 = vld [vmem:[%s3932_s23 + $0x54] sm:$0xe] }
  0xd1   : > { %3371 = vmatprep.mubr.msk.bf16.mxu1 %vm741_vm2, %v698_v57  ;;  %v706_v57 = vrot.slane %v3829_v49, 1  ;;  %v621_v62 = vpop.permute.xlu0 %620  ;;  %v5330_v3 = vld [vmem:[#allocation4_spill] sm:$0xff]  ;;  %v3839_v35 = vld [vmem:[%s3932_s23 + $0x68] ss:$0 sps:$4 sm:$0x11]   ;;  %v5331_v4 = vld [vmem:[#allocation5_spill] sm:$0xff] }
  0xd2   : > { %v755_v37 = vsel %vm741_vm2, %v5328_v9, %v621_v62 }
  0xd3   : > { %v707_v60 = vsel %vm692_vm1, %v705_v2, %v706_v57  ;;  %v2356_v24 = vpop.permute.xlu1 %2355  ;;  %v3840_v2 = vld [vmem:[%s3932_s23 + $0x58] sm:$0xf]  ;;  %v3441_v57 = vld [vmem:[%s3932_s23 + $0x6c] sm:$0xe] }
  0xd4   : > { %2701 = vmatmul.mubr.bf16.vlgmr.msra.gmra.mxu0 %v2476_v32  ;;  %v3831_v32 = vld [vmem:[%s3932_s23 + $0x50] ss:$0 sps:$4 sm:$0x11]   ;;  %v2488_v11 = vsel %vm741_vm2, %v5329_v50, %v2356_v24  ;;  %v3185_v49 = vcombine.low %v282_v59, %v3840_v2  ;;  %v5335_v59 = vld [vmem:[#allocation9_spill] sm:$0xff] }
  0xd5   : > { %3535 = vmatprep.mubr.msk.bf16.mxu0 %vm741_vm2, %v2432_v28  ;;  %v2440_v5 = vrot.slane %v3831_v32, 1  ;;  %v3832_v28 = vld [vmem:[%s3932_s23 + $0x40] sm:$0xf]  ;;  %v623_v44 = vpop.permute.xlu0 %622  ;;  %v3842_v32 = vld [vmem:[%s3932_s23 + $0x70] sm:$0xf] }
  0xd6   : > { %v3183_v38 = vcombine.low %v280_v42, %v3832_v28  ;;  %v758_v40 = vsel %vm741_vm2, %v5330_v3, %v623_v44  ;;  %v714_v52 = vrot.slane %v3185_v49, 1  ;;  %v283_v28 = vld [vmem:[%s3932_s23 + $0x60] sm:$0xe] }
  0xd7   : > { %v2441_v33 = vsel %vm692_vm1, %v2439_v21, %v2440_v5  ;;  %v2358_v26 = vpop.permute.xlu1 %2357  ;;  %v3489_v5 = vcombine.low %v3441_v57, %v3842_v32  ;;  %v5336_v49 = vld [vmem:[#allocation10_spill] sm:$0xff] }
  0xd8   : > { %1842 = vmatmul.mubr.bf16.gmra.mxu1 %v746_v0  ;;  %v708_v39 = vrot.slane %v3183_v38, 1  ;;  %v709_v0 = vrot.slane %v3833_v15, 1  ;;  %v2491_v46 = vsel %vm741_vm2, %v5331_v4, %v2358_v26  ;;  %v5332_v38 = vld [vmem:[#allocation6_spill] sm:$0xff] }
  0xd9   : > { %3372 = vmatprep.mubr.msk.bf16.mxu1 %vm741_vm2, %v701_v1  ;;  %v3487_v1 = vcombine.low %v3439_v23, %v3834_v48  ;;  %v625_v42 = vpop.permute.xlu0 %624 }
  0xda   : > { %v710_v18 = vsel %vm692_vm1, %v708_v39, %v709_v0  ;;  %v761_v23 = vsel %vm741_vm2, %v5332_v38, %v625_v42  ;;  %v3843_v39 = vld [vmem:[%s3932_s23 + $0x74] ss:$0 sps:$4 sm:$0x11]   ;;  %v3844_v0 = vld [vmem:[%s3932_s23 + $0x64] sm:$0xf] }
  0xdb   : > { %v2442_v34 = vrot.slane %v3487_v1, 1  ;;  %v2449_v15 = vrot.slane %v3843_v39, 1  ;;  %v3186_v48 = vcombine.low %v283_v28, %v3844_v0  ;;  %v3442_v1 = vld [vmem:[%s3932_s23 + $0x78] sm:$0xe]  ;;  %v5338_v28 = vld [vmem:[#allocation12_spill] sm:$0xff]  ;;  %v5340_v39 = vld [vmem:[#allocation14_spill] sm:$0xff] }
  0xdc   : > { %2709 = vmatmul.mubr.bf16.gmra.mxu0 %v2479_v13  ;;  %v2443_v13 = vrot.slane %v3835_v27, 1 }
  0xdd   : > { %3536 = vmatprep.mubr.msk.bf16.mxu0 %vm741_vm2, %v2435_v36  ;;  %v3184_v36 = vcombine.low %v281_v53, %v3836_v56  ;;  %v5333_v53 = vld [vmem:[#allocation7_spill] sm:$0xff] }
  0xde   : > { %v2444_v6 = vsel %vm692_vm1, %v2442_v34, %v2443_v13  ;;  %v3845_v34 = vld [vmem:[%s3932_s23 + $0x68] ss:$0 sps:$4 sm:$0x11]   ;;  %v3846_v13 = vld [vmem:[%s3932_s23 + $0x7c] sm:$0xf] }
  0xdf   : > { %v711_v58 = vrot.slane %v3184_v36, 1  ;;  %v718_v27 = vrot.slane %v3845_v34, 1  ;;  %v3490_v56 = vcombine.low %v3442_v1, %v3846_v13  ;;  %v284_v36 = vld [vmem:[%s3932_s23 + $0x6c] sm:$0xe]  ;;  %v5344_v34 = vld [vmem:[#allocation18_spill] sm:$0xff] }
  0xe0   : > { %1850 = vmatmul.mubr.bf16.gmra.mxu1 %v749_v30  ;;  %v3837_v30 = vld [vmem:[%s3932_s23 + $0x50] ss:$0 sps:$4 sm:$0x11]   ;;  %v5345_v13 = vld [vmem:[#allocation19_spill] sm:$0xff] }
  0xe1   : > { %3373 = vmatprep.mubr.msk.bf16.mxu1 %vm741_vm2, %v704_v10  ;;  %v712_v17 = vrot.slane %v3837_v30, 1  ;;  %v3838_v10 = vld [vmem:[%s3932_s23 + $0x64] sm:$0xf] }
  0xe2   : > { %v3488_v12 = vcombine.low %v3440_v20, %v3838_v10  ;;  %v5334_v20 = vld [vmem:[#allocation8_spill] sm:$0xff] }
  0xe3   : > { %v713_v14 = vsel %vm692_vm1, %v711_v58, %v712_v17  ;;  %v3847_v58 = vld [vmem:[%s3932_s23 + $0x80] ss:$0 sps:$4 sm:$0x11]   ;;  %v3848_v17 = vld [vmem:[%s3932_s23 + $0x70] sm:$0xf] }
  0xe4   : > { %2717 = vmatmul.mubr.bf16.gmra.mxu0 %v2482_v25  ;;  %v2445_v25 = vrot.slane %v3488_v12, 1  ;;  %v2452_v30 = vrot.slane %v3847_v58, 1  ;;  %v3187_v10 = vcombine.low %v284_v36, %v3848_v17  ;;  %v3443_v12 = vld [vmem:[%s3932_s23 + $0x84] sm:$0xe]  ;;  %v5346_v36 = vld [vmem:[#allocation20_spill] sm:$0xff]  ;;  %v5349_v58 = vld [vmem:[#allocation23_spill] sm:$0xff] }
  0xe5   : > { %3537 = vmatprep.mubr.msk.bf16.mxu0 %vm741_vm2, %v2438_v19  ;;  %v2446_v19 = vrot.slane %v3839_v35, 1  ;;  %v5350_v17 = vld [vmem:[#allocation24_spill] sm:$0xff] }
  0xe8   : > { %1858 = vmatmul.mubr.bf16.gmra.mxu1 %v752_v7  ;;  %v2447_v7 = vsel %vm692_vm1, %v2445_v25, %v2446_v19  ;;  %v3849_v25 = vld [vmem:[%s3932_s23 + $0x74] ss:$0 sps:$4 sm:$0x11]   ;;  %v3850_v19 = vld [vmem:[%s3932_s23 + $0x88] sm:$0xf] }
  0xe9   : > { %3374 = vmatprep.mubr.msk.bf16.mxu1 %vm741_vm2, %v707_v60  ;;  %v3841_v60 = vld [vmem:[%s3932_s23 + $0x5c] ss:$0 sps:$4 sm:$0x11]   ;;  %v721_v35 = vrot.slane %v3849_v25, 1  ;;  %v3491_v2 = vcombine.low %v3443_v12, %v3850_v19 }
  0xea   : > { %v715_v21 = vrot.slane %v3841_v60, 1  ;;  %v5337_v60 = vld [vmem:[#allocation11_spill] sm:$0xff] }
  0xeb   : > { %v2454_v42 = vrot.slane %v3491_v2, 1 }
  0xec   : > { %2725 = vmatmul.mubr.bf16.gmra.mxu0 %v2485_v8  ;;  %v2360_v8 = vpop.permute.xlu1 %2359  ;;  %v716_v62 = vsel %vm692_vm1, %v714_v52, %v715_v21 }
  0xed   : > { %3538 = vmatprep.mubr.msk.bf16.mxu0 %vm741_vm2, %v2441_v33  ;;  %v2448_v33 = vrot.slane %v3489_v5, 1  ;;  %v2494_v9 = vsel %vm741_vm2, %v5333_v53, %v2360_v8  ;;  %v5339_v8 = vld [vmem:[#allocation13_spill] sm:$0xff] }
  0xef   : > { %v2450_v24 = vsel %vm692_vm1, %v2448_v33, %v2449_v15 }
  0xf0   : > { %1866 = vmatmul.mubr.bf16.gmra.mxu1 %v755_v37  ;;  %v627_v37 = vpop.permute.xlu0 %626 }
  0xf1   : > { %3375 = vmatprep.mubr.msk.bf16.mxu1 %vm741_vm2, %v710_v18  ;;  %v717_v18 = vrot.slane %v3186_v48, 1  ;;  %v764_v50 = vsel %vm741_vm2, %v5334_v20, %v627_v37  ;;  %v5341_v48 = vld [vmem:[#allocation15_spill] sm:$0xff] }
  0xf3   : > { %v719_v44 = vsel %vm692_vm1, %v717_v18, %v718_v27 }
  0xf4   : > { %2733 = vmatmul.mubr.bf16.gmra.mxu0 %v2488_v11  ;;  %v2362_v11 = vpop.permute.xlu1 %2361 }
  0xf5   : > { %3539 = vmatprep.mubr.msk.bf16.mxu0 %vm741_vm2, %v2444_v6  ;;  %v2451_v6 = vrot.slane %v3490_v56, 1  ;;  %v2497_v3 = vsel %vm741_vm2, %v5335_v59, %v2362_v11 }
  0xf7   : > { %v2453_v26 = vsel %vm692_vm1, %v2451_v6, %v2452_v30 }
  0xf8   : > { %1874 = vmatmul.mubr.bf16.gmra.mxu1 %v758_v40  ;;  %v629_v40 = vpop.permute.xlu0 %628  ;;  %v2364_v4 = vpop.permute.xlu1 %2363 }
  0xf9   : > { %3376 = vmatprep.mubr.msk.bf16.mxu1 %vm741_vm2, %v713_v14  ;;  %v720_v14 = vrot.slane %v3187_v10, 1  ;;  %v767_v57 = vsel %vm741_vm2, %v5336_v49, %v629_v40  ;;  %v2500_v21 = vsel %vm741_vm2, %v5337_v60, %v2364_v4 }
  0xfc   : > { %2741 = vmatmul.mubr.bf16.gmra.mxu0 %v2491_v46  ;;  %v722_v46 = vsel %vm692_vm1, %v720_v14, %v721_v35  ;;  %v631_v32 = vpop.permute.xlu0 %630 }
  0xfd   : > { %3540 = vmatprep.mubr.msk.bf16.mxu0 %vm741_vm2, %v2447_v7  ;;  %v3851_v7 = vld [vmem:[%s3932_s23 + $0x8c] ss:$0 sps:$4 sm:$0x11]   ;;  %v770_v38 = vsel %vm741_vm2, %v5338_v28, %v631_v32  ;;  %s3552_s23 = sshll.u32 %s5356_s12, 8 }
  0xfe   : > { %v2455_v52 = vrot.slane %v3851_v7, 1  ;;  %s5059_s4 = scalar_lea.vmem %s5277_s2, %s3552_s23 }
 0x100   : > { %1882 = vmatmul.mubr.bf16.gmra.mxu1 %v761_v23  ;;  %v2456_v5 = vsel %vm692_vm1, %v2454_v42, %v2455_v52  ;;  %v2366_v23 = vpop.permute.xlu1 %2365  ;;  %v633_v33 = vpop.permute.xlu0 %632 }
 0x101   : > { %3377 = vmatprep.mubr.msk.bf16.mxu1 %vm741_vm2, %v716_v62  ;;  %v2503_v62 = vsel %vm741_vm2, %v5339_v8, %v2366_v23  ;;  %v773_v15 = vsel %vm741_vm2, %v5340_v39, %v633_v33 }
 0x104   : > { %2749 = vmatmul.mubr.bf16.gmra.mxu0 %v2494_v9  ;;  %v2368_v0 = vpop.permute.xlu1 %2367  ;;  %v635_v53 = vpop.permute.xlu0 %634  ;;  %v5342_v9 = vld [vmem:[#allocation16_spill] sm:$0xff] }
 0x105   : > { %3541 = vmatprep.mubr.msk.bf16.mxu0 %vm741_vm2, %v2450_v24  ;;  %v2506_v1 = vsel %vm741_vm2, %v5341_v48, %v2368_v0  ;;  %v5343_v24 = vld [vmem:[#allocation17_spill] sm:$0xff] }
 0x108   : > { %1890 = vmatmul.mubr.bf16.gmra.mxu1 %v764_v50  ;;  %v2370_v37 = vpop.permute.xlu1 %2369  ;;  %v637_v18 = vpop.permute.xlu0 %636  ;;  %v5347_v50 = vld [vmem:[#allocation21_spill] sm:$0xff] }
 0x109   : > { %3378 = vmatprep.mubr.msk.bf16.mxu1 %vm741_vm2, %v719_v44  ;;  %v5348_v44 = vld [vmem:[#allocation22_spill] sm:$0xff] }
 0x10c   : > { %2757 = vmatmul.mubr.bf16.gmra.mxu0 %v2497_v3 }
 0x10d   : > { %3542 = vmatprep.mubr.msk.bf16.mxu0 %vm741_vm2, %v2453_v26  ;;  %v2372_v27 = vpop.permute.xlu1 %2371 }
 0x110   : > { %1898 = vmatmul.mubr.bf16.gmra.mxu1 %v767_v57 }
 0x111   : > { %3379 = vmatprep.mubr.msk.bf16.mxu1 %vm741_vm2, %v722_v46  ;;  %v639_v56 = vpop.permute.xlu0 %638 }
 0x114   : > { %2765 = vmatmul.mubr.bf16.gmra.mxu0 %v2500_v21 }
 0x115   : > { %3543 = vmatprep.mubr.msk.bf16.mxu0 %vm741_vm2, %v2456_v5  ;;  %v2374_v20 = vpop.permute.xlu1 %2373 }
 0x118   : > { %1906 = vmatmul.mubr.bf16.gmra.mxu1 %v770_v38 }
 0x119   : > { %3380 = vmatprep.mubr.msk.bf16.mxu1 %vm741_vm2, %v4743_v31  ;;  %v776_v31 = vsel %vm741_vm2, %v5342_v9, %v635_v53  ;;  %v641_v11 = vpop.permute.xlu0 %640 }
 0x11c   : > { %2773 = vmatmul.mubr.bf16.gmra.mxu0 %v2503_v62 }
 0x11d   : > { %3544 = vmatprep.mubr.msk.bf16.mxu0 %vm741_vm2, %v4752_v22  ;;  %v2509_v22 = vsel %vm741_vm2, %v5343_v24, %v2370_v37 }
 0x11e   : > { %v2376_v6 = vpop.permute.xlu1 %2375 }
 0x120   : > { %1914 = vmatmul.mubr.bf16.gmra.mxu1 %v773_v15 }
 0x121   : > { %3381 = vmatprep.mubr.msk.bf16.mxu1 %vm741_vm2, %v4755_v16  ;;  %v779_v16 = vsel %vm741_vm2, %v5344_v34, %v637_v18  ;;  %v643_v30 = vpop.permute.xlu0 %642 }
 0x124   : > { %2781 = vmatmul.mubr.bf16.gmra.mxu0 %v2506_v1 }
 0x125   : > { %3545 = vmatprep.mubr.msk.bf16.mxu0 %vm741_vm2, %v4762_v51  ;;  %v2512_v51 = vsel %vm741_vm2, %v5345_v13, %v2372_v27  ;;  %v2378_v10 = vpop.permute.xlu1 %2377 }
 0x128   : > { %1922 = vmatmul.mubr.bf16.gmra.mxu1 %v776_v31 }
 0x129   : > { %3382 = vmatprep.mubr.msk.bf16.mxu1 %vm741_vm2, %v4772_v54  ;;  %v782_v54 = vsel %vm741_vm2, %v5346_v36, %v639_v56 }
 0x12c   : > { %2789 = vmatmul.mubr.bf16.gmra.mxu0 %v2509_v22 }
 0x12d   : > { %3546 = vmatprep.mubr.msk.bf16.mxu0 %vm741_vm2, %v4778_v55  ;;  %v2515_v55 = vsel %vm741_vm2, %v5347_v50, %v2374_v20 }
 0x130   : > { %1930 = vmatmul.mubr.bf16.gmra.mxu1 %v779_v16 }
 0x131   : > { %3383 = vmatprep.mubr.msk.bf16.mxu1 %vm741_vm2, %v4788_v43  ;;  %v785_v43 = vsel %vm741_vm2, %v5348_v44, %v641_v11 }
 0x134   : > { %2797 = vmatmul.mubr.bf16.gmra.mxu0 %v2512_v51 }
 0x135   : > { %3547 = vmatprep.mubr.msk.bf16.mxu0 %vm741_vm2, %v4792_v41  ;;  %v2518_v41 = vsel %vm741_vm2, %v5349_v58, %v2376_v6 }
 0x138   : > { %1938 = vmatmul.mubr.bf16.gmra.mxu1 %v782_v54 }
 0x139   : > { %3384 = vmatprep.mubr.msk.bf16.mxu1 %vm741_vm2, %v4800_v61  ;;  %v788_v61 = vsel %vm741_vm2, %v5350_v17, %v643_v30 }
 0x13c   : > { %2805 = vmatmul.mubr.bf16.gmra.mxu0 %v2515_v55 }
 0x13d   : > { %3548 = vmatprep.mubr.msk.bf16.mxu0 %vm741_vm2, %v4806_v63  ;;  %v2521_v63 = vsel %vm741_vm2, %v4630_v47, %v2378_v10 }
 0x140   : > { %1946 = vmatmul.mubr.bf16.gmra.mxu1 %v785_v43 }
 0x141   : > { %3385 = vmatprep.mubr.msk.bf16.mxu1 %vm741_vm2, %v4810_v45 }
 0x144   : > { %2813 = vmatmul.mubr.bf16.gmra.mxu0 %v2518_v41 }
 0x145   : > { %3549 = vmatprep.mubr.msk.bf16.mxu0 %vm741_vm2, %v4816_v29 }
 0x148   : > { %1954 = vmatmul.mubr.bf16.gmra.mxu1 %v788_v61 }
 0x14c   : > { %2821 = vmatmul.mubr.bf16.gmra.mxu0 %v2521_v63 }
 0x150   : > { %v4990_v12 = vpop.f32.mrf.mxu1 }
 0x152   : > { %v1620_v59 = vpop.f32.mrf.mxu1 }
 0x154   : > { %v4992_v3 = vpop.f32.mrf.mxu0  ;;  %v4994_v45 = vpop.f32.mrf.mxu1 }
 0x156   : > { %v1556_v40 = vpop.f32.mrf.mxu0  ;;  %v1623_v26 = vpop.f32.mrf.mxu1 }
 0x158   : > { %v4996_v14 = vpop.f32.mrf.mxu0  ;;  %v4998_v25 = vpop.f32.mrf.mxu1 }
 0x15a   : > { %v1559_v29 = vpop.f32.mrf.mxu0  ;;  %v1628_v35 = vpop.f32.mrf.mxu1 }
 0x15c   : > { %v5000_v19 = vpop.f32.mrf.mxu0  ;;  %v5002_v2 = vpop.f32.mrf.mxu1 }
 0x15e   : > { %v1564_v47 = vpop.f32.mrf.mxu0  ;;  %v1631_v49 = vpop.f32.mrf.mxu1 }
 0x160   : > { %v5004_v57 = vpop.f32.mrf.mxu0  ;;  %v5006_v4 = vpop.f32.mrf.mxu1 }
 0x162   : > { %v1567_v46 = vpop.f32.mrf.mxu0  ;;  %v1636_v42 = vpop.f32.mrf.mxu1 }
 0x164   : > { %v5008_v7 = vpop.f32.mrf.mxu0  ;;  %v5010_v52 = vpop.f32.mrf.mxu1 }
 0x166   : > { %v1572_v60 = vpop.f32.mrf.mxu0  ;;  %v1639_v21 = vpop.f32.mrf.mxu1 }
 0x168   : > { %v5012_v32 = vpop.f32.mrf.mxu0  ;;  %v5014_v5 = vpop.f32.mrf.mxu1 }
 0x16a   : > { %v1575_v28 = vpop.f32.mrf.mxu0  ;;  %v1644_v38 = vpop.f32.mrf.mxu1 }
 0x16c   : > { %v5016_v23 = vpop.f32.mrf.mxu0  ;;  %v5018_v8 = vpop.f32.mrf.mxu1 }
 0x16e   : > { %v1580_v62 = vpop.f32.mrf.mxu0  ;;  %v1647_v33 = vpop.f32.mrf.mxu1 }
 0x170   : > { %v5020_v39 = vpop.f32.mrf.mxu0  ;;  %v5022_v15 = vpop.f32.mrf.mxu1 }
 0x172   : > { %v1583_v0 = vpop.f32.mrf.mxu0  ;;  %v1652_v48 = vpop.f32.mrf.mxu1 }
 0x174   : > { %v5024_v1 = vpop.f32.mrf.mxu0  ;;  %v5026_v53 = vpop.f32.mrf.mxu1 }
 0x176   : > { %v1588_v9 = vpop.f32.mrf.mxu0  ;;  %v1655_v31 = vpop.f32.mrf.mxu1 }
 0x178   : > { %v5028_v37 = vpop.f32.mrf.mxu0  ;;  %v5030_v24 = vpop.f32.mrf.mxu1 }
 0x17a   : > { %v1591_v22 = vpop.f32.mrf.mxu0  ;;  %v1660_v18 = vpop.f32.mrf.mxu1 }
 0x17c   : > { %v5032_v34 = vpop.f32.mrf.mxu0  ;;  %v5034_v16 = vpop.f32.mrf.mxu1 }
 0x17e   : > { %v1596_v27 = vpop.f32.mrf.mxu0  ;;  %v1663_v13 = vpop.f32.mrf.mxu1 }
 0x180   : > { %v5036_v51 = vpop.f32.mrf.mxu0  ;;  %v5038_v56 = vpop.f32.mrf.mxu1 }
 0x182   : > { %v1599_v36 = vpop.f32.mrf.mxu0  ;;  %v1668_v54 = vpop.f32.mrf.mxu1 }
 0x184   : > { %v5040_v20 = vpop.f32.mrf.mxu0  ;;  %v5042_v50 = vpop.f32.mrf.mxu1 }
 0x186   : > { %v1604_v55 = vpop.f32.mrf.mxu0  ;;  %v1671_v11 = vpop.f32.mrf.mxu1 }
 0x188   : > { %v5044_v44 = vpop.f32.mrf.mxu0  ;;  %v5046_v43 = vpop.f32.mrf.mxu1 }
 0x18a   : > { %v1607_v6 = vpop.f32.mrf.mxu0  ;;  %v1676_v58 = vpop.f32.mrf.mxu1 }
 0x18c   : > { %v5048_v41 = vpop.f32.mrf.mxu0  ;;  %v5050_v30 = vpop.f32.mrf.mxu1 }
 0x18e   : > { %v1612_v17 = vpop.f32.mrf.mxu0  ;;  %v1679_v61 = vpop.f32.mrf.mxu1 }
 0x190   : > { %v5052_v10 = vpop.f32.mrf.mxu0  ;;  %v1835_v63 = vpop.f32.mrf.mxu1 }
 0x191   : > { %v1836_v26 = vadd.f32 %v1835_v63, %v4992_v3 }
 0x192   : > { %v1615_v59 = vpop.f32.mrf.mxu0  ;;  %v1837_v40 = vpop.f32.mrf.mxu1 }
 0x194   : > { %v1838_v29 = vpop.f32.mrf.mxu1  ;;  %v2702_v35 = vpop.f32.mrf.mxu0 }
 0x195   : > { %v5061_v47 = vadd.f32 %v2702_v35, %v1836_v26  ;;  %v1839_v42 = vadd.f32 %v1838_v29, %v4996_v14 }
 0x196   : > { %v1840_v49 = vpop.f32.mrf.mxu1  ;;  %v2704_v46 = vpop.f32.mrf.mxu0 }
 0x197   : > { %2861 = vst [vmem:[%s5059_s4] sm:$0xff] %v5061_v47 }
 0x198   : > { %v1843_v60 = vpop.f32.mrf.mxu1  ;;  %v2705_v3 = vpop.f32.mrf.mxu0 }
 0x199   : > { %v5066_v21 = vadd.f32 %v2705_v3, %v1839_v42  ;;  %v1844_v62 = vadd.f32 %v1843_v60, %v5000_v19 }
 0x19a   : > { %v1845_v28 = vpop.f32.mrf.mxu1  ;;  %v2707_v38 = vpop.f32.mrf.mxu0 }
 0x19b   : > { %2862 = vst [vmem:[%s5059_s4 + $0x8] sm:$0xff] %v5066_v21 }
 0x19c   : > { %v1846_v33 = vpop.f32.mrf.mxu1  ;;  %v2710_v0 = vpop.f32.mrf.mxu0 }
 0x19d   : > { %v5071_v48 = vadd.f32 %v2710_v0, %v1844_v62  ;;  %v1847_v14 = vadd.f32 %v1846_v33, %v5004_v57 }
 0x19e   : > { %v1848_v9 = vpop.f32.mrf.mxu1  ;;  %v2712_v31 = vpop.f32.mrf.mxu0 }
 0x19f   : > { %2863 = vst [vmem:[%s5059_s4 + $0x10] sm:$0xff] %v5071_v48 }
 0x1a0   : > { %v1851_v22 = vpop.f32.mrf.mxu1  ;;  %v2713_v18 = vpop.f32.mrf.mxu0 }
 0x1a1   : > { %v5076_v27 = vadd.f32 %v2713_v18, %v1847_v14  ;;  %v1852_v19 = vadd.f32 %v1851_v22, %v5008_v7 }
 0x1a2   : > { %v1853_v13 = vpop.f32.mrf.mxu1  ;;  %v2715_v36 = vpop.f32.mrf.mxu0 }
 0x1a3   : > { %2864 = vst [vmem:[%s5059_s4 + $0x18] sm:$0xff] %v5076_v27 }
 0x1a4   : > { %v1854_v54 = vpop.f32.mrf.mxu1  ;;  %v2718_v55 = vpop.f32.mrf.mxu0 }
 0x1a5   : > { %v5081_v11 = vadd.f32 %v2718_v55, %v1852_v19  ;;  %v1855_v57 = vadd.f32 %v1854_v54, %v5012_v32 }
 0x1a6   : > { %v1856_v6 = vpop.f32.mrf.mxu1  ;;  %v2720_v58 = vpop.f32.mrf.mxu0 }
 0x1a7   : > { %2865 = vst [vmem:[%s5059_s4 + $0x20] sm:$0xff] %v5081_v11 }
 0x1a8   : > { %v1859_v17 = vpop.f32.mrf.mxu1  ;;  %v2721_v61 = vpop.f32.mrf.mxu0 }
 0x1a9   : > { %v5086_v63 = vadd.f32 %v2721_v61, %v1855_v57  ;;  %v1860_v7 = vadd.f32 %v1859_v17, %v5016_v23 }
 0x1aa   : > { %v1861_v59 = vpop.f32.mrf.mxu1  ;;  %v2723_v40 = vpop.f32.mrf.mxu0 }
 0x1ab   : > { %2866 = vst [vmem:[%s5059_s4 + $0x28] sm:$0xff] %v5086_v63 }
 0x1ac   : > { %v1862_v26 = vpop.f32.mrf.mxu1  ;;  %v2726_v29 = vpop.f32.mrf.mxu0 }
 0x1ad   : > { %v5091_v35 = vadd.f32 %v2726_v29, %v1860_v7  ;;  %v1863_v32 = vadd.f32 %v1862_v26, %v5020_v39 }
 0x1ae   : > { %v1864_v49 = vpop.f32.mrf.mxu1  ;;  %v2728_v46 = vpop.f32.mrf.mxu0 }
 0x1af   : > { %2867 = vst [vmem:[%s5059_s4 + $0x30] sm:$0xff] %v5091_v35 }
 0x1b0   : > { %v1867_v42 = vpop.f32.mrf.mxu1  ;;  %v2729_v60 = vpop.f32.mrf.mxu0 }
 0x1b1   : > { %v5096_v3 = vadd.f32 %v2729_v60, %v1863_v32  ;;  %v1868_v23 = vadd.f32 %v1867_v42, %v5024_v1 }
 0x1b2   : > { %v1869_v28 = vpop.f32.mrf.mxu1  ;;  %v2731_v38 = vpop.f32.mrf.mxu0 }
 0x1b3   : > { %2868 = vst [vmem:[%s5059_s4 + $0x38] sm:$0xff] %v5096_v3 }
 0x1b4   : > { %v1870_v62 = vpop.f32.mrf.mxu1  ;;  %v2734_v33 = vpop.f32.mrf.mxu0 }
 0x1b5   : > { %v5101_v0 = vadd.f32 %v2734_v33, %v1868_v23  ;;  %v1871_v39 = vadd.f32 %v1870_v62, %v5028_v37 }
 0x1b6   : > { %v1872_v9 = vpop.f32.mrf.mxu1  ;;  %v2736_v31 = vpop.f32.mrf.mxu0 }
 0x1b7   : > { %2869 = vst [vmem:[%s5059_s4 + $0x40] sm:$0xff] %v5101_v0 }
 0x1b8   : > { %v1875_v14 = vpop.f32.mrf.mxu1  ;;  %v2737_v22 = vpop.f32.mrf.mxu0 }
 0x1b9   : > { %v5106_v18 = vadd.f32 %v2737_v22, %v1871_v39  ;;  %v1876_v1 = vadd.f32 %v1875_v14, %v5032_v34 }
 0x1ba   : > { %v1877_v13 = vpop.f32.mrf.mxu1  ;;  %v2739_v36 = vpop.f32.mrf.mxu0 }
 0x1bb   : > { %2870 = vst [vmem:[%s5059_s4 + $0x48] sm:$0xff] %v5106_v18 }
 0x1bc   : > { %v1878_v19 = vpop.f32.mrf.mxu1  ;;  %v2742_v54 = vpop.f32.mrf.mxu0 }
 0x1bd   : > { %v5111_v55 = vadd.f32 %v2742_v54, %v1876_v1  ;;  %v1879_v37 = vadd.f32 %v1878_v19, %v5036_v51  ;;  %v2932_v54 = vmul.f32 %v5066_v21, %v5066_v21 }
 0x1be   : > { %v1880_v6 = vpop.f32.mrf.mxu1  ;;  %v2744_v58 = vpop.f32.mrf.mxu0 }
 0x1bf   : > { %2871 = vst [vmem:[%s5059_s4 + $0x50] sm:$0xff] %v5111_v55 }
 0x1c0   : > { %v1883_v57 = vpop.f32.mrf.mxu1  ;;  %v2745_v17 = vpop.f32.mrf.mxu0 }
 0x1c1   : > { %v5116_v61 = vadd.f32 %v2745_v17, %v1879_v37  ;;  %v1884_v34 = vadd.f32 %v1883_v57, %v5040_v20  ;;  %v2931_v37 = vmul.f32 %v5061_v47, %v5061_v47  ;;  %v2893_v57 = vadd.f32 %v5066_v21, %v5061_v47 }
 0x1c2   : > { %v1885_v59 = vpop.f32.mrf.mxu1  ;;  %v2747_v40 = vpop.f32.mrf.mxu0 }
 0x1c3   : > { %2872 = vst [vmem:[%s5059_s4 + $0x58] sm:$0xff] %v5116_v61 }
 0x1c4   : > { %v1886_v7 = vpop.f32.mrf.mxu1  ;;  %v2750_v26 = vpop.f32.mrf.mxu0 }
 0x1c5   : > { %v5121_v29 = vadd.f32 %v2750_v26, %v1884_v34  ;;  %v1887_v51 = vadd.f32 %v1886_v7, %v5044_v44  ;;  %v2963_v34 = vadd.f32 %v2932_v54, %v2931_v37  ;;  %v2894_v7 = vadd.f32 %v2893_v57, %v5071_v48 }
 0x1c6   : > { %v1888_v49 = vpop.f32.mrf.mxu1  ;;  %v2752_v46 = vpop.f32.mrf.mxu0  ;;  %v2934_v26 = vmul.f32 %v5076_v27, %v5076_v27 }
 0x1c7   : > { %2873 = vst [vmem:[%s5059_s4 + $0x60] sm:$0xff] %v5121_v29 }
 0x1c8   : > { %v1891_v32 = vpop.f32.mrf.mxu1  ;;  %v2753_v42 = vpop.f32.mrf.mxu0 }
 0x1c9   : > { %v5126_v60 = vadd.f32 %v2753_v42, %v1887_v51  ;;  %v1892_v20 = vadd.f32 %v1891_v32, %v5048_v41  ;;  %v2895_v51 = vadd.f32 %v2894_v7, %v5076_v27 }
 0x1ca   : > { %v1893_v28 = vpop.f32.mrf.mxu1  ;;  %v2755_v38 = vpop.f32.mrf.mxu0 }
 0x1cb   : > { %2874 = vst [vmem:[%s5059_s4 + $0x68] sm:$0xff] %v5126_v60  ;;  %v2896_v38 = vadd.f32 %v2895_v51, %v5081_v11 }
 0x1cc   : > { %v1894_v23 = vpop.f32.mrf.mxu1  ;;  %v2758_v62 = vpop.f32.mrf.mxu0 }
 0x1cd   : > { %v5131_v33 = vadd.f32 %v2758_v62, %v1892_v20  ;;  %v1895_v44 = vadd.f32 %v1894_v23, %v5052_v10  ;;  %v2936_v20 = vmul.f32 %v5086_v63, %v5086_v63 }
 0x1ce   : > { %v1896_v9 = vpop.f32.mrf.mxu1  ;;  %v2760_v31 = vpop.f32.mrf.mxu0 }
 0x1cf   : > { %2875 = vst [vmem:[%s5059_s4 + $0x70] sm:$0xff] %v5131_v33  ;;  %v2897_v31 = vadd.f32 %v2896_v38, %v5086_v63 }
 0x1d0   : > { %v1899_v39 = vpop.f32.mrf.mxu1  ;;  %v2761_v14 = vpop.f32.mrf.mxu0 }
 0x1d1   : > { %v5136_v22 = vadd.f32 %v2761_v14, %v1895_v44  ;;  %v1900_v41 = vadd.f32 %v1899_v39, %v4990_v12  ;;  %v2933_v12 = vmul.f32 %v5071_v48, %v5071_v48 }
 0x1d2   : > { %v1901_v13 = vpop.f32.mrf.mxu1  ;;  %v2763_v36 = vpop.f32.mrf.mxu0 }
 0x1d3   : > { %2876 = vst [vmem:[%s5059_s4 + $0x78] sm:$0xff] %v5136_v22  ;;  %v2964_v21 = vadd.f32 %v2963_v34, %v2933_v12  ;;  %v2898_v13 = vadd.f32 %v2897_v31, %v5091_v35  ;;  %v2938_v36 = vmul.f32 %v5096_v3, %v5096_v3  ;;  %v2940_v12 = vmul.f32 %v5106_v18, %v5106_v18 }
 0x1d4   : > { %v1902_v1 = vpop.f32.mrf.mxu1  ;;  %v2766_v19 = vpop.f32.mrf.mxu0 }
 0x1d5   : > { %v5143_v6 = vadd.f32 %v2766_v19, %v1900_v41  ;;  %v1903_v17 = vadd.f32 %v1902_v1, %v4994_v45  ;;  %v2935_v45 = vmul.f32 %v5081_v11, %v5081_v11  ;;  %v2965_v28 = vadd.f32 %v2964_v21, %v2934_v26 }
 0x1d6   : > { %v1904_v10 = vpop.f32.mrf.mxu1  ;;  %v2768_v58 = vpop.f32.mrf.mxu0  ;;  %v2899_v54 = vadd.f32 %v2898_v13, %v5096_v3  ;;  %v2942_v21 = vmul.f32 %v5116_v61, %v5116_v61  ;;  %v2946_v13 = vmul.f32 %v5136_v22, %v5136_v22 }
 0x1d7   : > { %2877 = vst [vmem:[%s5059_s4 + $0x80] sm:$0xff] %v5143_v6  ;;  %v2966_v9 = vadd.f32 %v2965_v28, %v2935_v45 }
 0x1d8   : > { %v1907_v59 = vpop.f32.mrf.mxu1  ;;  %v2769_v40 = vpop.f32.mrf.mxu0  ;;  %v2900_v57 = vadd.f32 %v2899_v54, %v5101_v0 }
 0x1d9   : > { %v5157_v49 = vadd.f32 %v2769_v40, %v1903_v17  ;;  %v1908_v32 = vadd.f32 %v1907_v59, %v4998_v25  ;;  %v2937_v25 = vmul.f32 %v5091_v35, %v5091_v35  ;;  %v2967_v14 = vadd.f32 %v2966_v9, %v2936_v20 }
 0x1da   : > { %v1909_v46 = vpop.f32.mrf.mxu1  ;;  %v2771_v47 = vpop.f32.mrf.mxu0  ;;  %v2901_v34 = vadd.f32 %v2900_v57, %v5106_v18 }
 0x1db   : > { %2878 = vst [vmem:[%s5059_s4 + $0x88] sm:$0xff] %v5157_v49  ;;  %v2968_v19 = vadd.f32 %v2967_v14, %v2937_v25 }
 0x1dc   : > { %v1910_v42 = vpop.f32.mrf.mxu1  ;;  %v2774_v48 = vpop.f32.mrf.mxu0  ;;  %v2902_v47 = vadd.f32 %v2901_v34, %v5111_v55 }
 0x1dd   : > { %v5168_v23 = vadd.f32 %v2774_v48, %v1908_v32  ;;  %v1911_v44 = vadd.f32 %v1910_v42, %v5002_v2  ;;  %v2939_v2 = vmul.f32 %v5101_v0, %v5101_v0  ;;  %v2969_v37 = vadd.f32 %v2968_v19, %v2938_v36 }
 0x1de   : > { %v1912_v62 = vpop.f32.mrf.mxu1  ;;  %v2776_v27 = vpop.f32.mrf.mxu0  ;;  %v2903_v42 = vadd.f32 %v2902_v47, %v5116_v61 }
 0x1df   : > { %2879 = vst [vmem:[%s5059_s4 + $0x90] sm:$0xff] %v5168_v23  ;;  %v2970_v40 = vadd.f32 %v2969_v37, %v2939_v2  ;;  %v2944_v62 = vmul.f32 %v5126_v60, %v5126_v60 }
 0x1e0   : > { %v1915_v39 = vpop.f32.mrf.mxu1  ;;  %v2777_v11 = vpop.f32.mrf.mxu0  ;;  %v2904_v20 = vadd.f32 %v2903_v42, %v5121_v29 }
 0x1e1   : > { %v5179_v41 = vadd.f32 %v2777_v11, %v1911_v44  ;;  %v1916_v10 = vadd.f32 %v1915_v39, %v5006_v4  ;;  %v2941_v4 = vmul.f32 %v5111_v55, %v5111_v55  ;;  %v2971_v46 = vadd.f32 %v2970_v40, %v2940_v12 }
 0x1e2   : > { %v1917_v1 = vpop.f32.mrf.mxu1  ;;  %v2779_v63 = vpop.f32.mrf.mxu0  ;;  %v2905_v25 = vadd.f32 %v2904_v20, %v5126_v60 }
 0x1e3   : > { %2880 = vst [vmem:[%s5059_s4 + $0x98] sm:$0xff] %v5179_v41  ;;  %v2972_v32 = vadd.f32 %v2971_v46, %v2941_v4 }
 0x1e4   : > { %v1918_v58 = vpop.f32.mrf.mxu1  ;;  %v2782_v35 = vpop.f32.mrf.mxu0  ;;  %v2906_v14 = vadd.f32 %v2905_v25, %v5131_v33 }
 0x1e5   : > { %v5190_v17 = vadd.f32 %v2782_v35, %v1916_v10  ;;  %v1919_v7 = vadd.f32 %v1918_v58, %v5010_v52  ;;  %v2943_v52 = vmul.f32 %v5121_v29, %v5121_v29  ;;  %v2973_v38 = vadd.f32 %v2972_v32, %v2942_v21 }
 0x1e6   : > { %v1920_v59 = vpop.f32.mrf.mxu1  ;;  %v2784_v3 = vpop.f32.mrf.mxu0  ;;  %v2907_v19 = vadd.f32 %v2906_v14, %v5136_v22  ;;  %v2948_v35 = vmul.f32 %v5157_v49, %v5157_v49 }
 0x1e7   : > { %2881 = vst [vmem:[%s5059_s4 + $0xa0] sm:$0xff] %v5190_v17  ;;  %v2974_v31 = vadd.f32 %v2973_v38, %v2943_v52  ;;  %v2949_v3 = vmul.f32 %v5168_v23, %v5168_v23  ;;  %v2951_v21 = vmul.f32 %v5190_v17, %v5190_v17 }
 0x1e8   : > { %v1923_v26 = vpop.f32.mrf.mxu1  ;;  %v2785_v0 = vpop.f32.mrf.mxu0 }
 0x1e9   : > { %v5201_v51 = vadd.f32 %v2785_v0, %v1919_v7  ;;  %v1924_v48 = vadd.f32 %v1923_v26, %v5014_v5  ;;  %v2945_v5 = vmul.f32 %v5131_v33, %v5131_v33  ;;  %v2975_v11 = vadd.f32 %v2974_v31, %v2944_v62 }
 0x1ea   : > { %v1925_v45 = vpop.f32.mrf.mxu1  ;;  %v2787_v18 = vpop.f32.mrf.mxu0  ;;  %v2908_v33 = vadd.f32 %v2907_v19, %v5143_v6  ;;  %v2950_v7 = vmul.f32 %v5179_v41, %v5179_v41 }
 0x1eb   : > { %2882 = vst [vmem:[%s5059_s4 + $0xa8] sm:$0xff] %v5201_v51  ;;  %v2976_v60 = vadd.f32 %v2975_v11, %v2945_v5  ;;  %v2952_v42 = vmul.f32 %v5201_v51, %v5201_v51 }
 0x1ec   : > { %v1926_v28 = vpop.f32.mrf.mxu1  ;;  %v2790_v55 = vpop.f32.mrf.mxu0  ;;  %v2909_v22 = vadd.f32 %v2908_v33, %v5157_v49 }
 0x1ed   : > { %v5212_v27 = vadd.f32 %v2790_v55, %v1924_v48  ;;  %v1927_v44 = vadd.f32 %v1926_v28, %v5018_v8  ;;  %v2947_v8 = vmul.f32 %v5143_v6, %v5143_v6  ;;  %v2977_v58 = vadd.f32 %v2976_v60, %v2946_v13 }
 0x1ee   : > { %v1928_v9 = vpop.f32.mrf.mxu1  ;;  %v2792_v61 = vpop.f32.mrf.mxu0  ;;  %v2910_v6 = vadd.f32 %v2909_v22, %v5168_v23 }
 0x1ef   : > { %2883 = vst [vmem:[%s5059_s4 + $0xb0] sm:$0xff] %v5212_v27  ;;  %v2978_v59 = vadd.f32 %v2977_v58, %v2947_v8  ;;  %v2953_v38 = vmul.f32 %v5212_v27, %v5212_v27 }
 0x1f0   : > { %v1931_v39 = vpop.f32.mrf.mxu1  ;;  %v2793_v29 = vpop.f32.mrf.mxu0  ;;  %v2911_v49 = vadd.f32 %v2910_v6, %v5179_v41 }
 0x1f1   : > { %v2852_v36 = vadd.f32 %v2793_v29, %v1927_v44  ;;  %v1932_v54 = vadd.f32 %v1931_v39, %v5022_v15  ;;  %v2979_v4 = vadd.f32 %v2978_v59, %v2948_v35 }
 0x1f2   : > { %v1933_v1 = vpop.f32.mrf.mxu1  ;;  %v2795_v63 = vpop.f32.mrf.mxu0  ;;  %v2912_v23 = vadd.f32 %v2911_v49, %v5190_v17 }
 0x1f3   : > { %2884 = vst [vmem:[%s5059_s4 + $0xb8] sm:$0xff] %v2852_v36  ;;  %v2980_v47 = vadd.f32 %v2979_v4, %v2949_v3  ;;  %v2954_v61 = vmul.f32 %v2852_v36, %v2852_v36 }
 0x1f4   : > { %v1934_v2 = vpop.f32.mrf.mxu1  ;;  %v2798_v10 = vpop.f32.mrf.mxu0  ;;  %v2913_v41 = vadd.f32 %v2912_v23, %v5201_v51 }
 0x1f5   : > { %v2853_v37 = vadd.f32 %v2798_v10, %v1932_v54  ;;  %v1935_v15 = vadd.f32 %v1934_v2, %v5026_v53  ;;  %v2981_v32 = vadd.f32 %v2980_v47, %v2950_v7 }
 0x1f6   : > { %v1936_v57 = vpop.f32.mrf.mxu1  ;;  %v2800_v12 = vpop.f32.mrf.mxu0  ;;  %v2914_v17 = vadd.f32 %v2913_v41, %v5212_v27 }
 0x1f7   : > { %2885 = vst [vmem:[%s5059_s4 + $0xc0] sm:$0xff] %v2853_v37  ;;  %v2982_v55 = vadd.f32 %v2981_v32, %v2951_v21  ;;  %v2955_v51 = vmul.f32 %v2853_v37, %v2853_v37 }
 0x1f8   : > { %v1939_v40 = vpop.f32.mrf.mxu1  ;;  %v2801_v34 = vpop.f32.mrf.mxu0  ;;  %v2915_v39 = vadd.f32 %v2914_v17, %v2852_v36 }
 0x1f9   : > { %v2854_v26 = vadd.f32 %v2801_v34, %v1935_v15  ;;  %v1940_v53 = vadd.f32 %v1939_v40, %v5030_v24  ;;  %v2983_v9 = vadd.f32 %v2982_v55, %v2952_v42 }
 0x1fa   : > { %v1941_v0 = vpop.f32.mrf.mxu1  ;;  %v2803_v46 = vpop.f32.mrf.mxu0  ;;  %v2916_v13 = vadd.f32 %v2915_v39, %v2853_v37 }
 0x1fb   : > { %2886 = vst [vmem:[%s5059_s4 + $0xc8] sm:$0xff] %v2854_v26  ;;  %v2984_v44 = vadd.f32 %v2983_v9, %v2953_v38  ;;  %v2956_v1 = vmul.f32 %v2854_v26, %v2854_v26 }
 0x1fc   : > { %v1942_v45 = vpop.f32.mrf.mxu1  ;;  %v2806_v18 = vpop.f32.mrf.mxu0  ;;  %v2917_v8 = vadd.f32 %v2916_v13, %v2854_v26 }
 0x1fd   : > { %v2855_v52 = vadd.f32 %v2806_v18, %v1940_v53  ;;  %v1943_v24 = vadd.f32 %v1942_v45, %v5034_v16  ;;  %v2985_v16 = vadd.f32 %v2984_v44, %v2954_v61 }
 0x1fe   : > { %v1944_v48 = vpop.f32.mrf.mxu1  ;;  %v2808_v28 = vpop.f32.mrf.mxu0 }
 0x1ff   : > { %2887 = vst [vmem:[%s5059_s4 + $0xd0] sm:$0xff] %v2855_v52  ;;  %v2986_v27 = vadd.f32 %v2985_v16, %v2955_v51  ;;  %v2957_v54 = vmul.f32 %v2855_v52, %v2855_v52 }
 0x200   : > { %v1947_v20 = vpop.f32.mrf.mxu1  ;;  %v2809_v62 = vpop.f32.mrf.mxu0 }
 0x201   : > { %v2856_v31 = vadd.f32 %v2809_v62, %v1943_v24  ;;  %v1948_v29 = vadd.f32 %v1947_v20, %v5038_v56  ;;  %v2987_v58 = vadd.f32 %v2986_v27, %v2956_v1  ;;  %v2918_v56 = vadd.f32 %v2917_v8, %v2855_v52 }
 0x202   : > { %v1949_v25 = vpop.f32.mrf.mxu1  ;;  %v2811_v5 = vpop.f32.mrf.mxu0 }
 0x203   : > { %2888 = vst [vmem:[%s5059_s4 + $0xd8] sm:$0xff] %v2856_v31  ;;  %v2958_v33 = vmul.f32 %v2856_v31, %v2856_v31  ;;  %v2988_v37 = vadd.f32 %v2987_v58, %v2957_v54  ;;  %v2919_v59 = vadd.f32 %v2918_v56, %v2856_v31 }
 0x204   : > { %v1950_v11 = vpop.f32.mrf.mxu1  ;;  %v2814_v14 = vpop.f32.mrf.mxu0 }
 0x205   : > { %v2857_v63 = vadd.f32 %v2814_v14, %v1948_v29  ;;  %v1951_v2 = vadd.f32 %v1950_v11, %v5042_v50  ;;  %v2989_v34 = vadd.f32 %v2988_v37, %v2958_v33 }
 0x206   : > { %v1952_v60 = vpop.f32.mrf.mxu1  ;;  %v2816_v19 = vpop.f32.mrf.mxu0 }
 0x207   : > { %2889 = vst [vmem:[%s5059_s4 + $0xe0] sm:$0xff] %v2857_v63  ;;  %v2959_v22 = vmul.f32 %v2857_v63, %v2857_v63  ;;  %v2920_v50 = vadd.f32 %v2919_v59, %v2857_v63 }
 0x208   : > { %v1955_v36 = vpop.f32.mrf.mxu1  ;;  %v2817_v10 = vpop.f32.mrf.mxu0 }
 0x209   : > { %v2858_v35 = vadd.f32 %v2817_v10, %v1951_v2  ;;  %v1956_v3 = vadd.f32 %v1955_v36, %v5046_v43  ;;  %v2990_v0 = vadd.f32 %v2989_v34, %v2959_v22 }
 0x20a   : > { %v1957_v57 = vpop.f32.mrf.mxu1  ;;  %v2819_v12 = vpop.f32.mrf.mxu0 }
 0x20b   : > { %2890 = vst [vmem:[%s5059_s4 + $0xe8] sm:$0xff] %v2858_v35  ;;  %v2960_v4 = vmul.f32 %v2858_v35, %v2858_v35  ;;  %v2921_v46 = vadd.f32 %v2920_v50, %v2858_v35 }
 0x20c   : > { %v1958_v15 = vpop.f32.mrf.mxu1  ;;  %v2822_v40 = vpop.f32.mrf.mxu0 }
 0x20d   : > { %v2859_v6 = vadd.f32 %v2822_v40, %v1956_v3  ;;  %v1959_v47 = vadd.f32 %v1958_v15, %v5050_v30  ;;  %v2991_v53 = vadd.f32 %v2990_v0, %v2960_v4 }
 0x20e   : > { %v1960_v7 = vpop.f32.mrf.mxu1  ;;  %v2824_v26 = vpop.f32.mrf.mxu0 }
 0x20f   : > { %2891 = vst [vmem:[%s5059_s4 + $0xf0] sm:$0xff] %v2859_v6  ;;  %v2961_v49 = vmul.f32 %v2859_v6, %v2859_v6  ;;  %v2922_v45 = vadd.f32 %v2921_v46, %v2859_v6 }
 0x210   : > { %v2825_v21 = vpop.f32.mrf.mxu0 }
 0x211   : > { %v2860_v43 = vadd.f32 %v2825_v21, %v1959_v47  ;;  %v2992_v32 = vadd.f32 %v2991_v53, %v2961_v49 }
 0x212   : > { %v2827_v18 = vpop.f32.mrf.mxu0 }
 0x213   : > { %2892 = vst [vmem:[%s5059_s4 + $0xf8] sm:$0xff] %v2860_v43  ;;  %v2923_v23 = vadd.f32 %v2922_v45, %v2860_v43  ;;  %v2962_v42 = vmul.f32 %v2860_v43, %v2860_v43 }
 0x215   : > { %v2924_v52 = vrot.slane %v2923_v23, 4  ;;  %v2993_v48 = vadd.f32 %v2992_v32, %v2962_v42 }
 0x217   : > { %v2925_v28 = vadd.f32 %v2924_v52, %v2923_v23  ;;  %v2994_v55 = vrot.slane %v2993_v48, 4 }
 0x219   : > { %v2926_v41 = vrot.slane %v2925_v28, 2  ;;  %v2995_v38 = vadd.f32 %v2994_v55, %v2993_v48 }
 0x21b   : > { %v2927_v24 = vadd.f32 %v2926_v41, %v2925_v28  ;;  %v2996_v30 = vrot.slane %v2995_v38, 2 }
 0x21d   : > { %v2928_v20 = vrot.slane %v2927_v24, 1  ;;  %v2997_v62 = vadd.f32 %v2996_v30, %v2995_v38 }
 0x21f   : > { %v2998_v9 = vrot.slane %v2997_v62, 1  ;;  %v2929_v17 = vadd.f32 %v2928_v20, %v2927_v24 }
 0x221   : > { %v2999_v61 = vadd.f32 %v2998_v9, %v2997_v62 }
 0x223   : > { %v3002_v31 = vsel %vm3001_vm3, %v2929_v17, %v2999_v61 }
 0x224   : > { %3003 = vst [vmem:[%s225_s8] sm:$0x3] %v3002_v31 }
 0x225 PF: > { %s14_s14 = sadd.s32 1, %s3874_s14   ;;  %s5351_s12 = smov %s3870_s13 }
 0x226   : > { %p11_p5 = scmp.ge.s32.totalorder %s14_s14, 4   ;;  %s5352_s13 = smov %s5354_s15 }
 0x228   :  { %13 = sbr.rel (!%p11_p5) target bundleno = 2 (0x2), region = 74 }

</bundles_post_ra>
